<compile_context>
chip_gen: v5e
topology: v5e:2x2
jax: 0.10.0
libtpu: 0.0.40
codegen_flags: <defaults>
</compile_context>

<pallas_src>
import jax
import jax.numpy as jnp
from jax.experimental import pallas as pl
from jax.experimental.pallas import tpu as pltpu


def _lstm_last_hidden_kernel(x_ref, wih_ref, whh_ref, b_ref, out_ref, gx_ref):
    """One tile of B*T samples: run the LSTM over S, emit only the final hidden state.

    x_ref:   (tn, S, E)   bf16 inputs for this tile (batch-major)
    wih_ref: (E, 4H)      bf16 W_ih^T  (PyTorch gate order: i, f, g, o)
    whh_ref: (H, 4H)      bf16 W_hh^T
    b_ref:   (1, 4H)      f32  b_ih + b_hh
    out_ref: (tn, H)      f32  h_S for this tile
    gx_ref:  (tn, S, 4H)  f32  VMEM scratch for the hoisted input projection
    """
    tn, S, E = x_ref.shape
    H = whh_ref.shape[0]

    # Weights / bias loaded once (hoisted out of the unrolled recurrence).
    wih = wih_ref[...]
    whh = whh_ref[...]
    b = b_ref[...]

    # Input projection hoisted out of the recurrence: ONE big bf16 MXU matmul over
    # all timesteps of the tile with the bias folded in, staged into an explicit
    # VMEM scratch so the (tn, S, 4H) slab never lives in vregs across the unrolled
    # loop (bounds live ranges; one predictable vld per step that hides under the
    # recurrent matmul).
    x = x_ref[...]
    gx_ref[...] = (
        jnp.dot(x.reshape(tn * S, E), wih, preferred_element_type=jnp.float32) + b
    ).reshape(tn, S, 4 * H)

    # Recurrent part: h and c are loop-carried VALUES. All gate elementwise math and
    # the c/h state stay strictly in f32 (mandatory on v5e: no bf16 VPU/EUP path);
    # only the MXU operands are bf16.
    h = jnp.zeros((tn, H), jnp.float32)
    c = jnp.zeros((tn, H), jnp.float32)

    # S is small and static -> unrolled; each step is one bf16 MXU op (h @ W_hh^T)
    # plus two full-width EUP launches + VPU elementwise work.
    # TODO(synk): if S grows large, switch to lax.fori_loop with (h, c) carry.
    # TODO(synk): optional further win: hold W_hh in the MXU weight registers across
    #             the recurrence via pltpu.matmul_push_rhs / matmul_acc_lhs.
    for t in range(S):
        gates = gx_ref[:, t, :] + jnp.dot(
            h.astype(jnp.bfloat16), whh, preferred_element_type=jnp.float32
        )
        # Full-width sigmoid/tanh over the whole (tn, 4H) slab: 2 EUP launches at
        # 100% lane utilization instead of 4 quarter-width (32-lane) gate slices.
        s = jax.nn.sigmoid(gates)
        g_t = jnp.tanh(gates)
        i_g = s[:, 0 * H:1 * H]
        f_g = s[:, 1 * H:2 * H]
        o_g = s[:, 3 * H:4 * H]
        g_g = g_t[:, 2 * H:3 * H]
        c = f_g * c + i_g * g_g
        h = o_g * jnp.tanh(c)

    out_ref[...] = h


def _pick_tiling(N, cap):
    """Choose (tile_n, n_pad): tile_n a multiple of 8 dividing n_pad, tile_n <= cap.

    Prefers >= 2 tiles (so the 'parallel' grid axis can shard across v7x's two
    TensorCores) and avoids padding x whenever N has a usable divisor.
    """
    n8 = -(-N // 8) * 8
    if n8 <= cap:
        if n8 >= 16 and (n8 // 2) % 8 == 0:
            return n8 // 2, n8          # two tiles, no extra padding beyond N->n8
        return n8, n8                    # single tile
    best = 8
    for t in range(cap, 7, -8):          # largest multiple-of-8 divisor of n8 <= cap
        if n8 % t == 0:
            best = t
            break
    if best >= cap // 8:
        return best, n8                  # decent divisor -> no padding copy of x
    # Pathological N (large prime factor): pad up rather than running a huge grid
    # of tiny tiles (each grid step carries a full serial S-chain).
    n_pad = -(-n8 // cap) * cap
    return cap, n_pad


def _vmem_limit_bytes(tile_n, S, E, H):
    """Budget: double-buffered bf16 x block + f32 gates scratch + f32 out block
    (+ weights), with headroom for recurrence temporaries/spills; capped safely
    below v7x's 64 MiB physical VMEM, generous on v5e/v6e's 128 MiB."""
    lane = 128
    x_blk = tile_n * S * max(E, lane) * 2            # bf16, lane-padded
    gates = tile_n * S * max(4 * H, lane) * 4        # f32 scratch
    out_blk = tile_n * max(H, lane) * 4              # f32, lane-padded
    weights = (E + H + 1) * max(4 * H, lane) * 4
    need = 2 * x_blk + gates + 2 * out_blk + 2 * weights
    return int(min(max(3 * need, 16 << 20), 48 << 20))


def time_distributed_forward(x, w_ih, w_hh, b_ih, b_hh, *, tile_n=None, tile_n_cap=512):
    """Pallas equivalent of time_distributed.forward (inference / eval mode).

    x: (B, T, S, E) float32. Returns (B, T, H) float32.
    """
    # TODO(synk): nn.Dropout is identity in eval mode; training-time dropout mask
    # is not implemented here.
    B, T, S, E = x.shape
    H = w_hh.shape[1]
    N = B * T

    if tile_n is None:
        # tile_n is a sweep parameter; the cap (default 512, try 512-2048 subject
        # to the VMEM budget) trades fewer serial S-chains against VMEM/vreg use.
        tile_n, n_pad = _pick_tiling(N, tile_n_cap)
    else:
        tile_n = max(8, (tile_n // 8) * 8)
        n_pad = -(-N // tile_n) * tile_n

    # Glue in plain JAX: fold (B, T) -> N. bf16 matmul operands halve the x DMA
    # bytes and run natively on the MXU; bias / state / elementwise stay f32.
    x_nse = x.reshape(N, S, E).astype(jnp.bfloat16)                  # (N, S, E)
    wih_t = jnp.asarray(w_ih, jnp.float32).T.astype(jnp.bfloat16)    # (E, 4H)
    whh_t = jnp.asarray(w_hh, jnp.float32).T.astype(jnp.bfloat16)    # (H, 4H)
    bias = (b_ih + b_hh).astype(jnp.float32).reshape(1, 4 * H)

    if n_pad != N:
        # Only hit when N % 8 != 0 or N has no usable divisor <= cap; padded rows
        # run on zero inputs and their outputs are dropped below.
        x_nse = jnp.pad(x_nse, ((0, n_pad - N), (0, 0), (0, 0)))

    grid = (n_pad // tile_n,)
    out = pl.pallas_call(
        _lstm_last_hidden_kernel,
        out_shape=jax.ShapeDtypeStruct((n_pad, H), jnp.float32),
        grid_spec=pltpu.PrefetchScalarGridSpec(
            num_scalar_prefetch=0,
            grid=grid,
            in_specs=[
                pl.BlockSpec((tile_n, S, E), lambda i: (i, 0, 0)),
                pl.BlockSpec((E, 4 * H), lambda i: (0, 0)),
                pl.BlockSpec((H, 4 * H), lambda i: (0, 0)),
                pl.BlockSpec((1, 4 * H), lambda i: (0, 0)),
            ],
            out_specs=pl.BlockSpec((tile_n, H), lambda i: (i, 0)),
            scratch_shapes=[pltpu.VMEM((tile_n, S, 4 * H), jnp.float32)],
        ),
        compiler_params=pltpu.CompilerParams(
            dimension_semantics=("parallel",),
            vmem_limit_bytes=_vmem_limit_bytes(tile_n, S, E, H),
        ),
    )(x_nse, wih_t, whh_t, bias)

    return out[:N].reshape(B, T, H)


def _reference_forward(x, w_ih, w_hh, b_ih, b_hh):
    """Pure-JAX f32 reference matching torch: LSTM over S, take out[:, -1, :] per t."""
    B, T, S, E = x.shape
    H = w_hh.shape[1]
    xf = x.reshape(B * T, S, E)
    h = jnp.zeros((B * T, H), jnp.float32)
    c = jnp.zeros((B * T, H), jnp.float32)
    for t in range(S):
        gates = xf[:, t] @ w_ih.T + h @ w_hh.T + b_ih + b_hh
        i, f, g, o = jnp.split(gates, 4, axis=-1)
        i, f, g, o = jax.nn.sigmoid(i), jax.nn.sigmoid(f), jnp.tanh(g), jax.nn.sigmoid(o)
        c = f * c + i * g
        h = o * jnp.tanh(c)
    return h.reshape(B, T, H)


if __name__ == "__main__":
    # Small shapes implied by the module: x is (batch, timesteps, seq, embedding_dim).
    B, T, S, E, H = 2, 8, 8, 32, 32

    key = jax.random.PRNGKey(0)
    kx, k1, k2, k3, k4 = jax.random.split(key, 5)

    # Deterministic PyTorch-style init: U(-1/sqrt(H), 1/sqrt(H)); gate order i,f,g,o.
    bound = 1.0 / (H ** 0.5)
    w_ih = jax.random.uniform(k1, (4 * H, E), jnp.float32, -bound, bound)
    w_hh = jax.random.uniform(k2, (4 * H, H), jnp.float32, -bound, bound)
    b_ih = jax.random.uniform(k3, (4 * H,), jnp.float32, -bound, bound)
    b_hh = jax.random.uniform(k4, (4 * H,), jnp.float32, -bound, bound)

    x = jax.random.normal(kx, (B, T, S, E), jnp.float32)

    out = time_distributed_forward(x, w_ih, w_hh, b_ih, b_hh)
    out = jax.block_until_ready(out)

    ref = _reference_forward(x, w_ih, w_hh, b_ih, b_hh)
    assert out.shape == (B, T, H), out.shape
    # Tolerance loosened vs the pure-f32 reference because matmul operands are bf16.
    assert jnp.allclose(out, ref, atol=3e-2, rtol=3e-2), float(jnp.max(jnp.abs(out - ref)))

    print("KERNEL_OK")
</pallas_src>

<mosaic_0001>
module attributes {stable_mosaic.version = 11 : i64} {
  func.func @_lstm_last_hidden_kernel(%arg0: i32, %arg1: memref<8x8x32xbf16, #tpu.memory_space<vmem>>, %arg2: memref<32x128xbf16, #tpu.memory_space<vmem>>, %arg3: memref<32x128xbf16, #tpu.memory_space<vmem>>, %arg4: memref<1x128xf32, #tpu.memory_space<vmem>>, %arg5: memref<8x32xf32, #tpu.memory_space<vmem>>, %arg6: memref<8x8x128xf32, #tpu.memory_space<vmem>>) attributes {dimension_semantics = [#tpu.dimension_semantics<parallel>], iteration_bounds = array<i64: 2>, scalar_prefetch = 0 : i64, scratch_operands = 1 : i64, tpu.core_type = #tpu.core_type<tc>, window_params = [{transform_indices = @transform_0, window_bounds = array<i64: 8, 8, 32>}, {pipeline_mode = #tpu.pipeline_mode<synchronous>, transform_indices = @transform_1, window_bounds = array<i64: 32, 128>}, {pipeline_mode = #tpu.pipeline_mode<synchronous>, transform_indices = @transform_2, window_bounds = array<i64: 32, 128>}, {pipeline_mode = #tpu.pipeline_mode<synchronous>, transform_indices = @transform_3, window_bounds = array<i64: 1, 128>}, {transform_indices = @transform_4, window_bounds = array<i64: 8, 32>}]} {
    %c0 = arith.constant 0 : index
    %c0_0 = arith.constant 0 : index
    %0 = vector.load %arg2[%c0, %c0_0] : memref<32x128xbf16, #tpu.memory_space<vmem>>, vector<32x128xbf16>
    %c0_1 = arith.constant 0 : index
    %c0_2 = arith.constant 0 : index
    %1 = vector.load %arg3[%c0_1, %c0_2] : memref<32x128xbf16, #tpu.memory_space<vmem>>, vector<32x128xbf16>
    %c0_3 = arith.constant 0 : index
    %c0_4 = arith.constant 0 : index
    %2 = vector.load %arg4[%c0_3, %c0_4] : memref<1x128xf32, #tpu.memory_space<vmem>>, vector<1x128xf32>
    %c0_5 = arith.constant 0 : index
    %c0_6 = arith.constant 0 : index
    %c0_7 = arith.constant 0 : index
    %3 = vector.load %arg1[%c0_5, %c0_6, %c0_7] : memref<8x8x32xbf16, #tpu.memory_space<vmem>>, vector<8x8x32xbf16>
    %4 = vector.shape_cast %3 : vector<8x8x32xbf16> to vector<64x32xbf16>
    %cst = arith.constant dense<0.000000e+00> : vector<64x128xf32>
    %5 = tpu.matmul %4, %0, %cst {dimension_numbers = #tpu.dot_dimension_numbers<[1], [0], [0], [1], [0, 0, 1, 1], [], []>} : vector<64x32xbf16>, vector<32x128xbf16>, vector<64x128xf32> -> vector<64x128xf32>
    %6 = vector.broadcast %2 : vector<1x128xf32> to vector<64x128xf32>
    %7 = arith.addf %5, %6 : vector<64x128xf32>
    %8 = vector.shape_cast %7 : vector<64x128xf32> to vector<8x8x128xf32>
    %c0_8 = arith.constant 0 : index
    %c0_9 = arith.constant 0 : index
    %c0_10 = arith.constant 0 : index
    %9 = vector.load %arg6[%c0_8, %c0_9, %c0_10] : memref<8x8x128xf32, #tpu.memory_space<vmem>>, vector<8x8x128xf32>
    tpu.vector_store %arg6[%c0_8, %c0_9, %c0_10], %8 {strides = array<i32>} : memref<8x8x128xf32, #tpu.memory_space<vmem>>, vector<8x8x128xf32>,
    %cst_11 = arith.constant 0.000000e+00 : f32
    %10 = vector.broadcast %cst_11 : f32 to vector<8x32xf32>
    %cst_12 = arith.constant 0.000000e+00 : f32
    %11 = vector.broadcast %cst_12 : f32 to vector<8x32xf32>
    %c0_13 = arith.constant 0 : index
    %c0_14 = arith.constant 0 : index
    %c0_15 = arith.constant 0 : index
    %12 = vector.load %arg6[%c0_13, %c0_14, %c0_15] : memref<8x8x128xf32, #tpu.memory_space<vmem>>, vector<8x1x128xf32>
    %13 = vector.shape_cast %12 : vector<8x1x128xf32> to vector<8x128xf32>
    %14 = arith.truncf %10 : vector<8x32xf32> to vector<8x32xbf16>
    %cst_16 = arith.constant dense<0.000000e+00> : vector<8x128xf32>
    %15 = tpu.matmul %14, %1, %cst_16 {dimension_numbers = #tpu.dot_dimension_numbers<[1], [0], [0], [1], [0, 0, 1, 1], [], []>} : vector<8x32xbf16>, vector<32x128xbf16>, vector<8x128xf32> -> vector<8x128xf32>
    %16 = arith.addf %13, %15 : vector<8x128xf32>
    %17 = arith.negf %16 : vector<8x128xf32>
    %18 = math.exp %17 : vector<8x128xf32>
    %cst_17 = arith.constant 1.000000e+00 : f32
    %19 = vector.broadcast %cst_17 : f32 to vector<8x128xf32>
    %20 = arith.addf %19, %18 : vector<8x128xf32>
    %21 = arith.divf %19, %20 : vector<8x128xf32>
    %22 = math.tanh %16 : vector<8x128xf32>
    %23 = vector.extract_strided_slice %21 {offsets = [0, 0], sizes = [8, 32], strides = [1, 1]} : vector<8x128xf32> to vector<8x32xf32>
    %24 = vector.extract_strided_slice %21 {offsets = [0, 32], sizes = [8, 32], strides = [1, 1]} : vector<8x128xf32> to vector<8x32xf32>
    %25 = vector.extract_strided_slice %21 {offsets = [0, 96], sizes = [8, 32], strides = [1, 1]} : vector<8x128xf32> to vector<8x32xf32>
    %26 = vector.extract_strided_slice %22 {offsets = [0, 64], sizes = [8, 32], strides = [1, 1]} : vector<8x128xf32> to vector<8x32xf32>
    %27 = arith.mulf %24, %11 : vector<8x32xf32>
    %28 = arith.mulf %23, %26 : vector<8x32xf32>
    %29 = arith.addf %27, %28 : vector<8x32xf32>
    %30 = math.tanh %29 : vector<8x32xf32>
    %31 = arith.mulf %25, %30 : vector<8x32xf32>
    %c0_18 = arith.constant 0 : index
    %c1 = arith.constant 1 : index
    %c0_19 = arith.constant 0 : index
    %32 = vector.load %arg6[%c0_18, %c1, %c0_19] : memref<8x8x128xf32, #tpu.memory_space<vmem>>, vector<8x1x128xf32>
    %33 = vector.shape_cast %32 : vector<8x1x128xf32> to vector<8x128xf32>
    %34 = arith.truncf %31 : vector<8x32xf32> to vector<8x32xbf16>
    %cst_20 = arith.constant dense<0.000000e+00> : vector<8x128xf32>
    %35 = tpu.matmul %34, %1, %cst_20 {dimension_numbers = #tpu.dot_dimension_numbers<[1], [0], [0], [1], [0, 0, 1, 1], [], []>} : vector<8x32xbf16>, vector<32x128xbf16>, vector<8x128xf32> -> vector<8x128xf32>
    %36 = arith.addf %33, %35 : vector<8x128xf32>
    %37 = arith.negf %36 : vector<8x128xf32>
    %38 = math.exp %37 : vector<8x128xf32>
    %cst_21 = arith.constant 1.000000e+00 : f32
    %39 = vector.broadcast %cst_21 : f32 to vector<8x128xf32>
    %40 = arith.addf %39, %38 : vector<8x128xf32>
    %41 = arith.divf %39, %40 : vector<8x128xf32>
    %42 = math.tanh %36 : vector<8x128xf32>
    %43 = vector.extract_strided_slice %41 {offsets = [0, 0], sizes = [8, 32], strides = [1, 1]} : vector<8x128xf32> to vector<8x32xf32>
    %44 = vector.extract_strided_slice %41 {offsets = [0, 32], sizes = [8, 32], strides = [1, 1]} : vector<8x128xf32> to vector<8x32xf32>
    %45 = vector.extract_strided_slice %41 {offsets = [0, 96], sizes = [8, 32], strides = [1, 1]} : vector<8x128xf32> to vector<8x32xf32>
    %46 = vector.extract_strided_slice %42 {offsets = [0, 64], sizes = [8, 32], strides = [1, 1]} : vector<8x128xf32> to vector<8x32xf32>
    %47 = arith.mulf %44, %29 : vector<8x32xf32>
    %48 = arith.mulf %43, %46 : vector<8x32xf32>
    %49 = arith.addf %47, %48 : vector<8x32xf32>
    %50 = math.tanh %49 : vector<8x32xf32>
    %51 = arith.mulf %45, %50 : vector<8x32xf32>
    %c0_22 = arith.constant 0 : index
    %c2 = arith.constant 2 : index
    %c0_23 = arith.constant 0 : index
    %52 = vector.load %arg6[%c0_22, %c2, %c0_23] : memref<8x8x128xf32, #tpu.memory_space<vmem>>, vector<8x1x128xf32>
    %53 = vector.shape_cast %52 : vector<8x1x128xf32> to vector<8x128xf32>
    %54 = arith.truncf %51 : vector<8x32xf32> to vector<8x32xbf16>
    %cst_24 = arith.constant dense<0.000000e+00> : vector<8x128xf32>
    %55 = tpu.matmul %54, %1, %cst_24 {dimension_numbers = #tpu.dot_dimension_numbers<[1], [0], [0], [1], [0, 0, 1, 1], [], []>} : vector<8x32xbf16>, vector<32x128xbf16>, vector<8x128xf32> -> vector<8x128xf32>
    %56 = arith.addf %53, %55 : vector<8x128xf32>
    %57 = arith.negf %56 : vector<8x128xf32>
    %58 = math.exp %57 : vector<8x128xf32>
    %cst_25 = arith.constant 1.000000e+00 : f32
    %59 = vector.broadcast %cst_25 : f32 to vector<8x128xf32>
    %60 = arith.addf %59, %58 : vector<8x128xf32>
    %61 = arith.divf %59, %60 : vector<8x128xf32>
    %62 = math.tanh %56 : vector<8x128xf32>
    %63 = vector.extract_strided_slice %61 {offsets = [0, 0], sizes = [8, 32], strides = [1, 1]} : vector<8x128xf32> to vector<8x32xf32>
    %64 = vector.extract_strided_slice %61 {offsets = [0, 32], sizes = [8, 32], strides = [1, 1]} : vector<8x128xf32> to vector<8x32xf32>
    %65 = vector.extract_strided_slice %61 {offsets = [0, 96], sizes = [8, 32], strides = [1, 1]} : vector<8x128xf32> to vector<8x32xf32>
    %66 = vector.extract_strided_slice %62 {offsets = [0, 64], sizes = [8, 32], strides = [1, 1]} : vector<8x128xf32> to vector<8x32xf32>
    %67 = arith.mulf %64, %49 : vector<8x32xf32>
    %68 = arith.mulf %63, %66 : vector<8x32xf32>
    %69 = arith.addf %67, %68 : vector<8x32xf32>
    %70 = math.tanh %69 : vector<8x32xf32>
    %71 = arith.mulf %65, %70 : vector<8x32xf32>
    %c0_26 = arith.constant 0 : index
    %c3 = arith.constant 3 : index
    %c0_27 = arith.constant 0 : index
    %72 = vector.load %arg6[%c0_26, %c3, %c0_27] : memref<8x8x128xf32, #tpu.memory_space<vmem>>, vector<8x1x128xf32>
    %73 = vector.shape_cast %72 : vector<8x1x128xf32> to vector<8x128xf32>
    %74 = arith.truncf %71 : vector<8x32xf32> to vector<8x32xbf16>
    %cst_28 = arith.constant dense<0.000000e+00> : vector<8x128xf32>
    %75 = tpu.matmul %74, %1, %cst_28 {dimension_numbers = #tpu.dot_dimension_numbers<[1], [0], [0], [1], [0, 0, 1, 1], [], []>} : vector<8x32xbf16>, vector<32x128xbf16>, vector<8x128xf32> -> vector<8x128xf32>
    %76 = arith.addf %73, %75 : vector<8x128xf32>
    %77 = arith.negf %76 : vector<8x128xf32>
    %78 = math.exp %77 : vector<8x128xf32>
    %cst_29 = arith.constant 1.000000e+00 : f32
    %79 = vector.broadcast %cst_29 : f32 to vector<8x128xf32>
    %80 = arith.addf %79, %78 : vector<8x128xf32>
    %81 = arith.divf %79, %80 : vector<8x128xf32>
    %82 = math.tanh %76 : vector<8x128xf32>
    %83 = vector.extract_strided_slice %81 {offsets = [0, 0], sizes = [8, 32], strides = [1, 1]} : vector<8x128xf32> to vector<8x32xf32>
    %84 = vector.extract_strided_slice %81 {offsets = [0, 32], sizes = [8, 32], strides = [1, 1]} : vector<8x128xf32> to vector<8x32xf32>
    %85 = vector.extract_strided_slice %81 {offsets = [0, 96], sizes = [8, 32], strides = [1, 1]} : vector<8x128xf32> to vector<8x32xf32>
    %86 = vector.extract_strided_slice %82 {offsets = [0, 64], sizes = [8, 32], strides = [1, 1]} : vector<8x128xf32> to vector<8x32xf32>
    %87 = arith.mulf %84, %69 : vector<8x32xf32>
    %88 = arith.mulf %83, %86 : vector<8x32xf32>
    %89 = arith.addf %87, %88 : vector<8x32xf32>
    %90 = math.tanh %89 : vector<8x32xf32>
    %91 = arith.mulf %85, %90 : vector<8x32xf32>
    %c0_30 = arith.constant 0 : index
    %c4 = arith.constant 4 : index
    %c0_31 = arith.constant 0 : index
    %92 = vector.load %arg6[%c0_30, %c4, %c0_31] : memref<8x8x128xf32, #tpu.memory_space<vmem>>, vector<8x1x128xf32>
    %93 = vector.shape_cast %92 : vector<8x1x128xf32> to vector<8x128xf32>
    %94 = arith.truncf %91 : vector<8x32xf32> to vector<8x32xbf16>
    %cst_32 = arith.constant dense<0.000000e+00> : vector<8x128xf32>
    %95 = tpu.matmul %94, %1, %cst_32 {dimension_numbers = #tpu.dot_dimension_numbers<[1], [0], [0], [1], [0, 0, 1, 1], [], []>} : vector<8x32xbf16>, vector<32x128xbf16>, vector<8x128xf32> -> vector<8x128xf32>
    %96 = arith.addf %93, %95 : vector<8x128xf32>
    %97 = arith.negf %96 : vector<8x128xf32>
    %98 = math.exp %97 : vector<8x128xf32>
    %cst_33 = arith.constant 1.000000e+00 : f32
    %99 = vector.broadcast %cst_33 : f32 to vector<8x128xf32>
    %100 = arith.addf %99, %98 : vector<8x128xf32>
    %101 = arith.divf %99, %100 : vector<8x128xf32>
    %102 = math.tanh %96 : vector<8x128xf32>
    %103 = vector.extract_strided_slice %101 {offsets = [0, 0], sizes = [8, 32], strides = [1, 1]} : vector<8x128xf32> to vector<8x32xf32>
    %104 = vector.extract_strided_slice %101 {offsets = [0, 32], sizes = [8, 32], strides = [1, 1]} : vector<8x128xf32> to vector<8x32xf32>
    %105 = vector.extract_strided_slice %101 {offsets = [0, 96], sizes = [8, 32], strides = [1, 1]} : vector<8x128xf32> to vector<8x32xf32>
    %106 = vector.extract_strided_slice %102 {offsets = [0, 64], sizes = [8, 32], strides = [1, 1]} : vector<8x128xf32> to vector<8x32xf32>
    %107 = arith.mulf %104, %89 : vector<8x32xf32>
    %108 = arith.mulf %103, %106 : vector<8x32xf32>
    %109 = arith.addf %107, %108 : vector<8x32xf32>
    %110 = math.tanh %109 : vector<8x32xf32>
    %111 = arith.mulf %105, %110 : vector<8x32xf32>
    %c0_34 = arith.constant 0 : index
    %c5 = arith.constant 5 : index
    %c0_35 = arith.constant 0 : index
    %112 = vector.load %arg6[%c0_34, %c5, %c0_35] : memref<8x8x128xf32, #tpu.memory_space<vmem>>, vector<8x1x128xf32>
    %113 = vector.shape_cast %112 : vector<8x1x128xf32> to vector<8x128xf32>
    %114 = arith.truncf %111 : vector<8x32xf32> to vector<8x32xbf16>
    %cst_36 = arith.constant dense<0.000000e+00> : vector<8x128xf32>
    %115 = tpu.matmul %114, %1, %cst_36 {dimension_numbers = #tpu.dot_dimension_numbers<[1], [0], [0], [1], [0, 0, 1, 1], [], []>} : vector<8x32xbf16>, vector<32x128xbf16>, vector<8x128xf32> -> vector<8x128xf32>
    %116 = arith.addf %113, %115 : vector<8x128xf32>
    %117 = arith.negf %116 : vector<8x128xf32>
    %118 = math.exp %117 : vector<8x128xf32>
    %cst_37 = arith.constant 1.000000e+00 : f32
    %119 = vector.broadcast %cst_37 : f32 to vector<8x128xf32>
    %120 = arith.addf %119, %118 : vector<8x128xf32>
    %121 = arith.divf %119, %120 : vector<8x128xf32>
    %122 = math.tanh %116 : vector<8x128xf32>
    %123 = vector.extract_strided_slice %121 {offsets = [0, 0], sizes = [8, 32], strides = [1, 1]} : vector<8x128xf32> to vector<8x32xf32>
    %124 = vector.extract_strided_slice %121 {offsets = [0, 32], sizes = [8, 32], strides = [1, 1]} : vector<8x128xf32> to vector<8x32xf32>
    %125 = vector.extract_strided_slice %121 {offsets = [0, 96], sizes = [8, 32], strides = [1, 1]} : vector<8x128xf32> to vector<8x32xf32>
    %126 = vector.extract_strided_slice %122 {offsets = [0, 64], sizes = [8, 32], strides = [1, 1]} : vector<8x128xf32> to vector<8x32xf32>
    %127 = arith.mulf %124, %109 : vector<8x32xf32>
    %128 = arith.mulf %123, %126 : vector<8x32xf32>
    %129 = arith.addf %127, %128 : vector<8x32xf32>
    %130 = math.tanh %129 : vector<8x32xf32>
    %131 = arith.mulf %125, %130 : vector<8x32xf32>
    %c0_38 = arith.constant 0 : index
    %c6 = arith.constant 6 : index
    %c0_39 = arith.constant 0 : index
    %132 = vector.load %arg6[%c0_38, %c6, %c0_39] : memref<8x8x128xf32, #tpu.memory_space<vmem>>, vector<8x1x128xf32>
    %133 = vector.shape_cast %132 : vector<8x1x128xf32> to vector<8x128xf32>
    %134 = arith.truncf %131 : vector<8x32xf32> to vector<8x32xbf16>
    %cst_40 = arith.constant dense<0.000000e+00> : vector<8x128xf32>
    %135 = tpu.matmul %134, %1, %cst_40 {dimension_numbers = #tpu.dot_dimension_numbers<[1], [0], [0], [1], [0, 0, 1, 1], [], []>} : vector<8x32xbf16>, vector<32x128xbf16>, vector<8x128xf32> -> vector<8x128xf32>
    %136 = arith.addf %133, %135 : vector<8x128xf32>
    %137 = arith.negf %136 : vector<8x128xf32>
    %138 = math.exp %137 : vector<8x128xf32>
    %cst_41 = arith.constant 1.000000e+00 : f32
    %139 = vector.broadcast %cst_41 : f32 to vector<8x128xf32>
    %140 = arith.addf %139, %138 : vector<8x128xf32>
    %141 = arith.divf %139, %140 : vector<8x128xf32>
    %142 = math.tanh %136 : vector<8x128xf32>
    %143 = vector.extract_strided_slice %141 {offsets = [0, 0], sizes = [8, 32], strides = [1, 1]} : vector<8x128xf32> to vector<8x32xf32>
    %144 = vector.extract_strided_slice %141 {offsets = [0, 32], sizes = [8, 32], strides = [1, 1]} : vector<8x128xf32> to vector<8x32xf32>
    %145 = vector.extract_strided_slice %141 {offsets = [0, 96], sizes = [8, 32], strides = [1, 1]} : vector<8x128xf32> to vector<8x32xf32>
    %146 = vector.extract_strided_slice %142 {offsets = [0, 64], sizes = [8, 32], strides = [1, 1]} : vector<8x128xf32> to vector<8x32xf32>
    %147 = arith.mulf %144, %129 : vector<8x32xf32>
    %148 = arith.mulf %143, %146 : vector<8x32xf32>
    %149 = arith.addf %147, %148 : vector<8x32xf32>
    %150 = math.tanh %149 : vector<8x32xf32>
    %151 = arith.mulf %145, %150 : vector<8x32xf32>
    %c0_42 = arith.constant 0 : index
    %c7 = arith.constant 7 : index
    %c0_43 = arith.constant 0 : index
    %152 = vector.load %arg6[%c0_42, %c7, %c0_43] : memref<8x8x128xf32, #tpu.memory_space<vmem>>, vector<8x1x128xf32>
    %153 = vector.shape_cast %152 : vector<8x1x128xf32> to vector<8x128xf32>
    %154 = arith.truncf %151 : vector<8x32xf32> to vector<8x32xbf16>
    %cst_44 = arith.constant dense<0.000000e+00> : vector<8x128xf32>
    %155 = tpu.matmul %154, %1, %cst_44 {dimension_numbers = #tpu.dot_dimension_numbers<[1], [0], [0], [1], [0, 0, 1, 1], [], []>} : vector<8x32xbf16>, vector<32x128xbf16>, vector<8x128xf32> -> vector<8x128xf32>
    %156 = arith.addf %153, %155 : vector<8x128xf32>
    %157 = arith.negf %156 : vector<8x128xf32>
    %158 = math.exp %157 : vector<8x128xf32>
    %cst_45 = arith.constant 1.000000e+00 : f32
    %159 = vector.broadcast %cst_45 : f32 to vector<8x128xf32>
    %160 = arith.addf %159, %158 : vector<8x128xf32>
    %161 = arith.divf %159, %160 : vector<8x128xf32>
    %162 = math.tanh %156 : vector<8x128xf32>
    %163 = vector.extract_strided_slice %161 {offsets = [0, 0], sizes = [8, 32], strides = [1, 1]} : vector<8x128xf32> to vector<8x32xf32>
    %164 = vector.extract_strided_slice %161 {offsets = [0, 32], sizes = [8, 32], strides = [1, 1]} : vector<8x128xf32> to vector<8x32xf32>
    %165 = vector.extract_strided_slice %161 {offsets = [0, 96], sizes = [8, 32], strides = [1, 1]} : vector<8x128xf32> to vector<8x32xf32>
    %166 = vector.extract_strided_slice %162 {offsets = [0, 64], sizes = [8, 32], strides = [1, 1]} : vector<8x128xf32> to vector<8x32xf32>
    %167 = arith.mulf %164, %149 : vector<8x32xf32>
    %168 = arith.mulf %163, %166 : vector<8x32xf32>
    %169 = arith.addf %167, %168 : vector<8x32xf32>
    %170 = math.tanh %169 : vector<8x32xf32>
    %171 = arith.mulf %165, %170 : vector<8x32xf32>
    %c0_46 = arith.constant 0 : index
    %c0_47 = arith.constant 0 : index
    %172 = vector.load %arg5[%c0_46, %c0_47] : memref<8x32xf32, #tpu.memory_space<vmem>>, vector<8x32xf32>
    tpu.vector_store %arg5[%c0_46, %c0_47], %171 {strides = array<i32>} : memref<8x32xf32, #tpu.memory_space<vmem>>, vector<8x32xf32>,
    return
  }
  func.func @transform_0(%arg0: i32) -> (i32, i32, i32) {
    %c0_i32 = arith.constant 0 : i32
    %c0_i32_0 = arith.constant 0 : i32
    %c0_i32_1 = arith.constant 0 : i32
    return %arg0, %c0_i32, %c0_i32_0 : i32, i32, i32
  }
  func.func @transform_1(%arg0: i32) -> (i32, i32) {
    %c0_i32 = arith.constant 0 : i32
    %c0_i32_0 = arith.constant 0 : i32
    %c0_i32_1 = arith.constant 0 : i32
    return %c0_i32, %c0_i32_0 : i32, i32
  }
  func.func @transform_2(%arg0: i32) -> (i32, i32) {
    %c0_i32 = arith.constant 0 : i32
    %c0_i32_0 = arith.constant 0 : i32
    %c0_i32_1 = arith.constant 0 : i32
    return %c0_i32, %c0_i32_0 : i32, i32
  }
  func.func @transform_3(%arg0: i32) -> (i32, i32) {
    %c0_i32 = arith.constant 0 : i32
    %c0_i32_0 = arith.constant 0 : i32
    %c0_i32_1 = arith.constant 0 : i32
    return %c0_i32, %c0_i32_0 : i32, i32
  }
  func.func @transform_4(%arg0: i32) -> (i32, i32) {
    %c0_i32 = arith.constant 0 : i32
    %c0_i32_0 = arith.constant 0 : i32
    return %arg0, %c0_i32 : i32, i32
  }
}

</mosaic_0001>

<bundles_post_ra>
// kernel: tpu_custom_call.1
= control target key start
LH: loop header
LB: loop body
LE: loop exit
PB: predicated region body
PF: predicated region fallthrough
CT: control target
= control target key end

     0   :  { %9 = vsyncpa [#allocation4], 0  ;;  %s6175_s0 = inlined_call_operand.hbm [shape: bf16[16,8,32], index: 0, kind: input, shape index: {}]   ;;  %s6176_s1 = inlined_call_operand.hbm [shape: bf16[32,128], index: 1, kind: input, shape index: {}]   ;;  %s6177_s2 = inlined_call_operand.hbm [shape: bf16[32,128], index: 2, kind: input, shape index: {}]   ;;  %s6178_s3 = inlined_call_operand.vmem [shape: f32[1,128], index: 3, kind: input, shape index: {}]   ;;  %s6179_s4 = inlined_call_operand.hbm [shape: f32[16,32], index: 4, kind: output, shape index: {}]  }
   0x1   :  { %11 = vsyncpa [#allocation4 + $0x1], 0 }
   0x2   :  { %12 = vsyncpa [#allocation7], 0 }
   0x3   :  { %13 = vsyncpa [#allocation5], 0 }
   0x4   :  { %15 = vsyncpa [#allocation5 + $0x1], 0  ;;  %s4458_s15 = smov 0   ;;  %s4460_s16 = smov 0  }
   0x5   :  { %s4462_s17 = smov 0   ;;  %s4464_s18 = smov 0  }
   0x6 LB: > { %s4479_s19 = sadd.s32 4294967295, %s4424_s18   ;;  %s3544_s20 = sadd.s32 4294967294, %s4424_s18   ;;  %s4424_s18 = sphi %s4464_s18, %s6201_s18   ;;  %s4420_s17 = sphi %s4462_s17, %s6200_s17   ;;  %s4416_s16 = sphi %s4460_s16, %s6199_s16   ;;  %s4412_s15 = sphi %s4458_s15, %s6198_s15  }
   0x7   : > { %p41_p0 = scmp.ne.s32.totalorder %s4416_s16, %s4412_s15  ;;  %p42_p1 = scmp.eq.s32.totalorder %s4479_s19, 0 }
   0x8   : > { %p128_p2 = scmp.eq.s32.totalorder %s4479_s19, 1  ;;  %p134_p3 = scmp.eq.s32.totalorder %s3544_s20, 1 }
   0x9   : > { %p4488_p4 = por %p42_p1, %p41_p0  ;;  %p3545_p5 = scmp.ge.s32.totalorder %s4424_s18, 1 }
   0xa   : > { %p4493_p6 = por %p134_p3, %p41_p0  ;;  %p141_p7 = scmp.lt.s32.totalorder %s4424_s18, 3 }
   0xb   : > { %s152_s25 = sshll.u32 %s6176_s1, 4  ;;  %s4426_s27 = smov [#allocation6]   ;;  %s153_s25 = int_to_ptr.hbm [resolvable:$true] %s152_s25 }
   0xc   : > { %p4501_p8 = pnand %p3545_p5, %p141_p7  ;;  %s154_s28 = sshll.u32 %s4426_s27, 4  ;;  %s155_s28 = int_to_ptr.vmem [resolvable:$true] %s154_s28 }
   0xd   : > { %s166_s5 = sshll.u32 %s6177_s2, 4  ;;  %s4427_s6 = smov 64   ;;  %s167_s5 = int_to_ptr.hbm [resolvable:$true] %s166_s5 }
   0xe   : > { %p3691_p9 = pneg %p4501_p8  ;;  %s4428_s7 = smov 4  }
   0xf   : > { %s4429_s8 = smov [#allocation8]   ;;  %s4520_s10 = sadd.s32 1, %s4424_s18  }
  0x10   : > { %p3692_p10 = pnand %p3691_p9, %p42_p1  ;;  %s168_s9 = sshll.u32 %s4429_s8, 4  ;;  %s169_s9 = int_to_ptr.vmem [resolvable:$true] %s168_s9 }
  0x11   : > { %s28_s11 = sadd.s32 1, %s4420_s17  ;;  %s25_s12 = ssub.s32 %s4424_s18, %s4520_s10 }
  0x12   : > { %3694 = dma.hbm_to_vmem [thread:$0]  (!%p3692_p10), %s153_s25, 256, %s155_s28, [#allocation7], %s4427_s6, %s4427_s6, %s4428_s7  }
  0x13   : > { %3697 = dma.hbm_to_vmem [thread:$0]  (!%p3692_p10), %s167_s5, 256, %s169_s9, [#allocation7], %s4427_s6, %s4427_s6, %s4428_s7  }
  0x14   : > { %p35_p12 = scmp.ne.s32.totalorder %s4420_s17, %s4416_s16  ;;  %p26_p13 = scmp.eq.s32.totalorder %s25_s12, 0 }
  0x15   : > { %p36_p0 = scmp.eq.s32.totalorder %s4424_s18, 0  ;;  %p3708_p5 = scmp.lt.s32.totalorder %s4424_s18, 2 }
  0x16   : > { %p4530_p3 = por %p128_p2, %p35_p12  ;;  %s185_s20 = sand.u32 1, %s4420_s17  }
  0x17   : > { %s4536_s14 = scalar_select %p26_p13, %s4420_s17, %s28_s11  }
  0x18   : > { %p37_p7 = por %p36_p0, %p35_p12  ;;  %s3549_s23 = sshll.u32 %s185_s20, 5 }
  0x19   : > { %s3668_s24 = sshll.u32 %s4424_s18, 5  ;;  %s189_s29 = scalar_lea.vmem [#allocation3], %s3549_s23 }
  0x1a   : > { %s194_s28 = scalar_lea.hbm %s6175_s0, %s3668_s24  ;;  %s197_s30 = sshll.u32 %s189_s29, 4  ;;  %s198_s30 = int_to_ptr.vmem [resolvable:$true] %s197_s30 }
  0x1b   : > { %s195_s5 = sshll.u32 %s194_s28, 4  ;;  %p4543_p2 = pnand %p3708_p5, %p37_p7  ;;  %s196_s5 = int_to_ptr.hbm [resolvable:$true] %s195_s5 }
  0x1c   : > { %s186_s9 = scalar_lea.sflag [#allocation4], %s185_s20  ;;  %s4324_s11 = sshra.s32 %s196_s5, 4  ;;  %s4325_s11 = int_to_ptr.hbm [resolvable:$true] %s4324_s11 }
  0x1d   : > { %s4326_s12 = scalar_lea.hbm %s4325_s11, 32  ;;  %p4328_p10 = pneg %p4543_p2 }
  0x1e   : > { %p4327_p9 = scmp.ne.s32.totalorder %s4325_s11, %s4326_s12  ;;  %s4331_s25 = scalar_lea.hbm %s6175_s0, 64 }
  0x1f   : > { %p4332_p0 = scmp.lt.s32.totalorder %s4325_s11, %s6175_s0  ;;  %p4333_p5 = scmp.lt.s32.totalorder %s4331_s25, %s4326_s12 }
  0x20   : > { %p4329_p12 = pnand %p4328_p10, %p4327_p9 }
  0x21   : > { %p4334_p7 = por %p4333_p5, %p4332_p0 }
  0x22   : > { %p4330_p13 = pneg %p4329_p12 }
  0x24   : > { %p4335_p11 = pnand %p4334_p7, %p4330_p13 }
  0x26   : > { %4338 = shalt.err (!%p4335_p11)
}
  0x27   : > { %3701 = dma.hbm_to_vmem [thread:$0]  (!%p4543_p2), %s196_s5, 512, %s198_s30, %s186_s9, %s4427_s6, %s4427_s6, %s4428_s7  }
  0x28   : > { %209 = sbr.rel (%p4501_p8) target bundleno = 4970 (0x136a), region = 36  ;;  %s4563_s20 = sand.u32 (!%p4501_p8), 1, %s4416_s16  }
  0x29   : > { %s3553_s29 = sshll.u32 (!%p4501_p8), %s4563_s20, 5  ;;  %s212_s11 = scalar_lea.sflag (!%p4501_p8), [#allocation4], %s4563_s20 }
  0x2a   : > { %s4567_s12 = scalar_lea.vmem (!%p4501_p8), [#allocation3], %s3553_s29 }
  0x2d   : > { %4399 = dma.done.wait (%p4488_p4), %s212_s11, 512  }
  0x2e   : > { %4401 = vsyncadd (%p4488_p4), %s212_s11, 4294966784 }
  0x2f   : > { %4403 = dma.done.wait (%p42_p1), [#allocation7], 512  }
  0x30   : > { %4405 = vsyncadd (%p42_p1), [#allocation7], 4294966784  ;;  %v3670_v0 = vld [vmem:[#allocation6 + $0x8] sm:$0xff]  ;;  %v4577_v1 = vld [vmem:[#allocation8 + $0x8] sm:$0xff]  ;;  %vm305_vm0 = vcmask 261120   ;;  %v4430_v6 = vmov 0  }
  0x31   : > { %324 = vmatpush.bf16.msra.mxu0 %v3670_v0  ;;  %3677 = vmatpush.bf16.msra.mxu3 %v3670_v0  ;;  %v3669_v2 = vld [vmem:[#allocation6] sm:$0xff]  ;;  %v4580_v3 = vld [vmem:[#allocation8] sm:$0xff]  ;;  %v3676_v5 = vld [vmem:[%s4567_s12 + $0x18] sm:$0xff]  ;;  %s4431_s6 = smov 64   ;;  %s4432_s7 = smov 32  }
  0x32   : > { %384 = vmatpush.bf16.msra.mxu1 %v4577_v1  ;;  %776 = vmatpush.bf16.msra.mxu2 %v4577_v1  ;;  %v3673_v4 = vld [vmem:[%s4567_s12] sm:$0xff]  ;;  %v3674_v7 = vld [vmem:[%s4567_s12 + $0x8] sm:$0xff]  ;;  %v3675_v8 = vld [vmem:[%s4567_s12 + $0x10] sm:$0xff]  ;;  %s3556_s30 = sshll.u32 %s4563_s20, 3  ;;  %s3665_s5 = sshll.u32 %s4479_s19, 3 }
  0x33   : > { %v3751_v9 = vld [vmem:[%s6178_s3] ss:$0 sm:$0xff]  ;;  %s3450_s24 = scalar_lea.hbm %s6179_s4, %s3665_s5  ;;  %s250_s23 = scalar_lea.vmem [#allocation9], %s3556_s30 }
  0x34   : > { %s3452_s25 = sshll.u32 %s250_s23, 4  ;;  %s3454_s27 = sshll.u32 %s3450_s24, 4  ;;  %s3453_s25 = int_to_ptr.vmem [resolvable:$true] %s3452_s25  ;;  %s3455_s27 = int_to_ptr.hbm [resolvable:$true] %s3454_s27 }
  0x35   : > { %325 = vmatpush.bf16.msra.mxu0 %v3669_v2  ;;  %3678 = vmatpush.bf16.msra.mxu3 %v3669_v2  ;;  %s3440_s28 = scalar_lea.sflag [#allocation5], %s4563_s20  ;;  %s4368_s29 = sshra.s32 %s3455_s27, 4  ;;  %s4369_s29 = int_to_ptr.hbm [resolvable:$true] %s4368_s29 }
  0x36   : > { %385 = vmatpush.bf16.msra.mxu1 %v4580_v3  ;;  %777 = vmatpush.bf16.msra.mxu2 %v4580_v3  ;;  %s4370_s11 = scalar_lea.hbm %s4369_s29, 8  ;;  %s4374_s21 = scalar_lea.hbm %s6179_s4, 16 }
  0x37   : > { %p4371_p1 = scmp.ne.s32.totalorder %s4369_s29, %s4370_s11  ;;  %p4375_p11 = scmp.lt.s32.totalorder %s4369_s29, %s6179_s4 }
  0x38   : > { %3581 = vmatmul.msk.bf16.vlgmr.msra.gmra.mxu0 %vm305_vm0, %v3673_v4  ;;  %3584 = vmatmul.msk.bf16.vlgmr.msra.gmra.mxu3 %vm305_vm0, %v3676_v5  ;;  %p4376_p2 = scmp.lt.s32.totalorder %s4374_s21, %s4370_s11 }
  0x39   : > { %1161 = vmatpush.bf16.msrb.mxu3 %v4577_v1  ;;  %386 = vmatmul.bf16.vlgmr.msra.gmra.mxu1 %v4430_v6  ;;  %p4372_p4 = pnand %p4371_p1, %p4530_p3 }
  0x3a   : > { %1546 = vmatpush.bf16.msrb.mxu1 %v4577_v1  ;;  %1931 = vmatpush.bf16.msrb.mxu2 %v4577_v1  ;;  %p4377_p9 = por %p4376_p2, %p4375_p11 }
  0x3b   : > { %p4373_p8 = pneg %p4372_p4 }
  0x3d   : > { %1162 = vmatpush.bf16.msrb.mxu3 %v4580_v3  ;;  %p4378_p10 = pnand %p4377_p9, %p4373_p8 }
  0x3e   : > { %1547 = vmatpush.bf16.msrb.mxu1 %v4580_v3  ;;  %1932 = vmatpush.bf16.msrb.mxu2 %v4580_v3 }
  0x41   : > { %2316 = vmatpush.bf16.msra.mxu3 %v4577_v1 }
  0x42   : > { %2701 = vmatpush.bf16.msra.mxu1 %v4577_v1 }
  0x45   : > { %2317 = vmatpush.bf16.msra.mxu3 %v4580_v3 }
  0x46   : > { %2702 = vmatpush.bf16.msra.mxu1 %v4580_v3 }
  0x48   : > { %3582 = vmatmul.msk.bf16.gmra.mxu0 %vm305_vm0, %v3674_v7 }
  0x58   : > { %3583 = vmatmul.msk.bf16.gmra.mxu0 %vm305_vm0, %v3675_v8 }
  0xb5   : > { %v327_v10 = vpop.f32.mrf.mxu0 }
  0xb6   : > { %v328_v11 = vadd.f32 %v3751_v9, %v327_v10  ;;  %v4606_v12 = vpop.f32.mrf.mxu1 }
  0xb7   : > { %v392_v22 = vrot.slane %v4606_v12, 1  ;;  %v393_v30 = vrot.slane %v4606_v12, 2  ;;  %v397_v34 = vrot.slane %v4606_v12, 6  ;;  %v394_v38 = vrot.slane %v4606_v12, 3 }
  0xb8   : > { %347 = vst [vmem:[#allocation2] sm:$0xff] %v328_v11  ;;  %v398_v44 = vrot.slane %v4606_v12, 7  ;;  %v395_v48 = vrot.slane %v4606_v12, 4  ;;  %v396_v53 = vrot.slane %v4606_v12, 5 }
  0xbb   : > { %v342_v13 = vpop.f32.mrf.mxu3 }
  0xbc   : > { %v343_v14 = vadd.f32 %v3751_v9, %v342_v13 }
  0xbd   : > { %v329_v15 = vpop.f32.mrf.mxu0 }
  0xbe   : > { %353 = vst [vmem:[#allocation2 + $0x30] sm:$0xff] %v343_v14  ;;  %v330_v16 = vadd.f32 %v3751_v9, %v329_v15  ;;  %v389_v17 = vpop.f32.mrf.mxu1 }
  0xbf   : > { %v355_v18 = vld [vmem:[#allocation2] sm:$0x1] }
  0xc0   : > { %348 = vst [vmem:[#allocation2 + $0x8] sm:$0xff] %v330_v16  ;;  %v407_v19 = vadd.f32 %v4606_v12, %v355_v18 }
  0xc2   : > { %3752 = vtanh.f32 %v407_v19  ;;  %v3593_v59 = vmul.f32 -1.442695, %v407_v19 }
  0xc3   : > { %v344_v20 = vpop.f32.mrf.mxu3 }
  0xc4   : > { %v345_v21 = vadd.f32 %v3751_v9, %v344_v20 }
  0xc5   : > { %v332_v23 = vpop.f32.mrf.mxu0  ;;  %v361_v35 = vld [vmem:[#allocation2 + $0x30] sm:$0x1] }
  0xc6   : > { %354 = vst [vmem:[#allocation2 + $0x38] sm:$0xff] %v345_v21  ;;  %v333_v24 = vadd.f32 %v3751_v9, %v332_v23  ;;  %v413_v39 = vadd.f32 %v397_v34, %v361_v35 }
  0xc7   : > { %v356_v25 = vld [vmem:[#allocation2 + $0x8] sm:$0x1] }
  0xc8   : > { %v3753_v26 = vpop.eup %3752  ;;  %349 = vst [vmem:[#allocation2 + $0x10] sm:$0xff] %v333_v24  ;;  %v408_v27 = vadd.f32 %v392_v22, %v356_v25  ;;  %v3599_v11 = vmul.f32 -1.442695, %v413_v39 }
  0xc9   : > { %591 = vrot.lane.b32.xlu1 %v3753_v26, %s4431_s6 }
  0xca   : > { %3754 = vtanh.f32 %v408_v27  ;;  %v3594_v60 = vmul.f32 -1.442695, %v408_v27 }
  0xcd   : > { %v334_v28 = vpop.f32.mrf.mxu0  ;;  %v362_v43 = vld [vmem:[#allocation2 + $0x38] sm:$0x1] }
  0xce   : > { %v335_v29 = vadd.f32 %v3751_v9, %v334_v28  ;;  %v414_v46 = vadd.f32 %v398_v44, %v362_v43 }
  0xcf   : > { %v357_v31 = vld [vmem:[#allocation2 + $0x10] sm:$0x1] }
  0xd0   : > { %v3755_v32 = vpop.eup %3754  ;;  %350 = vst [vmem:[#allocation2 + $0x18] sm:$0xff] %v335_v29  ;;  %v409_v33 = vadd.f32 %v393_v30, %v357_v31  ;;  %v3600_v14 = vmul.f32 -1.442695, %v414_v46 }
  0xd1   : > { %593 = vrot.lane.b32.xlu0 %v3755_v32, %s4431_s6 }
  0xd2   : > { %3756 = vtanh.f32 %v409_v33  ;;  %v3595_v63 = vmul.f32 -1.442695, %v409_v33 }
  0xd3   : > { %3758 = vtanh.f32 %v413_v39 }
  0xd5   : > { %v337_v36 = vpop.f32.mrf.mxu0 }
  0xd6   : > { %v338_v37 = vadd.f32 %v3751_v9, %v337_v36 }
  0xd7   : > { %v358_v40 = vld [vmem:[#allocation2 + $0x18] sm:$0x1] }
  0xd8   : > { %v3757_v41 = vpop.eup %3756  ;;  %351 = vst [vmem:[#allocation2 + $0x20] sm:$0xff] %v338_v37  ;;  %v410_v42 = vadd.f32 %v394_v38, %v358_v40 }
  0xd9   : > { %595 = vrot.lane.b32.xlu0 %v3757_v41, %s4431_s6  ;;  %v3759_v49 = vpop.eup %3758 }
  0xda   : > { %3760 = vtanh.f32 %v410_v42  ;;  %v3596_v6 = vmul.f32 -1.442695, %v410_v42 }
  0xdb   : > { %3762 = vtanh.f32 %v414_v46 }
  0xdd   : > { %v339_v45 = vpop.f32.mrf.mxu0 }
  0xde   : > { %v340_v47 = vadd.f32 %v3751_v9, %v339_v45 }
  0xdf   : > { %v359_v50 = vld [vmem:[#allocation2 + $0x20] sm:$0x1] }
  0xe0   : > { %v3761_v51 = vpop.eup %3760  ;;  %352 = vst [vmem:[#allocation2 + $0x28] sm:$0xff] %v340_v47  ;;  %v411_v52 = vadd.f32 %v395_v48, %v359_v50 }
  0xe1   : > { %603 = vrot.lane.b32.xlu0 %v3759_v49, %s4431_s6  ;;  %597 = vrot.lane.b32.xlu1 %v3761_v51, %s4431_s6  ;;  %v3763_v54 = vpop.eup %3762 }
  0xe2   : > { %3764 = vtanh.f32 %v411_v52  ;;  %v3597_v7 = vmul.f32 -1.442695, %v411_v52 }
  0xe7   : > { %v360_v55 = vld [vmem:[#allocation2 + $0x28] sm:$0x1] }
  0xe8   : > { %v3765_v56 = vpop.eup %3764  ;;  %v412_v57 = vadd.f32 %v396_v53, %v360_v55 }
  0xe9   : > { %599 = vrot.lane.b32.xlu2 %v3765_v56, %s4431_s6  ;;  %605 = vrot.lane.b32.xlu1 %v3763_v54, %s4431_s6 }
  0xea   : > { %3766 = vtanh.f32 %v412_v57  ;;  %v3598_v0 = vmul.f32 -1.442695, %v412_v57 }
  0xeb   : > { %3768 = vpow2.f32 %v3593_v59 }
  0xec   : > { %3770 = vpow2.f32 %v3594_v60 }
  0xf0   : > { %v3767_v58 = vpop.eup %3766 }
  0xf1   : > { %601 = vrot.lane.b32.xlu2 %v3767_v58, %s4431_s6  ;;  %v3769_v61 = vpop.eup %3768 }
  0xf2   : > { %v439_v62 = vadd.f32 1.0, %v3769_v61  ;;  %v3771_v2 = vpop.eup %3770 }
  0xf3   : > { %v4624_v4 = vadd.f32 1.0, %v3771_v2 }
  0xf4   : > { %3772 = vrcp.f32 %v439_v62  ;;  %v458_v28 = vand.u32 2147483648, %v439_v62  ;;  %vm452_vm2 = vweird.f32 %v439_v62  ;;  %v456_v30 = vand.u32 2147483647, %v439_v62 }
  0xf5   : > { %3774 = vpow2.f32 %v3595_v63  ;;  %v473_v46 = vand.u32 2147483648, %v4624_v4  ;;  %vm467_vm6 = vweird.f32 %v4624_v4  ;;  %v471_v47 = vand.u32 2147483647, %v4624_v4 }
  0xf6   : > { %3776 = vpow2.f32 %v3598_v0  ;;  %v459_v36 = vor.u32 1.1754944e-38, %v458_v28  ;;  %vm457_vm4 = vcmp.eq.f32.partialorder %v456_v30, 8.507059e+37 }
  0xf7   : > { %3778 = vrcp.f32 %v4624_v4  ;;  %v474_v54 = vor.u32 1.1754944e-38, %v473_v46  ;;  %vm472_vm8 = vcmp.eq.f32.partialorder %v471_v47, 8.507059e+37 }
  0xf8   : > { %3780 = vpow2.f32 %v3596_v6 }
  0xf9   : > { %3782 = vpow2.f32 %v3597_v7 }
  0xfa   : > { %v3773_v5 = vpop.eup %3772  ;;  %3784 = vpow2.f32 %v3599_v11 }
  0xfb   : > { %v3775_v8 = vpop.eup %3774  ;;  %v448_v10 = vmul.f32 %v3773_v5, %v439_v62  ;;  %vm453_vm1 = vweird.f32 %v3773_v5 }
  0xfc   : > { %v3777_v9 = vpop.eup %3776  ;;  %v4627_v12 = vadd.f32 1.0, %v3775_v8  ;;  %vm454_vm3 = vmor %vm452_vm2, %vm453_vm1 }
  0xfd   : > { %v4629_v13 = vadd.f32 1.0, %v3777_v9  ;;  %v449_v15 = vsub.f32 1.0, %v448_v10  ;;  %v3779_v16 = vpop.eup %3778 }
  0xfe   : > { %3786 = vrcp.f32 %v4627_v12  ;;  %v3781_v17 = vpop.eup %3780  ;;  %v463_v20 = vmul.f32 %v3779_v16, %v4624_v4  ;;  %vm468_vm5 = vweird.f32 %v3779_v16  ;;  %vm482_vm11 = vweird.f32 %v4627_v12 }
  0xff   : > { %3788 = vrcp.f32 %v4629_v13  ;;  %v3783_v18 = vpop.eup %3782  ;;  %v450_v19 = vmul.f32 %v3773_v5, %v449_v15  ;;  %v4634_v21 = vadd.f32 1.0, %v3781_v17  ;;  %vm469_vm7 = vmor %vm467_vm6, %vm468_vm5  ;;  %v533_v0 = vand.u32 2147483648, %v4629_v13 }
 0x100   : > { %3790 = vpow2.f32 %v3600_v14  ;;  %v3785_v22 = vpop.eup %3784  ;;  %v4636_v23 = vadd.f32 1.0, %v3783_v18  ;;  %v464_v26 = vsub.f32 1.0, %v463_v20  ;;  %v486_v2 = vand.u32 2147483647, %v4627_v12 }
 0x101   : > { %v451_v25 = vadd.f32 %v3773_v5, %v450_v19  ;;  %3792 = vrcp.f32 %v4634_v21  ;;  %v4646_v32 = vadd.f32 1.0, %v3785_v22  ;;  %v488_v4 = vand.u32 2147483648, %v4627_v12 }
 0x102   : > { %3794 = vrcp.f32 %v4636_v23  ;;  %v465_v34 = vmul.f32 %v3779_v16, %v464_v26  ;;  %vm527_vm12 = vweird.f32 %v4629_v13  ;;  %vm487_vm1 = vcmp.eq.f32.partialorder %v486_v2, 8.507059e+37 }
 0x103   : > { %v455_v33 = vsel %vm454_vm3, %v3773_v5, %v451_v25  ;;  %3796 = vrcp.f32 %v4646_v32  ;;  %v531_v5 = vand.u32 2147483647, %v4629_v13  ;;  %v489_v14 = vor.u32 1.1754944e-38, %v488_v4 }
 0x104   : > { %v4638_v24 = vpop.eup %3786  ;;  %v4652_v39 = vsel %vm457_vm4, %v459_v36, %v455_v33  ;;  %v466_v43 = vadd.f32 %v3779_v16, %v465_v34  ;;  %vm497_vm4 = vweird.f32 %v4634_v21  ;;  %v503_v28 = vand.u32 2147483648, %v4634_v21 }
 0x105   : > { %v4640_v27 = vpop.eup %3788  ;;  %v478_v31 = vmul.f32 %v4638_v24, %v4627_v12  ;;  %vm483_vm9 = vweird.f32 %v4638_v24  ;;  %vm532_vm15 = vcmp.eq.f32.partialorder %v531_v5, 8.507059e+37  ;;  %vm512_vm5 = vweird.f32 %v4636_v23 }
 0x106   : > { %v3791_v29 = vpop.eup %3790  ;;  %v523_v35 = vmul.f32 %v4640_v27, %v4629_v13  ;;  %v470_v51 = vsel %vm469_vm7, %v3779_v16, %v466_v43  ;;  %vm528_vm10 = vweird.f32 %v4640_v27  ;;  %vm4691_vm13 = vmor %vm482_vm11, %vm483_vm9  ;;  %v534_v13 = vor.u32 1.1754944e-38, %v533_v0 }
 0x107   : > { %v4650_v37 = vadd.f32 1.0, %v3791_v29  ;;  %v479_v40 = vsub.f32 1.0, %v478_v31  ;;  %v4655_v41 = vpop.eup %3792  ;;  %v4677_v58 = vsel %vm472_vm8, %v474_v54, %v470_v51  ;;  %vm529_vm14 = vmor %vm527_vm12, %vm528_vm10  ;;  %v516_v29 = vand.u32 2147483647, %v4636_v23 }
 0x108   : > { %v524_v44 = vsub.f32 1.0, %v523_v35  ;;  %v4658_v45 = vpop.eup %3794  ;;  %v493_v49 = vmul.f32 %v4655_v41, %v4634_v21  ;;  %vm498_vm2 = vweird.f32 %v4655_v41  ;;  %v501_v30 = vand.u32 2147483647, %v4634_v21 }
 0x109   : > { %3798 = vrcp.f32 %v4650_v37  ;;  %v480_v48 = vmul.f32 %v4638_v24, %v479_v40  ;;  %v508_v50 = vmul.f32 %v4658_v45, %v4636_v23  ;;  %v4671_v53 = vpop.eup %3796  ;;  %vm513_vm3 = vweird.f32 %v4658_v45  ;;  %vm499_vm6 = vmor %vm497_vm4, %vm498_vm2 }
 0x10a   : > { %v525_v52 = vmul.f32 %v4640_v27, %v524_v44  ;;  %v494_v60 = vsub.f32 1.0, %v493_v49  ;;  %v538_v7 = vmul.f32 %v4671_v53, %v4646_v32  ;;  %vm514_vm7 = vmor %vm512_vm5, %vm513_vm3  ;;  %vm517_vm8 = vcmp.eq.f32.partialorder %v516_v29, 8.507059e+37 }
 0x10b   : > { %v481_v59 = vadd.f32 %v4638_v24, %v480_v48  ;;  %v509_v61 = vsub.f32 1.0, %v508_v50  ;;  %vm502_vm9 = vcmp.eq.f32.partialorder %v501_v30, 8.507059e+37  ;;  %vm543_vm10 = vweird.f32 %v4671_v53 }
 0x10c   : > { %v526_v63 = vadd.f32 %v4640_v27, %v525_v52  ;;  %v495_v9 = vmul.f32 %v4655_v41, %v494_v60  ;;  %v539_v15 = vsub.f32 1.0, %v538_v7  ;;  %vm542_vm12 = vweird.f32 %v4646_v32 }
 0x10d   : > { %v510_v10 = vmul.f32 %v4658_v45, %v509_v61  ;;  %v485_v12 = vsel %vm4691_vm13, %v4638_v24, %v481_v59  ;;  %v563_v46 = vand.u32 2147483648, %v4650_v37  ;;  %vm544_vm13 = vmor %vm542_vm12, %vm543_vm10  ;;  %v546_v47 = vand.u32 2147483647, %v4646_v32 }
 0x10e   : > { %v530_v11 = vsel %vm529_vm14, %v4640_v27, %v526_v63  ;;  %v4707_v19 = vsel %vm487_vm1, %v489_v14, %v485_v12  ;;  %v496_v22 = vadd.f32 %v4655_v41, %v495_v9  ;;  %v518_v27 = vand.u32 2147483648, %v4636_v23 }
 0x10f   : > { %v4673_v55 = vpop.eup %3798  ;;  %v4705_v17 = vsel %vm532_vm15, %v534_v13, %v530_v11  ;;  %v511_v25 = vadd.f32 %v4658_v45, %v510_v10  ;;  %v540_v31 = vmul.f32 %v4671_v53, %v539_v15  ;;  %vm557_vm14 = vweird.f32 %v4650_v37 }
 0x110   : > { %v553_v8 = vmul.f32 %v4673_v55, %v4650_v37  ;;  %v500_v34 = vsel %vm499_vm6, %v4655_v41, %v496_v22  ;;  %v519_v36 = vor.u32 1.1754944e-38, %v518_v27  ;;  %vm558_vm11 = vweird.f32 %v4673_v55 }
 0x111   : > { %v515_v33 = vsel %vm514_vm7, %v4658_v45, %v511_v25  ;;  %v541_v40 = vadd.f32 %v4671_v53, %v540_v31  ;;  %v548_v45 = vand.u32 2147483648, %v4646_v32  ;;  %v561_v48 = vand.u32 2147483647, %v4650_v37  ;;  %vm559_vm15 = vmor %vm557_vm14, %vm558_vm11 }
 0x112   : > { %v554_v16 = vsub.f32 1.0, %v553_v8  ;;  %v4727_v23 = vsel %vm517_vm8, %v519_v36, %v515_v33  ;;  %v564_v54 = vor.u32 1.1754944e-38, %v563_v46  ;;  %vm547_vm1 = vcmp.eq.f32.partialorder %v546_v47, 8.507059e+37 }
 0x113   : > { %v545_v49 = vsel %vm544_vm13, %v4671_v53, %v541_v40  ;;  %v549_v51 = vor.u32 1.1754944e-38, %v548_v45  ;;  %vm562_vm2 = vcmp.eq.f32.partialorder %v561_v48, 8.507059e+37  ;;  %v576_v37 = vmul.f32 0.0, %v4677_v58 }
 0x114   : > { %v555_v35 = vmul.f32 %v4673_v55, %v554_v16  ;;  %v575_v63 = vmul.f32 0.0, %v4652_v39  ;;  %v577_v11 = vmul.f32 0.0, %v4707_v19  ;;  %v580_v12 = vmul.f32 0.0, %v4705_v17 }
 0x115   : > { %vm744_vm3 = vcmask 1041409   ;;  %vm747_vm4 = vcmask 1042434   ;;  %vm750_vm5 = vcmask 1043459   ;;  %vm753_vm6 = vcmask 1044484  }
 0x116   : > { %v556_v44 = vadd.f32 %v4673_v55, %v555_v35  ;;  %vm756_vm7 = vcmask 1045509   ;;  %vm759_vm8 = vcmask 1046534  }
 0x118   : > { %v560_v50 = vsel %vm559_vm15, %v4673_v55, %v556_v44 }
 0x119   : > { %v4750_v32 = vsel %vm562_vm2, %v564_v54, %v560_v50 }
 0x11a   : > { %v582_v27 = vmul.f32 0.0, %v4750_v32 }
 0x13b   : > { %v592_v38 = vpop.permute.xlu1 %591 }
 0x13c   : > { %v615_v42 = vmul.f32 %v592_v38, %v4652_v39  ;;  %v504_v38 = vor.u32 1.1754944e-38, %v503_v28 }
 0x13e   : > { %631 = vrot.lane.b32.xlu1 %v615_v42, %s4432_s7  ;;  %v4731_v21 = vsel %vm502_vm9, %v504_v38, %v500_v34  ;;  %vm762_vm9 = vcmask 1047559  }
 0x143   : > { %v4675_v56 = vpop.permute.xlu2 %599  ;;  %v594_v57 = vpop.permute.xlu0 %593 }
 0x144   : > { %v616_v62 = vmul.f32 %v594_v57, %v4677_v58  ;;  %v619_v43 = vmul.f32 %v4675_v56, %v4727_v23  ;;  %v4748_v56 = vsel %vm547_vm1, %v549_v51, %v545_v49 }
 0x145   : > { %v581_v6 = vmul.f32 0.0, %v4748_v56 }
 0x146   : > { %633 = vrot.lane.b32.xlu2 %v616_v62, %s4432_s7  ;;  %v578_v62 = vmul.f32 0.0, %v4731_v21 }
 0x14b   : > { %v602_v18 = vpop.permute.xlu2 %601  ;;  %v596_v20 = vpop.permute.xlu0 %595 }
 0x14c   : > { %v620_v24 = vmul.f32 %v602_v18, %v4705_v17  ;;  %v617_v26 = vmul.f32 %v596_v20, %v4707_v19  ;;  %v579_v20 = vmul.f32 0.0, %v4727_v23 }
 0x14e   : > { %635 = vrot.lane.b32.xlu0 %v617_v26, %s4432_s7  ;;  %641 = vrot.lane.b32.xlu1 %v620_v24, %s4432_s7 }
 0x153   : > { %v598_v42 = vpop.permute.xlu1 %597  ;;  %v604_v52 = vpop.permute.xlu0 %603 }
 0x154   : > { %v618_v41 = vmul.f32 %v598_v42, %v4731_v21  ;;  %v621_v59 = vmul.f32 %v604_v52, %v4748_v56 }
 0x156   : > { %639 = vrot.lane.b32.xlu0 %v619_v43, %s4432_s7  ;;  %637 = vrot.lane.b32.xlu2 %v618_v41, %s4432_s7 }
 0x15b   : > { %v606_v57 = vpop.permute.xlu1 %605 }
 0x15c   : > { %v622_v60 = vmul.f32 %v606_v57, %v4750_v32 }
 0x15e   : > { %643 = vrot.lane.b32.xlu2 %v621_v59, %s4432_s7  ;;  %645 = vrot.lane.b32.xlu0 %v622_v60, %s4432_s7 }
 0x1a0   : > { %v634_v53 = vpop.permute.xlu2 %633 }
 0x1a1   : > { %v4757_v55 = vadd.f32 %v634_v53, %v576_v37 }
 0x1a3   : > { %3800 = vtanh.f32 %v4757_v55 }
 0x1a9   : > { %v3801_v61 = vpop.eup %3800 }
 0x1aa   : > { %681 = vrot.lane.b32.xlu1 %v3801_v61, %s4431_s6 }
 0x1b0   : > { %v638_v0 = vpop.permute.xlu2 %637  ;;  %v632_v2 = vpop.permute.xlu1 %631 }
 0x1b1   : > { %v4763_v4 = vadd.f32 %v638_v0, %v578_v62  ;;  %v4765_v5 = vadd.f32 %v632_v2, %v575_v63 }
 0x1b3   : > { %3802 = vtanh.f32 %v4763_v4 }
 0x1b4   : > { %3804 = vtanh.f32 %v4765_v5 }
 0x1b8   : > { %v644_v7 = vpop.permute.xlu2 %643 }
 0x1b9   : > { %v3803_v8 = vpop.eup %3802  ;;  %v4770_v9 = vadd.f32 %v644_v7, %v581_v6 }
 0x1ba   : > { %v3805_v10 = vpop.eup %3804  ;;  %685 = vrot.lane.b32.xlu1 %v3803_v8, %s4431_s6 }
 0x1bb   : > { %3806 = vtanh.f32 %v4770_v9  ;;  %679 = vrot.lane.b32.xlu0 %v3805_v10, %s4431_s6 }
 0x1c0   : > { %v636_v13 = vpop.permute.xlu0 %635  ;;  %v642_v14 = vpop.permute.xlu1 %641 }
 0x1c1   : > { %v3807_v15 = vpop.eup %3806  ;;  %v4777_v16 = vadd.f32 %v636_v13, %v577_v11  ;;  %v4779_v18 = vadd.f32 %v642_v14, %v580_v12 }
 0x1c2   : > { %691 = vrot.lane.b32.xlu1 %v3807_v15, %s4431_s6 }
 0x1c3   : > { %3808 = vtanh.f32 %v4777_v16 }
 0x1c4   : > { %3810 = vtanh.f32 %v4779_v18 }
 0x1c8   : > { %v640_v22 = vpop.permute.xlu0 %639 }
 0x1c9   : > { %v3809_v25 = vpop.eup %3808  ;;  %v4785_v24 = vadd.f32 %v640_v22, %v579_v20 }
 0x1ca   : > { %v3811_v26 = vpop.eup %3810  ;;  %683 = vrot.lane.b32.xlu2 %v3809_v25, %s4431_s6 }
 0x1cb   : > { %3812 = vtanh.f32 %v4785_v24  ;;  %689 = vrot.lane.b32.xlu0 %v3811_v26, %s4431_s6  ;;  %v711_v26 = vld [vmem:[#allocation2 + $0x1] sm:$0x1] }
 0x1d0   : > { %v646_v28 = vpop.permute.xlu0 %645 }
 0x1d1   : > { %v3813_v29 = vpop.eup %3812  ;;  %v4791_v30 = vadd.f32 %v646_v28, %v582_v27 }
 0x1d2   : > { %687 = vrot.lane.b32.xlu2 %v3813_v29, %s4431_s6 }
 0x1d3   : > { %3814 = vtanh.f32 %v4791_v30 }
 0x1d9   : > { %v3815_v31 = vpop.eup %3814 }
 0x1da   : > { %693 = vrot.lane.b32.xlu2 %v3815_v31, %s4431_s6  ;;  %v713_v31 = vld [vmem:[#allocation2 + $0x11] sm:$0x1] }
 0x21c   : > { %v682_v33 = vpop.permute.xlu1 %681 }
 0x21d   : > { %v704_v40 = vmul.f32 %v682_v33, %v4677_v58 }
 0x21f   : > { %v720_v41 = vpack.c.bf16 %v704_v40, %v704_v40 }
 0x221   : > { %v736_v48 = vunpack.c.l.b16 %v720_v41 }
 0x224   : > { %v684_v34 = vpop.permute.xlu2 %683 }
 0x225   : > { %v705_v43 = vmul.f32 %v684_v34, %v4707_v19  ;;  %v712_v34 = vld [vmem:[#allocation2 + $0x9] sm:$0x1] }
 0x227   : > { %v721_v46 = vpack.c.bf16 %v705_v43, %v705_v43 }
 0x229   : > { %v737_v54 = vunpack.c.l.b16 %v721_v46 }
 0x22b   : > { %v746_v60 = vrot.slane %v737_v54, 6 }
 0x22c   : > { %v686_v35 = vpop.permute.xlu1 %685  ;;  %v688_v36 = vpop.permute.xlu2 %687 }
 0x22d   : > { %v680_v38 = vpop.permute.xlu0 %679  ;;  %v706_v44 = vmul.f32 %v686_v35, %v4731_v21  ;;  %v707_v47 = vmul.f32 %v688_v36, %v4727_v23 }
 0x22e   : > { %v703_v42 = vmul.f32 %v680_v38, %v4652_v39  ;;  %v743_v39 = vrot.slane %v736_v48, 7  ;;  %v716_v38 = vld [vmem:[#allocation2 + $0x29] sm:$0x1] }
 0x22f   : > { %v722_v49 = vpack.c.bf16 %v706_v44, %v706_v44  ;;  %v723_v57 = vpack.c.bf16 %v707_v47, %v707_v47 }
 0x230   : > { %v719_v45 = vpack.c.bf16 %v703_v42, %v703_v42 }
 0x231   : > { %v738_v59 = vunpack.c.l.b16 %v722_v49  ;;  %v739_v37 = vunpack.c.l.b16 %v723_v57  ;;  %v717_v57 = vld [vmem:[#allocation2 + $0x31] sm:$0x1] }
 0x232   : > { %v735_v52 = vunpack.c.l.b16 %v719_v45  ;;  %v714_v45 = vld [vmem:[#allocation2 + $0x19] sm:$0x1] }
 0x233   : > { %v749_v61 = vrot.slane %v738_v59, 5 }
 0x234   : > { %v692_v50 = vpop.permute.xlu1 %691  ;;  %v694_v51 = vpop.permute.xlu2 %693  ;;  %v745_v21 = vsel %vm744_vm3, %v743_v39, %v735_v52  ;;  %v718_v52 = vld [vmem:[#allocation2 + $0x39] sm:$0x1] }
 0x235   : > { %v709_v58 = vmul.f32 %v692_v50, %v4748_v56  ;;  %v710_v19 = vmul.f32 %v694_v51, %v4750_v32  ;;  %v748_v0 = vsel %vm747_vm4, %v746_v60, %v745_v21  ;;  %v752_v56 = vrot.slane %v739_v37, 4 }
 0x236   : > { %v751_v7 = vsel %vm750_vm5, %v749_v61, %v748_v0 }
 0x237   : > { %v725_v23 = vpack.c.bf16 %v709_v58, %v709_v58  ;;  %v726_v62 = vpack.c.bf16 %v710_v19, %v710_v19  ;;  %v754_v12 = vsel %vm753_vm6, %v752_v56, %v751_v7 }
 0x239   : > { %v741_v6 = vunpack.c.l.b16 %v725_v23  ;;  %v742_v32 = vunpack.c.l.b16 %v726_v62 }
 0x23b   : > { %v758_v11 = vrot.slane %v741_v6, 2  ;;  %v761_v13 = vrot.slane %v742_v32, 1 }
 0x23d   : > { %v690_v53 = vpop.permute.xlu0 %689 }
 0x23e   : > { %v708_v63 = vmul.f32 %v690_v53, %v4705_v17 }
 0x240   : > { %v724_v2 = vpack.c.bf16 %v708_v63, %v708_v63 }
 0x242   : > { %v740_v8 = vunpack.c.l.b16 %v724_v2 }
 0x244   : > { %v755_v10 = vrot.slane %v740_v8, 3 }
 0x246   : > { %v757_v17 = vsel %vm756_vm7, %v755_v10, %v754_v12 }
 0x247   : > { %v760_v14 = vsel %vm759_vm8, %v758_v11, %v757_v17 }
 0x248   : > { %v763_v15 = vsel %vm762_vm9, %v761_v13, %v760_v14 }
 0x249   : > { %v764_v20 = vpack.c.b16 %v763_v15, %v763_v15 }
 0x24b   : > { %765 = vrot.lane.b32.xlu0 %v764_v20, %s4432_s7 }
 0x2bd   : > { %v766_v22 = vpop.permute.xlu0 %765 }
 0x2be   : > { %3601 = vmatmul.msk.bf16.vlgmr.msra.gmra.mxu2 %vm305_vm0, %v766_v22 }
 0x2bf   : > { %3086 = vmatpush.bf16.msra.mxu2 %v4577_v1 }
 0x2c3   : > { %3087 = vmatpush.bf16.msra.mxu2 %v4580_v3  ;;  %v715_v3 = vld [vmem:[#allocation2 + $0x21] sm:$0x1] }
 0x341   : > { %v779_v25 = vpop.f32.mrf.mxu2 }
 0x342   : > { %v799_v27 = vadd.f32 %v779_v25, %v711_v26  ;;  %v785_v28 = vrot.slane %v779_v25, 2  ;;  %v784_v29 = vrot.slane %v779_v25, 1  ;;  %v788_v35 = vrot.slane %v779_v25, 5 }
 0x343   : > { %v787_v40 = vrot.slane %v779_v25, 4  ;;  %v786_v1 = vrot.slane %v779_v25, 3  ;;  %v790_v49 = vrot.slane %v779_v25, 7  ;;  %v789_v50 = vrot.slane %v779_v25, 6 }
 0x344   : > { %3816 = vtanh.f32 %v799_v27  ;;  %v801_v33 = vadd.f32 %v785_v28, %v713_v31  ;;  %v800_v36 = vadd.f32 %v784_v29, %v712_v34  ;;  %v804_v42 = vadd.f32 %v788_v35, %v716_v38 }
 0x345   : > { %v803_v44 = vadd.f32 %v787_v40, %v715_v3  ;;  %v802_v47 = vadd.f32 %v786_v1, %v714_v45  ;;  %v806_v54 = vadd.f32 %v790_v49, %v718_v52  ;;  %v805_v39 = vadd.f32 %v789_v50, %v717_v57 }
 0x346   : > { %3818 = vtanh.f32 %v801_v33  ;;  %v3604_v60 = vmul.f32 -1.442695, %v801_v33  ;;  %v3602_v63 = vmul.f32 -1.442695, %v799_v27  ;;  %v3603_v6 = vmul.f32 -1.442695, %v800_v36 }
 0x347   : > { %3820 = vtanh.f32 %v800_v36  ;;  %v3606_v37 = vmul.f32 -1.442695, %v803_v44  ;;  %v3609_v61 = vmul.f32 -1.442695, %v806_v54  ;;  %v3607_v32 = vmul.f32 -1.442695, %v804_v42 }
 0x348   : > { %3822 = vtanh.f32 %v804_v42  ;;  %v3605_v13 = vmul.f32 -1.442695, %v802_v47  ;;  %v3608_v31 = vmul.f32 -1.442695, %v805_v39 }
 0x349   : > { %v781_v43 = vpop.f32.mrf.mxu2  ;;  %3824 = vtanh.f32 %v803_v44 }
 0x34a   : > { %v3817_v41 = vpop.eup %3816  ;;  %3826 = vtanh.f32 %v802_v47 }
 0x34b   : > { %983 = vrot.lane.b32.xlu0 %v3817_v41, %s4431_s6  ;;  %3828 = vtanh.f32 %v806_v54 }
 0x34c   : > { %v3819_v46 = vpop.eup %3818  ;;  %3830 = vtanh.f32 %v805_v39 }
 0x34d   : > { %987 = vrot.lane.b32.xlu2 %v3819_v46, %s4431_s6  ;;  %v3821_v48 = vpop.eup %3820  ;;  %3832 = vpow2.f32 %v3604_v60 }
 0x34e   : > { %985 = vrot.lane.b32.xlu1 %v3821_v48, %s4431_s6  ;;  %v3823_v51 = vpop.eup %3822  ;;  %3834 = vpow2.f32 %v3606_v37 }
 0x34f   : > { %v3825_v58 = vpop.eup %3824 }
 0x350   : > { %v3827_v59 = vpop.eup %3826 }
 0x351   : > { %v3829_v19 = vpop.eup %3828 }
 0x352   : > { %v3831_v21 = vpop.eup %3830 }
 0x353   : > { %993 = vrot.lane.b32.xlu0 %v3823_v51, %s4431_s6  ;;  %v3833_v23 = vpop.eup %3832 }
 0x354   : > { %v833_v53 = vadd.f32 1.0, %v3833_v23  ;;  %v3835_v62 = vpop.eup %3834 }
 0x355   : > { %991 = vrot.lane.b32.xlu2 %v3825_v58, %s4431_s6  ;;  %v4823_v0 = vadd.f32 1.0, %v3835_v62 }
 0x356   : > { %989 = vrot.lane.b32.xlu1 %v3827_v59, %s4431_s6  ;;  %3836 = vrcp.f32 %v833_v53  ;;  %v880_v28 = vand.u32 2147483648, %v833_v53  ;;  %vm874_vm11 = vweird.f32 %v833_v53  ;;  %v878_v33 = vand.u32 2147483647, %v833_v53 }
 0x357   : > { %3838 = vpow2.f32 %v3609_v61  ;;  %v910_v46 = vand.u32 2147483648, %v4823_v0  ;;  %vm904_vm15 = vweird.f32 %v4823_v0  ;;  %v908_v49 = vand.u32 2147483647, %v4823_v0 }
 0x358   : > { %3840 = vpow2.f32 %v3602_v63  ;;  %v881_v42 = vor.u32 1.1754944e-38, %v880_v28  ;;  %vm879_vm13 = vcmp.eq.f32.partialorder %v878_v33, 8.507059e+37 }
 0x359   : > { %3842 = vrcp.f32 %v4823_v0  ;;  %v911_v58 = vor.u32 1.1754944e-38, %v910_v46  ;;  %vm909_vm2 = vcmp.eq.f32.partialorder %v908_v49, 8.507059e+37 }
 0x35a   : > { %3844 = vpow2.f32 %v3603_v6 }
 0x35b   : > { %3846 = vpow2.f32 %v3607_v32 }
 0x35c   : > { %v3837_v2 = vpop.eup %3836 }
 0x35d   : > { %997 = vrot.lane.b32.xlu2 %v3829_v19, %s4431_s6  ;;  %v3839_v56 = vpop.eup %3838  ;;  %v870_v7 = vmul.f32 %v3837_v2, %v833_v53  ;;  %vm875_vm10 = vweird.f32 %v3837_v2 }
 0x35e   : > { %995 = vrot.lane.b32.xlu1 %v3831_v21, %s4431_s6  ;;  %v4826_v8 = vadd.f32 1.0, %v3839_v56  ;;  %v3841_v10 = vpop.eup %3840  ;;  %vm876_vm12 = vmor %vm874_vm11, %vm875_vm10 }
 0x35f   : > { %v871_v11 = vsub.f32 1.0, %v870_v7  ;;  %v3843_v12 = vpop.eup %3842  ;;  %v4830_v15 = vadd.f32 1.0, %v3841_v10 }
 0x360   : > { %3848 = vrcp.f32 %v4826_v8  ;;  %v900_v14 = vmul.f32 %v3843_v12, %v4823_v0  ;;  %v3845_v20 = vpop.eup %3844  ;;  %vm905_vm14 = vweird.f32 %v3843_v12  ;;  %v955_v23 = vand.u32 2147483648, %v4826_v8 }
 0x361   : > { %v872_v17 = vmul.f32 %v3837_v2, %v871_v11  ;;  %3850 = vpow2.f32 %v3605_v13  ;;  %v3847_v22 = vpop.eup %3846  ;;  %v4835_v29 = vadd.f32 1.0, %v3845_v20  ;;  %vm906_vm1 = vmor %vm904_vm15, %vm905_vm14  ;;  %vm949_vm11 = vweird.f32 %v4826_v8 }
 0x362   : > { %v901_v26 = vsub.f32 1.0, %v900_v14  ;;  %3852 = vrcp.f32 %v4830_v15  ;;  %v4837_v34 = vadd.f32 1.0, %v3847_v22  ;;  %v953_v63 = vand.u32 2147483647, %v4826_v8 }
 0x363   : > { %v873_v25 = vadd.f32 %v3837_v2, %v872_v17  ;;  %3854 = vrcp.f32 %v4835_v29  ;;  %v956_v6 = vor.u32 1.1754944e-38, %v955_v23  ;;  %v850_v10 = vand.u32 2147483648, %v4830_v15 }
 0x364   : > { %v902_v36 = vmul.f32 %v3843_v12, %v901_v26  ;;  %3856 = vpow2.f32 %v3608_v31  ;;  %vm954_vm14 = vcmp.eq.f32.partialorder %v953_v63, 8.507059e+37  ;;  %vm844_vm15 = vweird.f32 %v4830_v15 }
 0x365   : > { %v877_v35 = vsel %vm876_vm12, %v3837_v2, %v873_v25  ;;  %3858 = vrcp.f32 %v4837_v34  ;;  %v848_v17 = vand.u32 2147483647, %v4830_v15  ;;  %v851_v25 = vor.u32 1.1754944e-38, %v850_v10 }
 0x366   : > { %v4833_v27 = vpop.eup %3848  ;;  %v4844_v41 = vsel %vm879_vm13, %v881_v42, %v877_v35  ;;  %v903_v44 = vadd.f32 %v3843_v12, %v902_v36  ;;  %v865_v31 = vand.u32 2147483648, %v4835_v29  ;;  %v863_v35 = vand.u32 2147483647, %v4835_v29 }
 0x367   : > { %v945_v38 = vmul.f32 %v4833_v27, %v4826_v8  ;;  %v3851_v40 = vpop.eup %3850  ;;  %vm950_vm10 = vweird.f32 %v4833_v27 }
 0x368   : > { %v4842_v43 = vpop.eup %3852  ;;  %v4851_v48 = vadd.f32 1.0, %v3851_v40  ;;  %v907_v52 = vsel %vm906_vm1, %v3843_v12, %v903_v44  ;;  %vm951_vm12 = vmor %vm949_vm11, %vm950_vm10  ;;  %vm849_vm10 = vcmp.eq.f32.partialorder %v848_v17, 8.507059e+37  ;;  %vm859_vm11 = vweird.f32 %v4835_v29 }
 0x369   : > { %v946_v45 = vsub.f32 1.0, %v945_v38  ;;  %v840_v47 = vmul.f32 %v4842_v43, %v4830_v15  ;;  %v4856_v50 = vpop.eup %3854  ;;  %v4864_v19 = vsel %vm909_vm2, %v911_v58, %v907_v52  ;;  %vm845_vm13 = vweird.f32 %v4842_v43 }
 0x36a   : > { %v3857_v51 = vpop.eup %3856  ;;  %3860 = vrcp.f32 %v4851_v48  ;;  %v855_v59 = vmul.f32 %v4856_v50, %v4835_v29  ;;  %vm846_vm1 = vmor %vm844_vm15, %vm845_vm13  ;;  %vm860_vm2 = vweird.f32 %v4856_v50  ;;  %v925_v40 = vand.u32 2147483648, %v4837_v34 }
 0x36b   : > { %v947_v54 = vmul.f32 %v4833_v27, %v946_v45  ;;  %v4859_v57 = vpop.eup %3858  ;;  %v841_v39 = vsub.f32 1.0, %v840_v47  ;;  %v4873_v62 = vadd.f32 1.0, %v3857_v51  ;;  %v923_v29 = vand.u32 2147483647, %v4837_v34 }
 0x36c   : > { %v915_v61 = vmul.f32 %v4859_v57, %v4837_v34  ;;  %v856_v0 = vsub.f32 1.0, %v855_v59  ;;  %vm920_vm13 = vweird.f32 %v4859_v57  ;;  %vm864_vm15 = vcmp.eq.f32.partialorder %v863_v35, 8.507059e+37 }
 0x36d   : > { %v948_v37 = vadd.f32 %v4833_v27, %v947_v54  ;;  %v842_v53 = vmul.f32 %v4842_v43, %v841_v39  ;;  %3862 = vrcp.f32 %v4873_v62  ;;  %v926_v47 = vor.u32 1.1754944e-38, %v925_v40 }
 0x36e   : > { %v916_v32 = vsub.f32 1.0, %v915_v61  ;;  %v857_v11 = vmul.f32 %v4856_v50, %v856_v0  ;;  %v895_v52 = vand.u32 2147483648, %v4851_v48  ;;  %v940_v61 = vand.u32 2147483648, %v4873_v62 }
 0x36f   : > { %v952_v56 = vsel %vm951_vm12, %v4833_v27, %v948_v37  ;;  %v843_v7 = vadd.f32 %v4842_v43, %v842_v53  ;;  %vm861_vm12 = vmor %vm859_vm11, %vm860_vm2  ;;  %vm889_vm11 = vweird.f32 %v4851_v48 }
 0x370   : > { %v4878_v2 = vpop.eup %3860  ;;  %v4888_v12 = vsel %vm954_vm14, %v956_v6, %v952_v56  ;;  %v917_v22 = vmul.f32 %v4859_v57, %v916_v32  ;;  %v858_v26 = vadd.f32 %v4856_v50, %v857_v11  ;;  %vm919_vm14 = vweird.f32 %v4837_v34 }
 0x371   : > { %v885_v8 = vmul.f32 %v4878_v2, %v4851_v48  ;;  %v847_v20 = vsel %vm846_vm1, %v4842_v43, %v843_v7  ;;  %vm921_vm1 = vmor %vm919_vm14, %vm920_vm13  ;;  %vm890_vm2 = vweird.f32 %v4878_v2  ;;  %v941_v0 = vor.u32 1.1754944e-38, %v940_v61 }
 0x372   : > { %v4899_v33 = vsel %vm849_vm10, %v851_v25, %v847_v20  ;;  %v918_v38 = vadd.f32 %v4859_v57, %v917_v22  ;;  %v862_v42 = vsel %vm861_vm12, %v4856_v50, %v858_v26  ;;  %vm924_vm10 = vcmp.eq.f32.partialorder %v923_v29, 8.507059e+37  ;;  %vm891_vm12 = vmor %vm889_vm11, %vm890_vm2 }
 0x373   : > { %v886_v27 = vsub.f32 1.0, %v885_v8  ;;  %v3863_v28 = vpop.eup %3862  ;;  %v967_v7 = vmul.f32 %v4899_v33, %v4765_v5  ;;  %v971_v5 = vmul.f32 %v4864_v19, %v4785_v24  ;;  %v974_v26 = vmul.f32 %v4888_v12, %v4791_v30 }
 0x374   : > { %v922_v46 = vsel %vm921_vm1, %v4859_v57, %v918_v38  ;;  %v893_v57 = vand.u32 2147483647, %v4851_v48  ;;  %vm935_vm14 = vweird.f32 %v3863_v28  ;;  %v938_v48 = vand.u32 2147483647, %v4873_v62 }
 0x375   : > { %v887_v43 = vmul.f32 %v4878_v2, %v886_v27  ;;  %v4921_v54 = vsel %vm924_vm10, %v926_v47, %v922_v46 }
 0x376   : > { %vm894_vm13 = vcmp.eq.f32.partialorder %v893_v57, 8.507059e+37  ;;  %vm939_vm2 = vcmp.eq.f32.partialorder %v938_v48, 8.507059e+37 }
 0x377   : > { %v888_v50 = vadd.f32 %v4878_v2, %v887_v43 }
 0x379   : > { %v892_v39 = vsel %vm891_vm12, %v4878_v2, %v888_v50 }
 0x3a7   : > { %v988_v1 = vpop.permute.xlu2 %987 }
 0x3a8   : > { %v1009_v3 = vmul.f32 %v988_v1, %v4844_v41  ;;  %v930_v1 = vmul.f32 %v3863_v28, %v4873_v62 }
 0x3aa   : > { %1027 = vrot.lane.b32.xlu1 %v1009_v3, %s4432_s7  ;;  %v866_v3 = vor.u32 1.1754944e-38, %v865_v31  ;;  %v931_v51 = vsub.f32 1.0, %v930_v1 }
 0x3ac   : > { %v4913_v45 = vsel %vm864_vm15, %v866_v3, %v862_v42  ;;  %v932_v59 = vmul.f32 %v3863_v28, %v931_v51  ;;  %vm934_vm15 = vweird.f32 %v4873_v62  ;;  %v969_v62 = vmul.f32 %v4844_v41, %v4777_v16 }
 0x3ad   : > { %vm936_vm1 = vmor %vm934_vm15, %vm935_vm14 }
 0x3ae   : > { %v933_v53 = vadd.f32 %v3863_v28, %v932_v59 }
 0x3af   : > { %v992_v21 = vpop.permute.xlu2 %991 }
 0x3b0   : > { %v1011_v60 = vmul.f32 %v992_v21, %v4864_v19  ;;  %v896_v21 = vor.u32 1.1754944e-38, %v895_v52  ;;  %v937_v63 = vsel %vm936_vm1, %v3863_v28, %v933_v53 }
 0x3b1   : > { %v4935_v2 = vsel %vm939_vm2, %v941_v0, %v937_v63 }
 0x3b2   : > { %1031 = vrot.lane.b32.xlu1 %v1011_v60, %s4432_s7  ;;  %v4928_v60 = vsel %vm894_vm13, %v896_v21, %v892_v39 }
 0x3b3   : > { %v970_v30 = vmul.f32 %v4928_v60, %v4763_v4 }
 0x3b7   : > { %v998_v13 = vpop.permute.xlu2 %997 }
 0x3b8   : > { %v1014_v14 = vmul.f32 %v998_v13, %v4888_v12  ;;  %v972_v13 = vmul.f32 %v4921_v54, %v4779_v18 }
 0x3ba   : > { %1037 = vrot.lane.b32.xlu1 %v1014_v14, %s4432_s7 }
 0x3bd   : > { %v984_v15 = vpop.permute.xlu0 %983 }
 0x3be   : > { %v1007_v36 = vmul.f32 %v984_v15, %v4899_v33  ;;  %v968_v15 = vmul.f32 %v4913_v45, %v4757_v55  ;;  %v973_v55 = vmul.f32 %v4935_v2, %v4770_v9 }
 0x3c0   : > { %1023 = vrot.lane.b32.xlu2 %v1007_v36, %s4432_s7  ;;  %v986_v44 = vpop.permute.xlu1 %985 }
 0x3c1   : > { %v1008_v49 = vmul.f32 %v986_v44, %v4913_v45 }
 0x3c3   : > { %1025 = vrot.lane.b32.xlu0 %v1008_v49, %s4432_s7 }
 0x3c5   : > { %v994_v34 = vpop.permute.xlu0 %993 }
 0x3c6   : > { %v1012_v58 = vmul.f32 %v994_v34, %v4921_v54 }
 0x3c8   : > { %1033 = vrot.lane.b32.xlu2 %v1012_v58, %s4432_s7  ;;  %v990_v37 = vpop.permute.xlu1 %989 }
 0x3c9   : > { %v1010_v23 = vmul.f32 %v990_v37, %v4928_v60 }
 0x3cb   : > { %1029 = vrot.lane.b32.xlu0 %v1010_v23, %s4432_s7 }
 0x3d0   : > { %v996_v56 = vpop.permute.xlu1 %995 }
 0x3d1   : > { %v1013_v6 = vmul.f32 %v996_v56, %v4935_v2 }
 0x3d3   : > { %1035 = vrot.lane.b32.xlu0 %v1013_v6, %s4432_s7 }
 0x41a   : > { %v1024_v32 = vpop.permute.xlu2 %1023 }
 0x41b   : > { %v4941_v10 = vadd.f32 %v1024_v32, %v967_v7 }
 0x41c   : > { %v1028_v11 = vpop.permute.xlu1 %1027 }
 0x41d   : > { %3864 = vtanh.f32 %v4941_v10  ;;  %v4946_v8 = vadd.f32 %v1028_v11, %v969_v62 }
 0x41f   : > { %3866 = vtanh.f32 %v4946_v8 }
 0x422   : > { %v1034_v17 = vpop.permute.xlu2 %1033 }
 0x423   : > { %v3865_v14 = vpop.eup %3864  ;;  %v4951_v20 = vadd.f32 %v1034_v17, %v972_v13 }
 0x424   : > { %1071 = vrot.lane.b32.xlu1 %v3865_v14, %s4431_s6  ;;  %v1032_v16 = vpop.permute.xlu1 %1031 }
 0x425   : > { %3868 = vtanh.f32 %v4951_v20  ;;  %v3867_v22 = vpop.eup %3866  ;;  %v4957_v25 = vadd.f32 %v1032_v16, %v971_v5 }
 0x426   : > { %1075 = vrot.lane.b32.xlu0 %v3867_v22, %s4431_s6 }
 0x427   : > { %3870 = vtanh.f32 %v4957_v25 }
 0x42b   : > { %v3869_v18 = vpop.eup %3868 }
 0x42c   : > { %1081 = vrot.lane.b32.xlu1 %v3869_v18, %s4431_s6  ;;  %v1038_v27 = vpop.permute.xlu1 %1037 }
 0x42d   : > { %v3871_v28 = vpop.eup %3870  ;;  %v4964_v31 = vadd.f32 %v1038_v27, %v974_v26 }
 0x42e   : > { %1079 = vrot.lane.b32.xlu0 %v3871_v28, %s4431_s6 }
 0x42f   : > { %3872 = vtanh.f32 %v4964_v31 }
 0x435   : > { %v3873_v24 = vpop.eup %3872  ;;  %v1026_v35 = vpop.permute.xlu0 %1025 }
 0x436   : > { %1085 = vrot.lane.b32.xlu0 %v3873_v24, %s4431_s6  ;;  %v4971_v36 = vadd.f32 %v1026_v35, %v968_v15 }
 0x438   : > { %3874 = vtanh.f32 %v4971_v36 }
 0x43d   : > { %v1030_v38 = vpop.permute.xlu0 %1029 }
 0x43e   : > { %v3875_v40 = vpop.eup %3874  ;;  %v4976_v42 = vadd.f32 %v1030_v38, %v970_v30  ;;  %v1103_v30 = vld [vmem:[#allocation2 + $0x2] sm:$0x1] }
 0x43f   : > { %1073 = vrot.lane.b32.xlu2 %v3875_v40, %s4431_s6 }
 0x440   : > { %3876 = vtanh.f32 %v4976_v42 }
 0x445   : > { %v1036_v43 = vpop.permute.xlu0 %1035 }
 0x446   : > { %v3877_v1 = vpop.eup %3876  ;;  %v4982_v3 = vadd.f32 %v1036_v43, %v973_v55  ;;  %v1105_v43 = vld [vmem:[#allocation2 + $0x12] sm:$0x1] }
 0x447   : > { %1077 = vrot.lane.b32.xlu2 %v3877_v1, %s4431_s6 }
 0x448   : > { %3878 = vtanh.f32 %v4982_v3 }
 0x44e   : > { %v3879_v4 = vpop.eup %3878 }
 0x44f   : > { %1083 = vrot.lane.b32.xlu2 %v3879_v4, %s4431_s6  ;;  %v1104_v4 = vld [vmem:[#allocation2 + $0xa] sm:$0x1] }
 0x496   : > { %v1072_v29 = vpop.permute.xlu1 %1071 }
 0x497   : > { %v1095_v9 = vmul.f32 %v1072_v29, %v4899_v33 }
 0x498   : > { %v1076_v44 = vpop.permute.xlu0 %1075 }
 0x499   : > { %v1074_v46 = vpop.permute.xlu2 %1073  ;;  %v1097_v47 = vmul.f32 %v1076_v44, %v4844_v41  ;;  %v1111_v39 = vpack.c.bf16 %v1095_v9, %v1095_v9 }
 0x49a   : > { %v1096_v49 = vmul.f32 %v1074_v46, %v4913_v45  ;;  %v1108_v46 = vld [vmem:[#allocation2 + $0x2a] sm:$0x1] }
 0x49b   : > { %v1113_v51 = vpack.c.bf16 %v1097_v47, %v1097_v47  ;;  %v1127_v45 = vunpack.c.l.b16 %v1111_v39 }
 0x49c   : > { %v1112_v50 = vpack.c.bf16 %v1096_v49, %v1096_v49 }
 0x49d   : > { %v1129_v21 = vunpack.c.l.b16 %v1113_v51 }
 0x49e   : > { %v1128_v52 = vunpack.c.l.b16 %v1112_v50  ;;  %v1082_v57 = vpop.permute.xlu1 %1081 }
 0x49f   : > { %v1100_v41 = vmul.f32 %v1082_v57, %v4921_v54  ;;  %v1137_v48 = vrot.slane %v1129_v21, 6  ;;  %v1106_v57 = vld [vmem:[#allocation2 + $0x1a] sm:$0x1] }
 0x4a0   : > { %v1080_v34 = vpop.permute.xlu0 %1079  ;;  %v1135_v53 = vrot.slane %v1128_v52, 7  ;;  %v1107_v52 = vld [vmem:[#allocation2 + $0x22] sm:$0x1] }
 0x4a1   : > { %v1099_v58 = vmul.f32 %v1080_v34, %v4864_v19  ;;  %v1078_v59 = vpop.permute.xlu2 %1077  ;;  %v1116_v56 = vpack.c.bf16 %v1100_v41, %v1100_v41 }
 0x4a2   : > { %v1098_v23 = vmul.f32 %v1078_v59, %v4928_v60  ;;  %v1136_v0 = vsel %vm744_vm3, %v1135_v53, %v1127_v45  ;;  %v1110_v53 = vld [vmem:[#allocation2 + $0x3a] sm:$0x1] }
 0x4a3   : > { %v1115_v37 = vpack.c.bf16 %v1099_v58, %v1099_v58  ;;  %v1138_v11 = vsel %vm747_vm4, %v1137_v48, %v1136_v0  ;;  %v1132_v54 = vunpack.c.l.b16 %v1116_v56 }
 0x4a4   : > { %v1114_v61 = vpack.c.bf16 %v1098_v23, %v1098_v23 }
 0x4a5   : > { %v1131_v63 = vunpack.c.l.b16 %v1115_v37  ;;  %v1143_v18 = vrot.slane %v1132_v54, 3 }
 0x4a6   : > { %v1130_v33 = vunpack.c.l.b16 %v1114_v61  ;;  %v1109_v61 = vld [vmem:[#allocation2 + $0x32] sm:$0x1] }
 0x4a7   : > { %v1141_v62 = vrot.slane %v1131_v63, 4 }
 0x4a8   : > { %v1086_v6 = vpop.permute.xlu0 %1085  ;;  %v1139_v7 = vrot.slane %v1130_v33, 5 }
 0x4a9   : > { %v1102_v19 = vmul.f32 %v1086_v6, %v4888_v12  ;;  %v1084_v32 = vpop.permute.xlu2 %1083 }
 0x4aa   : > { %v1101_v13 = vmul.f32 %v1084_v32, %v4935_v2  ;;  %v1140_v17 = vsel %vm750_vm5, %v1139_v7, %v1138_v11 }
 0x4ab   : > { %v1118_v60 = vpack.c.bf16 %v1102_v19, %v1102_v19  ;;  %v1142_v16 = vsel %vm753_vm6, %v1141_v62, %v1140_v17 }
 0x4ac   : > { %v1117_v5 = vpack.c.bf16 %v1101_v13, %v1101_v13  ;;  %v1144_v12 = vsel %vm756_vm7, %v1143_v18, %v1142_v16 }
 0x4ad   : > { %v1134_v14 = vunpack.c.l.b16 %v1118_v60 }
 0x4ae   : > { %v1133_v22 = vunpack.c.l.b16 %v1117_v5 }
 0x4af   : > { %v1147_v26 = vrot.slane %v1134_v14, 1 }
 0x4b0   : > { %v1145_v27 = vrot.slane %v1133_v22, 2 }
 0x4b2   : > { %v1146_v28 = vsel %vm759_vm8, %v1145_v27, %v1144_v12 }
 0x4b3   : > { %v1148_v24 = vsel %vm762_vm9, %v1147_v26, %v1146_v28 }
 0x4b4   : > { %v1149_v15 = vpack.c.b16 %v1148_v24, %v1148_v24 }
 0x4b6   : > { %1150 = vrot.lane.b32.xlu1 %v1149_v15, %s4432_s7 }
 0x528   : > { %v1151_v2 = vpop.permute.xlu1 %1150 }
 0x529   : > { %3610 = vmatmul.msk.bf16.vlgmr.msrb.gmra.mxu3 %vm305_vm0, %v1151_v2 }
 0x5ac   : > { %v1164_v35 = vpop.f32.mrf.mxu3 }
 0x5ad   : > { %v1184_v38 = vadd.f32 %v1164_v35, %v1103_v30  ;;  %v1170_v40 = vrot.slane %v1164_v35, 2  ;;  %v1169_v55 = vrot.slane %v1164_v35, 1  ;;  %v1173_v29 = vrot.slane %v1164_v35, 5 }
 0x5ae   : > { %v1172_v47 = vrot.slane %v1164_v35, 4  ;;  %v1171_v9 = vrot.slane %v1164_v35, 3  ;;  %v1175_v21 = vrot.slane %v1164_v35, 7  ;;  %v1174_v37 = vrot.slane %v1164_v35, 6 }
 0x5af   : > { %3880 = vtanh.f32 %v1184_v38  ;;  %v1186_v1 = vadd.f32 %v1170_v40, %v1105_v43  ;;  %v1185_v44 = vadd.f32 %v1169_v55, %v1104_v4  ;;  %v1189_v49 = vadd.f32 %v1173_v29, %v1108_v46 }
 0x5b0   : > { %v1188_v34 = vadd.f32 %v1172_v47, %v1107_v52  ;;  %v1187_v39 = vadd.f32 %v1171_v9, %v1106_v57  ;;  %v1191_v41 = vadd.f32 %v1175_v21, %v1110_v53  ;;  %v1190_v48 = vadd.f32 %v1174_v37, %v1109_v61 }
 0x5b1   : > { %3882 = vtanh.f32 %v1186_v1  ;;  %v3612_v56 = vmul.f32 -1.442695, %v1185_v44  ;;  %v3611_v11 = vmul.f32 -1.442695, %v1184_v38  ;;  %v3613_v13 = vmul.f32 -1.442695, %v1186_v1 }
 0x5b2   : > { %3884 = vtanh.f32 %v1185_v44  ;;  %v3614_v6 = vmul.f32 -1.442695, %v1187_v39  ;;  %v3617_v32 = vmul.f32 -1.442695, %v1190_v48  ;;  %v3616_v5 = vmul.f32 -1.442695, %v1189_v49 }
 0x5b3   : > { %3886 = vtanh.f32 %v1189_v49  ;;  %v3615_v18 = vmul.f32 -1.442695, %v1188_v34  ;;  %v3618_v30 = vmul.f32 -1.442695, %v1191_v41 }
 0x5b4   : > { %v1166_v50 = vpop.f32.mrf.mxu3  ;;  %3888 = vtanh.f32 %v1188_v34 }
 0x5b5   : > { %v3881_v51 = vpop.eup %3880  ;;  %3890 = vtanh.f32 %v1187_v39 }
 0x5b6   : > { %1368 = vrot.lane.b32.xlu1 %v3881_v51, %s4431_s6  ;;  %3892 = vtanh.f32 %v1191_v41 }
 0x5b7   : > { %v3883_v58 = vpop.eup %3882  ;;  %3894 = vtanh.f32 %v1190_v48 }
 0x5b8   : > { %1372 = vrot.lane.b32.xlu0 %v3883_v58, %s4431_s6  ;;  %v3885_v59 = vpop.eup %3884  ;;  %3896 = vpow2.f32 %v3612_v56 }
 0x5b9   : > { %1370 = vrot.lane.b32.xlu2 %v3885_v59, %s4431_s6  ;;  %v3887_v23 = vpop.eup %3886  ;;  %3898 = vpow2.f32 %v3614_v6 }
 0x5ba   : > { %v3889_v45 = vpop.eup %3888 }
 0x5bb   : > { %v3891_v63 = vpop.eup %3890 }
 0x5bc   : > { %v3893_v33 = vpop.eup %3892 }
 0x5bd   : > { %v3895_v0 = vpop.eup %3894 }
 0x5be   : > { %1378 = vrot.lane.b32.xlu1 %v3887_v23, %s4431_s6  ;;  %v3897_v7 = vpop.eup %3896 }
 0x5bf   : > { %v1217_v19 = vadd.f32 1.0, %v3897_v7  ;;  %v3899_v62 = vpop.eup %3898 }
 0x5c0   : > { %1376 = vrot.lane.b32.xlu0 %v3889_v45, %s4431_s6  ;;  %v5012_v60 = vadd.f32 1.0, %v3899_v62 }
 0x5c1   : > { %1374 = vrot.lane.b32.xlu2 %v3891_v63, %s4431_s6  ;;  %3900 = vrcp.f32 %v1217_v19  ;;  %v1250_v43 = vand.u32 2147483648, %v1217_v19  ;;  %vm1244_vm11 = vweird.f32 %v1217_v19  ;;  %v1248_v4 = vand.u32 2147483647, %v1217_v19 }
 0x5c2   : > { %3902 = vpow2.f32 %v3617_v32  ;;  %v1280_v21 = vand.u32 2147483648, %v5012_v60  ;;  %vm1274_vm15 = vweird.f32 %v5012_v60  ;;  %v1278_v23 = vand.u32 2147483647, %v5012_v60 }
 0x5c3   : > { %3904 = vpow2.f32 %v3611_v11  ;;  %v1251_v50 = vor.u32 1.1754944e-38, %v1250_v43  ;;  %vm1249_vm13 = vcmp.eq.f32.partialorder %v1248_v4, 8.507059e+37 }
 0x5c4   : > { %3906 = vrcp.f32 %v5012_v60  ;;  %v1281_v63 = vor.u32 1.1754944e-38, %v1280_v21  ;;  %vm1279_vm2 = vcmp.eq.f32.partialorder %v1278_v23, 8.507059e+37 }
 0x5c5   : > { %3908 = vpow2.f32 %v3613_v13 }
 0x5c6   : > { %3910 = vpow2.f32 %v3616_v5 }
 0x5c7   : > { %v3901_v54 = vpop.eup %3900 }
 0x5c8   : > { %1382 = vrot.lane.b32.xlu0 %v3893_v33, %s4431_s6  ;;  %v3903_v17 = vpop.eup %3902  ;;  %v1240_v14 = vmul.f32 %v3901_v54, %v1217_v19  ;;  %vm1245_vm10 = vweird.f32 %v3901_v54 }
 0x5c9   : > { %1380 = vrot.lane.b32.xlu2 %v3895_v0, %s4431_s6  ;;  %v3905_v16 = vpop.eup %3904  ;;  %v5015_v22 = vadd.f32 1.0, %v3903_v17  ;;  %vm1246_vm12 = vmor %vm1244_vm11, %vm1245_vm10 }
 0x5ca   : > { %v1241_v26 = vsub.f32 1.0, %v1240_v14  ;;  %v3907_v27 = vpop.eup %3906  ;;  %v5017_v28 = vadd.f32 1.0, %v3905_v16 }
 0x5cb   : > { %v3909_v12 = vpop.eup %3908  ;;  %3912 = vrcp.f32 %v5015_v22  ;;  %v1270_v15 = vmul.f32 %v3907_v27, %v5012_v60  ;;  %vm1275_vm14 = vweird.f32 %v3907_v27  ;;  %v1325_v60 = vand.u32 2147483648, %v5015_v22 }
 0x5cc   : > { %v1242_v24 = vmul.f32 %v3901_v54, %v1241_v26  ;;  %3914 = vpow2.f32 %v3615_v18  ;;  %v5021_v2 = vadd.f32 1.0, %v3909_v12  ;;  %v3911_v35 = vpop.eup %3910  ;;  %vm1276_vm1 = vmor %vm1274_vm15, %vm1275_vm14  ;;  %vm1319_vm11 = vweird.f32 %v5015_v22 }
 0x5cd   : > { %3916 = vrcp.f32 %v5017_v28  ;;  %v1271_v40 = vsub.f32 1.0, %v1270_v15  ;;  %v5027_v29 = vadd.f32 1.0, %v3911_v35  ;;  %v1323_v13 = vand.u32 2147483647, %v5015_v22 }
 0x5ce   : > { %v1243_v38 = vadd.f32 %v3901_v54, %v1242_v24  ;;  %3918 = vrcp.f32 %v5021_v2  ;;  %v1326_v26 = vor.u32 1.1754944e-38, %v1325_v60  ;;  %vm1229_vm14 = vweird.f32 %v5017_v28 }
 0x5cf   : > { %v1272_v47 = vmul.f32 %v3907_v27, %v1271_v40  ;;  %3920 = vpow2.f32 %v3618_v30  ;;  %vm1324_vm15 = vcmp.eq.f32.partialorder %v1323_v13, 8.507059e+37  ;;  %v1263_v4 = vand.u32 2147483647, %v5021_v2 }
 0x5d0   : > { %v1247_v46 = vsel %vm1246_vm12, %v3901_v54, %v1243_v38  ;;  %3922 = vrcp.f32 %v5027_v29 }
 0x5d1   : > { %v5024_v55 = vpop.eup %3912  ;;  %v5038_v34 = vsel %vm1249_vm13, %v1251_v50, %v1247_v46  ;;  %v1273_v39 = vadd.f32 %v3907_v27, %v1272_v47 }
 0x5d2   : > { %v3915_v1 = vpop.eup %3914  ;;  %v1315_v49 = vmul.f32 %v5024_v55, %v5015_v22  ;;  %vm1320_vm10 = vweird.f32 %v5024_v55  ;;  %v1235_v22 = vand.u32 2147483648, %v5017_v28 }
 0x5d3   : > { %v5029_v44 = vpop.eup %3916  ;;  %v5033_v9 = vadd.f32 1.0, %v3915_v1  ;;  %v1277_v45 = vsel %vm1276_vm1, %v3907_v27, %v1273_v39  ;;  %vm5073_vm12 = vmor %vm1319_vm11, %vm1320_vm10  ;;  %v1233_v27 = vand.u32 2147483647, %v5017_v28  ;;  %vm1259_vm10 = vweird.f32 %v5021_v2 }
 0x5d4   : > { %v5036_v51 = vpop.eup %3918  ;;  %v1225_v57 = vmul.f32 %v5029_v44, %v5017_v28  ;;  %v1316_v59 = vsub.f32 1.0, %v1315_v49  ;;  %v5057_v6 = vsel %vm1279_vm2, %v1281_v63, %v1277_v45  ;;  %vm1230_vm13 = vweird.f32 %v5029_v44 }
 0x5d5   : > { %3924 = vrcp.f32 %v5033_v9  ;;  %v3921_v37 = vpop.eup %3920  ;;  %v1255_v53 = vmul.f32 %v5036_v51, %v5021_v2  ;;  %vm5085_vm1 = vmor %vm1229_vm14, %vm1230_vm13  ;;  %vm1260_vm2 = vweird.f32 %v5036_v51  ;;  %v1265_v28 = vand.u32 2147483648, %v5021_v2 }
 0x5d6   : > { %v1226_v41 = vsub.f32 1.0, %v1225_v57  ;;  %v5050_v61 = vpop.eup %3922  ;;  %v1317_v48 = vmul.f32 %v5024_v55, %v1316_v59  ;;  %v5053_v33 = vadd.f32 1.0, %v3921_v37  ;;  %v1236_v1 = vor.u32 1.1754944e-38, %v1235_v22 }
 0x5d7   : > { %v1256_v0 = vsub.f32 1.0, %v1255_v53  ;;  %v1300_v32 = vmul.f32 %v5050_v61, %v5027_v29  ;;  %vm1234_vm11 = vcmp.eq.f32.partialorder %v1233_v27, 8.507059e+37  ;;  %v1266_v57 = vor.u32 1.1754944e-38, %v1265_v28 }
 0x5d8   : > { %v1227_v19 = vmul.f32 %v5029_v44, %v1226_v41  ;;  %v1318_v11 = vadd.f32 %v5024_v55, %v1317_v48  ;;  %3926 = vrcp.f32 %v5053_v33  ;;  %vm1305_vm13 = vweird.f32 %v5050_v61 }
 0x5d9   : > { %v1257_v54 = vmul.f32 %v5036_v51, %v1256_v0  ;;  %v1301_v16 = vsub.f32 1.0, %v1300_v32  ;;  %vm1264_vm14 = vcmp.eq.f32.partialorder %v1263_v4, 8.507059e+37  ;;  %v1310_v2 = vand.u32 2147483648, %v5027_v29 }
 0x5da   : > { %v1228_v5 = vadd.f32 %v5029_v44, %v1227_v19  ;;  %v1322_v18 = vsel %vm5073_vm12, %v5024_v55, %v1318_v11  ;;  %vm1261_vm12 = vmor %vm1259_vm10, %vm1260_vm2  ;;  %v1295_v41 = vand.u32 2147483648, %v5033_v9  ;;  %vm1289_vm10 = vweird.f32 %v5033_v9 }
 0x5db   : > { %v5055_v56 = vpop.eup %3924  ;;  %v1258_v24 = vadd.f32 %v5036_v51, %v1257_v54  ;;  %v5093_v30 = vsel %vm1324_vm15, %v1326_v26, %v1322_v18  ;;  %v1302_v55 = vmul.f32 %v5050_v61, %v1301_v16  ;;  %vm1304_vm15 = vweird.f32 %v5027_v29 }
 0x5dc   : > { %v1285_v17 = vmul.f32 %v5055_v56, %v5033_v9  ;;  %v1232_v40 = vsel %vm5085_vm1, %v5029_v44, %v1228_v5  ;;  %vm1306_vm1 = vmor %vm1304_vm15, %vm1305_vm13  ;;  %vm1290_vm2 = vweird.f32 %v5055_v56  ;;  %v1311_v45 = vor.u32 1.1754944e-38, %v1310_v2 }
 0x5dd   : > { %v5104_v47 = vsel %vm1234_vm11, %v1236_v1, %v1232_v40  ;;  %v1262_v44 = vsel %vm1261_vm12, %v5036_v51, %v1258_v24  ;;  %v1308_v51 = vand.u32 2147483647, %v5027_v29  ;;  %v1293_v48 = vand.u32 2147483647, %v5033_v9  ;;  %vm1291_vm12 = vmor %vm1289_vm10, %vm1290_vm2 }
 0x5de   : > { %v1286_v15 = vsub.f32 1.0, %v1285_v17  ;;  %v5091_v35 = vpop.eup %3926  ;;  %v5114_v59 = vsel %vm1264_vm14, %v1266_v57, %v1262_v44  ;;  %v1296_v19 = vor.u32 1.1754944e-38, %v1295_v41  ;;  %v1340_v60 = vand.u32 2147483648, %v5053_v33 }
 0x5df   : > { %v1330_v50 = vmul.f32 %v5091_v35, %v5053_v33  ;;  %vm1309_vm11 = vcmp.eq.f32.partialorder %v1308_v51, 8.507059e+37  ;;  %vm1294_vm13 = vcmp.eq.f32.partialorder %v1293_v48, 8.507059e+37  ;;  %vm1335_vm14 = vweird.f32 %v5091_v35 }
 0x5e0   : > { %v1287_v49 = vmul.f32 %v5055_v56, %v1286_v15  ;;  %vm1334_vm15 = vweird.f32 %v5053_v33  ;;  %v1341_v54 = vor.u32 1.1754944e-38, %v1340_v60  ;;  %v1354_v16 = vmul.f32 %v5114_v59, %v4946_v8 }
 0x5e1   : > { %v1331_v23 = vsub.f32 1.0, %v1330_v50  ;;  %v1355_v8 = vmul.f32 %v5057_v6, %v4976_v42  ;;  %v1358_v42 = vmul.f32 %v5093_v30, %v4982_v3 }
 0x5e2   : > { %v1288_v37 = vadd.f32 %v5055_v56, %v1287_v49 }
 0x5e4   : > { %v1292_v0 = vsel %vm1291_vm12, %v5055_v56, %v1288_v37  ;;  %v1338_v56 = vand.u32 2147483647, %v5053_v33  ;;  %v1353_v33 = vmul.f32 %v5038_v34, %v4971_v36 }
 0x5e5   : > { %v5132_v32 = vsel %vm1294_vm13, %v1296_v19, %v1292_v0 }
 0x5e6   : > { %vm1339_vm2 = vcmp.eq.f32.partialorder %v1338_v56, 8.507059e+37  ;;  %v1356_v12 = vmul.f32 %v5132_v32, %v4957_v25 }
 0x613   : > { %v1371_v52 = vpop.permute.xlu2 %1370 }
 0x614   : > { %v1393_v58 = vmul.f32 %v1371_v52, %v5038_v34 }
 0x616   : > { %1410 = vrot.lane.b32.xlu1 %v1393_v58, %s4432_s7  ;;  %v1303_v58 = vadd.f32 %v5050_v61, %v1302_v55 }
 0x618   : > { %v1307_v53 = vsel %vm1306_vm1, %v5050_v61, %v1303_v58  ;;  %vm1336_vm1 = vmor %vm1334_vm15, %vm1335_vm14 }
 0x619   : > { %v5127_v63 = vsel %vm1309_vm11, %v1311_v45, %v1307_v53 }
 0x61b   : > { %v1375_v7 = vpop.permute.xlu2 %1374 }
 0x61c   : > { %v1395_v62 = vmul.f32 %v1375_v7, %v5057_v6  ;;  %v1332_v7 = vmul.f32 %v5091_v35, %v1331_v23 }
 0x61e   : > { %1414 = vrot.lane.b32.xlu1 %v1395_v62, %s4432_s7  ;;  %v1333_v11 = vadd.f32 %v5091_v35, %v1332_v7 }
 0x620   : > { %v1337_v13 = vsel %vm1336_vm1, %v5091_v35, %v1333_v11 }
 0x621   : > { %v5143_v17 = vsel %vm1339_vm2, %v1341_v54, %v1337_v13 }
 0x622   : > { %v1359_v25 = vmul.f32 %v5143_v17, %v4964_v31  ;;  %v1352_v31 = vmul.f32 %v5104_v47, %v4941_v10 }
 0x623   : > { %v1381_v38 = vpop.permute.xlu2 %1380 }
 0x624   : > { %v1398_v43 = vmul.f32 %v1381_v38, %v5093_v30 }
 0x626   : > { %1420 = vrot.lane.b32.xlu1 %v1398_v43, %s4432_s7 }
 0x628   : > { %v1369_v46 = vpop.permute.xlu1 %1368 }
 0x629   : > { %v1392_v52 = vmul.f32 %v1369_v46, %v5104_v47 }
 0x62a   : > { %v1373_v39 = vpop.permute.xlu0 %1372 }
 0x62b   : > { %1408 = vrot.lane.b32.xlu0 %v1392_v52, %s4432_s7  ;;  %v1394_v21 = vmul.f32 %v1373_v39, %v5114_v59  ;;  %v1357_v52 = vmul.f32 %v5127_v63, %v4951_v20 }
 0x62d   : > { %1412 = vrot.lane.b32.xlu2 %v1394_v21, %s4432_s7 }
 0x630   : > { %v1379_v29 = vpop.permute.xlu1 %1378 }
 0x631   : > { %v1397_v61 = vmul.f32 %v1379_v29, %v5127_v63 }
 0x632   : > { %v1377_v62 = vpop.permute.xlu0 %1376 }
 0x633   : > { %1418 = vrot.lane.b32.xlu0 %v1397_v61, %s4432_s7  ;;  %v1396_v9 = vmul.f32 %v1377_v62, %v5132_v32 }
 0x635   : > { %1416 = vrot.lane.b32.xlu2 %v1396_v9, %s4432_s7 }
 0x63a   : > { %v1383_v14 = vpop.permute.xlu0 %1382 }
 0x63b   : > { %v1399_v5 = vmul.f32 %v1383_v14, %v5143_v17 }
 0x63d   : > { %1422 = vrot.lane.b32.xlu2 %v1399_v5, %s4432_s7 }
 0x687   : > { %v1413_v18 = vpop.permute.xlu2 %1412 }
 0x688   : > { %v5149_v22 = vadd.f32 %v1413_v18, %v1354_v16  ;;  %v1411_v26 = vpop.permute.xlu1 %1410 }
 0x689   : > { %v5154_v27 = vadd.f32 %v1411_v26, %v1353_v33 }
 0x68a   : > { %3928 = vtanh.f32 %v5149_v22 }
 0x68b   : > { %3930 = vtanh.f32 %v5154_v27 }
 0x68f   : > { %v1417_v24 = vpop.permute.xlu2 %1416 }
 0x690   : > { %v3929_v15 = vpop.eup %3928  ;;  %v5159_v35 = vadd.f32 %v1417_v24, %v1356_v12  ;;  %v1415_v38 = vpop.permute.xlu1 %1414 }
 0x691   : > { %1460 = vrot.lane.b32.xlu1 %v3929_v15, %s4431_s6  ;;  %v3931_v36 = vpop.eup %3930  ;;  %v5165_v40 = vadd.f32 %v1415_v38, %v1355_v8 }
 0x692   : > { %3932 = vtanh.f32 %v5159_v35  ;;  %1458 = vrot.lane.b32.xlu0 %v3931_v36, %s4431_s6 }
 0x693   : > { %3934 = vtanh.f32 %v5165_v40 }
 0x697   : > { %v1423_v28 = vpop.permute.xlu2 %1422 }
 0x698   : > { %v3933_v55 = vpop.eup %3932  ;;  %v5171_v43 = vadd.f32 %v1423_v28, %v1359_v25  ;;  %v1421_v1 = vpop.permute.xlu1 %1420 }
 0x699   : > { %1464 = vrot.lane.b32.xlu1 %v3933_v55, %s4431_s6  ;;  %v3935_v4 = vpop.eup %3934  ;;  %v5177_v46 = vadd.f32 %v1421_v1, %v1358_v42 }
 0x69a   : > { %3936 = vtanh.f32 %v5171_v43  ;;  %1462 = vrot.lane.b32.xlu0 %v3935_v4, %s4431_s6 }
 0x69b   : > { %3938 = vtanh.f32 %v5177_v46 }
 0x69d   : > { %v1409_v44 = vpop.permute.xlu0 %1408 }
 0x69e   : > { %v5183_v49 = vadd.f32 %v1409_v44, %v1352_v31  ;;  %v1488_v44 = vld [vmem:[#allocation2 + $0x3] sm:$0x1] }
 0x6a0   : > { %3940 = vtanh.f32 %v5183_v49  ;;  %v3937_v3 = vpop.eup %3936 }
 0x6a1   : > { %1470 = vrot.lane.b32.xlu1 %v3937_v3, %s4431_s6  ;;  %v3939_v50 = vpop.eup %3938 }
 0x6a2   : > { %1468 = vrot.lane.b32.xlu0 %v3939_v50, %s4431_s6 }
 0x6a5   : > { %v1419_v57 = vpop.permute.xlu0 %1418 }
 0x6a6   : > { %v3941_v58 = vpop.eup %3940  ;;  %v5190_v2 = vadd.f32 %v1419_v57, %v1357_v52  ;;  %v1490_v57 = vld [vmem:[#allocation2 + $0x13] sm:$0x1] }
 0x6a7   : > { %1456 = vrot.lane.b32.xlu2 %v3941_v58, %s4431_s6  ;;  %v1489_v58 = vld [vmem:[#allocation2 + $0xb] sm:$0x1] }
 0x6a8   : > { %3942 = vtanh.f32 %v5190_v2 }
 0x6ae   : > { %v3943_v10 = vpop.eup %3942 }
 0x6af   : > { %1466 = vrot.lane.b32.xlu2 %v3943_v10, %s4431_s6 }
 0x701   : > { %v1457_v39 = vpop.permute.xlu2 %1456 }
 0x702   : > { %v1480_v20 = vmul.f32 %v1457_v39, %v5104_v47 }
 0x703   : > { %v1461_v51 = vpop.permute.xlu1 %1460 }
 0x704   : > { %v1459_v21 = vpop.permute.xlu0 %1458  ;;  %v1482_v37 = vmul.f32 %v1461_v51, %v5114_v59  ;;  %v1496_v7 = vpack.c.bf16 %v1480_v20, %v1480_v20 }
 0x705   : > { %v1481_v23 = vmul.f32 %v1459_v21, %v5038_v34 }
 0x706   : > { %v1498_v41 = vpack.c.bf16 %v1482_v37, %v1482_v37  ;;  %v1512_v34 = vunpack.c.l.b16 %v1496_v7  ;;  %v1493_v37 = vld [vmem:[#allocation2 + $0x2b] sm:$0x1] }
 0x707   : > { %v1497_v53 = vpack.c.bf16 %v1481_v23, %v1481_v23 }
 0x708   : > { %v1514_v19 = vunpack.c.l.b16 %v1498_v41  ;;  %v1492_v41 = vld [vmem:[#allocation2 + $0x23] sm:$0x1] }
 0x709   : > { %v1513_v45 = vunpack.c.l.b16 %v1497_v53  ;;  %v1467_v29 = vpop.permute.xlu2 %1466 }
 0x70a   : > { %v1485_v59 = vmul.f32 %v1467_v29, %v5127_v63  ;;  %v1522_v56 = vrot.slane %v1514_v19, 6  ;;  %v1491_v29 = vld [vmem:[#allocation2 + $0x1b] sm:$0x1] }
 0x70b   : > { %v1465_v48 = vpop.permute.xlu1 %1464  ;;  %v1520_v11 = vrot.slane %v1513_v45, 7 }
 0x70c   : > { %v1484_v0 = vmul.f32 %v1465_v48, %v5132_v32  ;;  %v1463_v61 = vpop.permute.xlu0 %1462  ;;  %v1501_v14 = vpack.c.bf16 %v1485_v59, %v1485_v59 }
 0x70d   : > { %v1483_v9 = vmul.f32 %v1463_v61, %v5057_v6  ;;  %v1521_v54 = vsel %vm744_vm3, %v1520_v11, %v1512_v34 }
 0x70e   : > { %v1500_v62 = vpack.c.bf16 %v1484_v0, %v1484_v0  ;;  %v1523_v26 = vsel %vm747_vm4, %v1522_v56, %v1521_v54  ;;  %v1517_v63 = vunpack.c.l.b16 %v1501_v14 }
 0x70f   : > { %v1499_v60 = vpack.c.bf16 %v1483_v9, %v1483_v9  ;;  %v1495_v9 = vld [vmem:[#allocation2 + $0x3b] sm:$0x1] }
 0x710   : > { %v1516_v13 = vunpack.c.l.b16 %v1500_v62  ;;  %v1528_v25 = vrot.slane %v1517_v63, 3 }
 0x711   : > { %v1515_v47 = vunpack.c.l.b16 %v1499_v60  ;;  %v1494_v60 = vld [vmem:[#allocation2 + $0x33] sm:$0x1] }
 0x712   : > { %v1526_v33 = vrot.slane %v1516_v13, 4 }
 0x713   : > { %v1471_v5 = vpop.permute.xlu1 %1470  ;;  %v1524_v16 = vrot.slane %v1515_v47, 5 }
 0x714   : > { %v1487_v32 = vmul.f32 %v1471_v5, %v5143_v17  ;;  %v1469_v18 = vpop.permute.xlu0 %1468 }
 0x715   : > { %v1486_v12 = vmul.f32 %v1469_v18, %v5093_v30  ;;  %v1525_v24 = vsel %vm750_vm5, %v1524_v16, %v1523_v26 }
 0x716   : > { %v1503_v6 = vpack.c.bf16 %v1487_v32, %v1487_v32  ;;  %v1527_v38 = vsel %vm753_vm6, %v1526_v33, %v1525_v24 }
 0x717   : > { %v1502_v8 = vpack.c.bf16 %v1486_v12, %v1486_v12  ;;  %v1529_v17 = vsel %vm756_vm7, %v1528_v25, %v1527_v38 }
 0x718   : > { %v1519_v15 = vunpack.c.l.b16 %v1503_v6 }
 0x719   : > { %v1518_v36 = vunpack.c.l.b16 %v1502_v8 }
 0x71a   : > { %v1532_v28 = vrot.slane %v1519_v15, 1 }
 0x71b   : > { %v1530_v55 = vrot.slane %v1518_v36, 2 }
 0x71d   : > { %v1531_v42 = vsel %vm759_vm8, %v1530_v55, %v1529_v17 }
 0x71e   : > { %v1533_v1 = vsel %vm762_vm9, %v1532_v28, %v1531_v42 }
 0x71f   : > { %v1534_v4 = vpack.c.b16 %v1533_v1, %v1533_v1 }
 0x721   : > { %1535 = vrot.lane.b32.xlu2 %v1534_v4, %s4432_s7 }
 0x77b   : > { %v1536_v30 = vpop.permute.xlu2 %1535 }
 0x77c   : > { %3619 = vmatmul.msk.bf16.vlgmr.msrb.gmra.mxu1 %vm305_vm0, %v1536_v30 }
 0x7f9   : > { %v1549_v31 = vpop.f32.mrf.mxu1 }
 0x7fa   : > { %v1569_v3 = vadd.f32 %v1549_v31, %v1488_v44  ;;  %v1555_v50 = vrot.slane %v1549_v31, 2  ;;  %v1554_v52 = vrot.slane %v1549_v31, 1  ;;  %v1558_v51 = vrot.slane %v1549_v31, 5 }
 0x7fb   : > { %v1557_v21 = vrot.slane %v1549_v31, 4  ;;  %v1556_v23 = vrot.slane %v1549_v31, 3  ;;  %v1560_v19 = vrot.slane %v1549_v31, 7  ;;  %v1559_v62 = vrot.slane %v1549_v31, 6 }
 0x7fc   : > { %3944 = vtanh.f32 %v1569_v3  ;;  %v1571_v10 = vadd.f32 %v1555_v50, %v1490_v57  ;;  %v1570_v39 = vadd.f32 %v1554_v52, %v1489_v58  ;;  %v1574_v53 = vadd.f32 %v1558_v51, %v1493_v37 }
 0x7fd   : > { %v1573_v48 = vadd.f32 %v1557_v21, %v1492_v41  ;;  %v1572_v0 = vadd.f32 %v1556_v23, %v1491_v29  ;;  %v1576_v59 = vadd.f32 %v1560_v19, %v1495_v9  ;;  %v1575_v34 = vadd.f32 %v1559_v62, %v1494_v60 }
 0x7fe   : > { %3946 = vtanh.f32 %v1571_v10  ;;  %v3620_v14 = vmul.f32 -1.442695, %v1569_v3  ;;  %v3625_v5 = vmul.f32 -1.442695, %v1574_v53  ;;  %v3622_v6 = vmul.f32 -1.442695, %v1571_v10 }
 0x7ff   : > { %3948 = vtanh.f32 %v1570_v39  ;;  %v3621_v63 = vmul.f32 -1.442695, %v1570_v39  ;;  %v3624_v8 = vmul.f32 -1.442695, %v1573_v48  ;;  %v3623_v25 = vmul.f32 -1.442695, %v1572_v0 }
 0x800   : > { %3950 = vtanh.f32 %v1574_v53  ;;  %v3627_v44 = vmul.f32 -1.442695, %v1576_v59  ;;  %v3626_v52 = vmul.f32 -1.442695, %v1575_v34 }
 0x801   : > { %v1551_v20 = vpop.f32.mrf.mxu1  ;;  %3952 = vtanh.f32 %v1573_v48 }
 0x802   : > { %v3945_v45 = vpop.eup %3944  ;;  %3954 = vtanh.f32 %v1572_v0 }
 0x803   : > { %1753 = vrot.lane.b32.xlu2 %v3945_v45, %s4431_s6  ;;  %3956 = vtanh.f32 %v1576_v59 }
 0x804   : > { %v3947_v7 = vpop.eup %3946  ;;  %3958 = vtanh.f32 %v1575_v34 }
 0x805   : > { %v3949_v61 = vpop.eup %3948  ;;  %1757 = vrot.lane.b32.xlu1 %v3947_v7, %s4431_s6  ;;  %3960 = vpow2.f32 %v3620_v14 }
 0x806   : > { %1755 = vrot.lane.b32.xlu0 %v3949_v61, %s4431_s6  ;;  %v3951_v11 = vpop.eup %3950  ;;  %3962 = vpow2.f32 %v3625_v5 }
 0x807   : > { %v3953_v56 = vpop.eup %3952 }
 0x808   : > { %v3955_v13 = vpop.eup %3954 }
 0x809   : > { %v3957_v47 = vpop.eup %3956 }
 0x80a   : > { %v3959_v54 = vpop.eup %3958 }
 0x80b   : > { %1763 = vrot.lane.b32.xlu2 %v3951_v11, %s4431_s6  ;;  %v3961_v16 = vpop.eup %3960 }
 0x80c   : > { %v1601_v32 = vadd.f32 1.0, %v3961_v16  ;;  %v3963_v18 = vpop.eup %3962 }
 0x80d   : > { %1761 = vrot.lane.b32.xlu1 %v3953_v56, %s4431_s6  ;;  %v1606_v33 = vadd.f32 1.0, %v3963_v18 }
 0x80e   : > { %1759 = vrot.lane.b32.xlu0 %v3955_v13, %s4431_s6  ;;  %3964 = vrcp.f32 %v1601_v32  ;;  %v1620_v1 = vand.u32 2147483648, %v1601_v32  ;;  %vm1614_vm11 = vweird.f32 %v1601_v32  ;;  %v1618_v30 = vand.u32 2147483647, %v1601_v32 }
 0x80f   : > { %3966 = vrcp.f32 %v1606_v33  ;;  %v1695_v23 = vand.u32 2147483648, %v1606_v33  ;;  %vm1689_vm15 = vweird.f32 %v1606_v33  ;;  %v1693_v20 = vand.u32 2147483647, %v1606_v33 }
 0x810   : > { %3968 = vpow2.f32 %v3622_v6  ;;  %v1621_v57 = vor.u32 1.1754944e-38, %v1620_v1  ;;  %vm1619_vm13 = vcmp.eq.f32.partialorder %v1618_v30, 8.507059e+37 }
 0x811   : > { %3970 = vpow2.f32 %v3621_v63  ;;  %v1696_v0 = vor.u32 1.1754944e-38, %v1695_v23  ;;  %vm1694_vm2 = vcmp.eq.f32.partialorder %v1693_v20, 8.507059e+37 }
 0x812   : > { %3972 = vpow2.f32 %v3624_v8 }
 0x813   : > { %3974 = vpow2.f32 %v3623_v25 }
 0x814   : > { %v3965_v26 = vpop.eup %3964 }
 0x815   : > { %1767 = vrot.lane.b32.xlu1 %v3957_v47, %s4431_s6  ;;  %v1610_v12 = vmul.f32 %v3965_v26, %v1601_v32  ;;  %v3967_v15 = vpop.eup %3966  ;;  %vm1615_vm10 = vweird.f32 %v3965_v26 }
 0x816   : > { %1765 = vrot.lane.b32.xlu0 %v3959_v54, %s4431_s6  ;;  %v1685_v36 = vmul.f32 %v3967_v15, %v1606_v33  ;;  %v3969_v28 = vpop.eup %3968  ;;  %vm1616_vm12 = vmor %vm1614_vm11, %vm1615_vm10  ;;  %vm1690_vm14 = vweird.f32 %v3967_v15 }
 0x817   : > { %v1611_v24 = vsub.f32 1.0, %v1610_v12  ;;  %v3971_v55 = vpop.eup %3970  ;;  %v5220_v4 = vadd.f32 1.0, %v3969_v28  ;;  %vm1691_vm1 = vmor %vm1689_vm15, %vm1690_vm14 }
 0x818   : > { %v1686_v42 = vsub.f32 1.0, %v1685_v36  ;;  %v5222_v31 = vadd.f32 1.0, %v3971_v55  ;;  %v3973_v58 = vpop.eup %3972 }
 0x819   : > { %v1612_v38 = vmul.f32 %v3965_v26, %v1611_v24  ;;  %3976 = vrcp.f32 %v5220_v4  ;;  %v3975_v10 = vpop.eup %3974  ;;  %v5229_v53 = vadd.f32 1.0, %v3973_v58  ;;  %v1650_v6 = vand.u32 2147483648, %v5220_v4 }
 0x81a   : > { %v1687_v50 = vmul.f32 %v3967_v15, %v1686_v42  ;;  %3978 = vrcp.f32 %v5222_v31  ;;  %v5232_v41 = vadd.f32 1.0, %v3975_v10  ;;  %v1635_v8 = vand.u32 2147483648, %v5222_v31 }
 0x81b   : > { %v1613_v17 = vadd.f32 %v3965_v26, %v1612_v38  ;;  %3980 = vpow2.f32 %v3627_v44  ;;  %vm1629_vm14 = vweird.f32 %v5222_v31  ;;  %v1633_v38 = vand.u32 2147483647, %v5222_v31 }
 0x81c   : > { %v1688_v37 = vadd.f32 %v3967_v15, %v1687_v50  ;;  %3982 = vpow2.f32 %v3626_v52  ;;  %v1636_v30 = vor.u32 1.1754944e-38, %v1635_v8  ;;  %v1678_v23 = vand.u32 2147483647, %v5229_v53 }
 0x81d   : > { %v1617_v3 = vsel %vm1616_vm12, %v3965_v26, %v1613_v17  ;;  %3984 = vrcp.f32 %v5229_v53  ;;  %vm1644_vm12 = vweird.f32 %v5220_v4  ;;  %v1651_v17 = vor.u32 1.1754944e-38, %v1650_v6 }
 0x81e   : > { %v5226_v51 = vsel %vm1619_vm13, %v1621_v57, %v1617_v3  ;;  %v1692_v29 = vsel %vm1691_vm1, %v3967_v15, %v1688_v37  ;;  %3986 = vrcp.f32 %v5232_v41  ;;  %v1648_v15 = vand.u32 2147483647, %v5220_v4 }
 0x81f   : > { %v3977_v45 = vpop.eup %3976  ;;  %v5237_v9 = vsel %vm1694_vm2, %v1696_v0, %v1692_v29  ;;  %vm1634_vm2 = vcmp.eq.f32.partialorder %v1633_v38, 8.507059e+37  ;;  %v1680_v3 = vand.u32 2147483648, %v5229_v53  ;;  %v1665_v20 = vand.u32 2147483648, %v5232_v41 }
 0x820   : > { %v3979_v48 = vpop.eup %3978  ;;  %v1640_v61 = vmul.f32 %v3977_v45, %v5220_v4  ;;  %vm1645_vm10 = vweird.f32 %v3977_v45  ;;  %vm1649_vm1 = vcmp.eq.f32.partialorder %v1648_v15, 8.507059e+37 }
 0x821   : > { %v3981_v7 = vpop.eup %3980  ;;  %v1625_v11 = vmul.f32 %v3979_v48, %v5222_v31  ;;  %vm1630_vm11 = vweird.f32 %v3979_v48  ;;  %vm1646_vm13 = vmor %vm1644_vm12, %vm1645_vm10  ;;  %vm1674_vm12 = vweird.f32 %v5229_v53  ;;  %v1681_v0 = vor.u32 1.1754944e-38, %v1680_v3 }
 0x822   : > { %v3983_v19 = vpop.eup %3982  ;;  %v5241_v60 = vadd.f32 1.0, %v3981_v7  ;;  %v1641_v34 = vsub.f32 1.0, %v1640_v61  ;;  %vm5266_vm15 = vmor %vm1629_vm14, %vm1630_vm11  ;;  %vm1659_vm14 = vweird.f32 %v5232_v41  ;;  %v1666_v61 = vor.u32 1.1754944e-38, %v1665_v20 }
 0x823   : > { %v5244_v56 = vadd.f32 1.0, %v3983_v19  ;;  %v5246_v13 = vpop.eup %3984  ;;  %v1626_v47 = vsub.f32 1.0, %v1625_v11 }
 0x824   : > { %v5248_v54 = vpop.eup %3986  ;;  %3988 = vrcp.f32 %v5241_v60  ;;  %v1642_v14 = vmul.f32 %v3977_v45, %v1641_v34  ;;  %v1670_v5 = vmul.f32 %v5246_v13, %v5229_v53  ;;  %vm1675_vm10 = vweird.f32 %v5246_v13 }
 0x825   : > { %3990 = vrcp.f32 %v5244_v56  ;;  %v1627_v16 = vmul.f32 %v3979_v48, %v1626_v47  ;;  %v1655_v32 = vmul.f32 %v5248_v54, %v5232_v41  ;;  %vm1660_vm11 = vweird.f32 %v5248_v54 }
 0x826   : > { %v1643_v18 = vadd.f32 %v3977_v45, %v1642_v14  ;;  %v1671_v33 = vsub.f32 1.0, %v1670_v5  ;;  %v1725_v47 = vand.u32 2147483648, %v5241_v60  ;;  %v1723_v14 = vand.u32 2147483647, %v5241_v60 }
 0x827   : > { %v1628_v12 = vadd.f32 %v3979_v48, %v1627_v16  ;;  %v1656_v63 = vsub.f32 1.0, %v1655_v32  ;;  %v1710_v5 = vand.u32 2147483648, %v5244_v56  ;;  %v1708_v16 = vand.u32 2147483647, %v5244_v56 }
 0x828   : > { %v1647_v36 = vsel %vm1646_vm13, %v3977_v45, %v1643_v18  ;;  %v1672_v28 = vmul.f32 %v5246_v13, %v1671_v33  ;;  %vm1676_vm13 = vmor %vm1674_vm12, %vm1675_vm10  ;;  %v1663_v45 = vand.u32 2147483647, %v5232_v41  ;;  %vm1719_vm12 = vweird.f32 %v5241_v60 }
 0x829   : > { %v1632_v42 = vsel %vm5266_vm15, %v3979_v48, %v1628_v12  ;;  %v1657_v1 = vmul.f32 %v5248_v54, %v1656_v63  ;;  %v5278_v44 = vsel %vm1649_vm1, %v1651_v17, %v1647_v36  ;;  %vm1661_vm15 = vmor %vm1659_vm14, %vm1660_vm11  ;;  %vm1679_vm1 = vcmp.eq.f32.partialorder %v1678_v23, 8.507059e+37 }
 0x82a   : > { %v5256_v26 = vpop.eup %3988  ;;  %v5283_v57 = vsel %vm1634_vm2, %v1636_v30, %v1632_v42  ;;  %v1673_v58 = vadd.f32 %v5246_v13, %v1672_v28  ;;  %vm1664_vm2 = vcmp.eq.f32.partialorder %v1663_v45, 8.507059e+37  ;;  %vm1704_vm14 = vweird.f32 %v5244_v56 }
 0x82b   : > { %v5259_v24 = vpop.eup %3990  ;;  %v1715_v55 = vmul.f32 %v5256_v26, %v5241_v60  ;;  %vm1720_vm10 = vweird.f32 %v5256_v26  ;;  %v1726_v18 = vor.u32 1.1754944e-38, %v1725_v47  ;;  %v1711_v6 = vor.u32 1.1754944e-38, %v1710_v5 }
 0x82c   : > { %v1700_v4 = vmul.f32 %v5259_v24, %v5244_v56  ;;  %v1677_v48 = vsel %vm1676_vm13, %v5246_v13, %v1673_v58  ;;  %vm1705_vm11 = vweird.f32 %v5259_v24  ;;  %vm1721_vm13 = vmor %vm1719_vm12, %vm1720_vm10  ;;  %v1737_v56 = vmul.f32 %v5226_v51, %v5183_v49 }
 0x82d   : > { %v1716_v10 = vsub.f32 1.0, %v1715_v55  ;;  %v5302_v19 = vsel %vm1679_vm1, %v1681_v0, %v1677_v48  ;;  %vm1724_vm1 = vcmp.eq.f32.partialorder %v1723_v14, 8.507059e+37  ;;  %v1738_v36 = vmul.f32 %v5283_v57, %v5154_v27 }
 0x82e   : > { %v1701_v37 = vsub.f32 1.0, %v1700_v4  ;;  %v1742_v55 = vmul.f32 %v5237_v9, %v5190_v2 }
 0x82f   : > { %v1717_v29 = vmul.f32 %v5256_v26, %v1716_v10 }
 0x830   : > { %v1702_v53 = vmul.f32 %v5259_v24, %v1701_v37 }
 0x831   : > { %v1718_v34 = vadd.f32 %v5256_v26, %v1717_v29 }
 0x833   : > { %v1722_v32 = vsel %vm1721_vm13, %v5256_v26, %v1718_v34 }
 0x834   : > { %v5322_v12 = vsel %vm1724_vm1, %v1726_v18, %v1722_v32 }
 0x85d   : > { %v1754_v39 = vpop.permute.xlu2 %1753 }
 0x85e   : > { %v1777_v21 = vmul.f32 %v1754_v39, %v5226_v51 }
 0x860   : > { %1793 = vrot.lane.b32.xlu1 %v1777_v21, %s4432_s7  ;;  %v1658_v21 = vadd.f32 %v5248_v54, %v1657_v1 }
 0x862   : > { %v1662_v7 = vsel %vm1661_vm15, %v5248_v54, %v1658_v21  ;;  %v1703_v54 = vadd.f32 %v5259_v24, %v1702_v53  ;;  %vm1706_vm15 = vmor %vm1704_vm14, %vm1705_vm11 }
 0x864   : > { %v1707_v33 = vsel %vm1706_vm15, %v5259_v24, %v1703_v54 }
 0x865   : > { %v1764_v62 = vpop.permute.xlu2 %1763 }
 0x866   : > { %v1782_v59 = vmul.f32 %v1764_v62, %v5237_v9 }
 0x868   : > { %1803 = vrot.lane.b32.xlu1 %v1782_v59, %s4432_s7  ;;  %v5305_v59 = vsel %vm1664_vm2, %v1666_v61, %v1662_v7  ;;  %vm1709_vm2 = vcmp.eq.f32.partialorder %v1708_v16, 8.507059e+37 }
 0x869   : > { %v5325_v15 = vsel %vm1709_vm2, %v1711_v6, %v1707_v33  ;;  %v1740_v49 = vmul.f32 %v5305_v59, %v5165_v40  ;;  %v1739_v40 = vmul.f32 %v5278_v44, %v5149_v22  ;;  %v1744_v22 = vmul.f32 %v5322_v12, %v5171_v43 }
 0x877   : > { %v1758_v31 = vpop.permute.xlu1 %1757 }
 0x878   : > { %v1779_v50 = vmul.f32 %v1758_v31, %v5278_v44  ;;  %v1756_v52 = vpop.permute.xlu0 %1755  ;;  %v1743_v31 = vmul.f32 %v5325_v15, %v5177_v46  ;;  %v1741_v46 = vmul.f32 %v5302_v19, %v5159_v35 }
 0x879   : > { %v1778_v39 = vmul.f32 %v1756_v52, %v5283_v57 }
 0x87a   : > { %1797 = vrot.lane.b32.xlu0 %v1779_v50, %s4432_s7 }
 0x87b   : > { %1795 = vrot.lane.b32.xlu2 %v1778_v39, %s4432_s7 }
 0x87f   : > { %v1762_v62 = vpop.permute.xlu1 %1761 }
 0x880   : > { %v1781_v11 = vmul.f32 %v1762_v62, %v5302_v19  ;;  %v1760_v41 = vpop.permute.xlu0 %1759 }
 0x881   : > { %v1780_v13 = vmul.f32 %v1760_v41, %v5305_v59 }
 0x882   : > { %1801 = vrot.lane.b32.xlu0 %v1781_v11, %s4432_s7 }
 0x883   : > { %1799 = vrot.lane.b32.xlu2 %v1780_v13, %s4432_s7 }
 0x887   : > { %v1768_v60 = vpop.permute.xlu1 %1767 }
 0x888   : > { %v1784_v63 = vmul.f32 %v1768_v60, %v5322_v12  ;;  %v1766_v8 = vpop.permute.xlu0 %1765 }
 0x889   : > { %v1783_v38 = vmul.f32 %v1766_v8, %v5325_v15 }
 0x88a   : > { %1807 = vrot.lane.b32.xlu0 %v1784_v63, %s4432_s7 }
 0x88b   : > { %1805 = vrot.lane.b32.xlu2 %v1783_v38, %s4432_s7 }
 0x8d2   : > { %v1794_v26 = vpop.permute.xlu1 %1793 }
 0x8d3   : > { %v5332_v24 = vadd.f32 %v1794_v26, %v1737_v56 }
 0x8d5   : > { %3992 = vtanh.f32 %v5332_v24  ;;  %v1796_v25 = vpop.permute.xlu2 %1795 }
 0x8d6   : > { %v5337_v28 = vadd.f32 %v1796_v25, %v1738_v36 }
 0x8d8   : > { %3994 = vtanh.f32 %v5337_v28 }
 0x8da   : > { %v1804_v17 = vpop.permute.xlu1 %1803 }
 0x8db   : > { %v3993_v42 = vpop.eup %3992  ;;  %v5342_v1 = vadd.f32 %v1804_v17, %v1742_v55 }
 0x8dc   : > { %1841 = vrot.lane.b32.xlu0 %v3993_v42, %s4431_s6 }
 0x8dd   : > { %3996 = vtanh.f32 %v5342_v1  ;;  %v1800_v27 = vpop.permute.xlu2 %1799 }
 0x8de   : > { %v3995_v4 = vpop.eup %3994  ;;  %v5348_v30 = vadd.f32 %v1800_v27, %v1740_v49 }
 0x8df   : > { %1843 = vrot.lane.b32.xlu1 %v3995_v4, %s4431_s6 }
 0x8e0   : > { %3998 = vtanh.f32 %v5348_v30 }
 0x8e3   : > { %v3997_v2 = vpop.eup %3996 }
 0x8e4   : > { %1851 = vrot.lane.b32.xlu0 %v3997_v2, %s4431_s6 }
 0x8e5   : > { %v1806_v3 = vpop.permute.xlu2 %1805 }
 0x8e6   : > { %v3999_v50 = vpop.eup %3998  ;;  %v5355_v52 = vadd.f32 %v1806_v3, %v1743_v31 }
 0x8e7   : > { %1847 = vrot.lane.b32.xlu1 %v3999_v50, %s4431_s6 }
 0x8e8   : > { %4000 = vtanh.f32 %v5355_v52 }
 0x8ec   : > { %v1798_v58 = vpop.permute.xlu0 %1797 }
 0x8ed   : > { %v5361_v10 = vadd.f32 %v1798_v58, %v1739_v40 }
 0x8ee   : > { %v4001_v39 = vpop.eup %4000 }
 0x8ef   : > { %4002 = vtanh.f32 %v5361_v10  ;;  %1853 = vrot.lane.b32.xlu1 %v4001_v39, %s4431_s6 }
 0x8f4   : > { %v1802_v21 = vpop.permute.xlu0 %1801 }
 0x8f5   : > { %v4003_v37 = vpop.eup %4002  ;;  %v5367_v23 = vadd.f32 %v1802_v21, %v1741_v46  ;;  %v1873_v46 = vld [vmem:[#allocation2 + $0x4] sm:$0x1] }
 0x8f6   : > { %1845 = vrot.lane.b32.xlu2 %v4003_v37, %s4431_s6 }
 0x8f7   : > { %4004 = vtanh.f32 %v5367_v23 }
 0x8fc   : > { %v1808_v20 = vpop.permute.xlu0 %1807 }
 0x8fd   : > { %v4005_v45 = vpop.eup %4004  ;;  %v5373_v48 = vadd.f32 %v1808_v20, %v1744_v22  ;;  %v1875_v20 = vld [vmem:[#allocation2 + $0x14] sm:$0x1] }
 0x8fe   : > { %1849 = vrot.lane.b32.xlu2 %v4005_v45, %s4431_s6  ;;  %v1874_v45 = vld [vmem:[#allocation2 + $0xc] sm:$0x1] }
 0x8ff   : > { %4006 = vtanh.f32 %v5373_v48 }
 0x905   : > { %v4007_v35 = vpop.eup %4006 }
 0x906   : > { %1855 = vrot.lane.b32.xlu2 %v4007_v35, %s4431_s6 }
 0x94e   : > { %v1842_v29 = vpop.permute.xlu0 %1841 }
 0x94f   : > { %v1865_v43 = vmul.f32 %v1842_v29, %v5226_v51 }
 0x950   : > { %v1846_v0 = vpop.permute.xlu2 %1845 }
 0x951   : > { %v1844_v7 = vpop.permute.xlu1 %1843  ;;  %v1867_v53 = vmul.f32 %v1846_v0, %v5278_v44  ;;  %v1881_v47 = vpack.c.bf16 %v1865_v43, %v1865_v43 }
 0x952   : > { %v1866_v61 = vmul.f32 %v1844_v7, %v5283_v57 }
 0x953   : > { %v1883_v11 = vpack.c.bf16 %v1867_v53, %v1867_v53  ;;  %v1897_v57 = vunpack.c.l.b16 %v1881_v47  ;;  %v1878_v53 = vld [vmem:[#allocation2 + $0x2c] sm:$0x1] }
 0x954   : > { %v1882_v62 = vpack.c.bf16 %v1866_v61, %v1866_v61 }
 0x955   : > { %v1899_v5 = vunpack.c.l.b16 %v1883_v11  ;;  %v1877_v11 = vld [vmem:[#allocation2 + $0x24] sm:$0x1] }
 0x956   : > { %v1898_v41 = vunpack.c.l.b16 %v1882_v62  ;;  %v1852_v34 = vpop.permute.xlu0 %1851 }
 0x957   : > { %v1870_v18 = vmul.f32 %v1852_v34, %v5237_v9  ;;  %v1907_v6 = vrot.slane %v1899_v5, 6 }
 0x958   : > { %v1850_v13 = vpop.permute.xlu2 %1849  ;;  %v1905_v32 = vrot.slane %v1898_v41, 7 }
 0x959   : > { %v1869_v54 = vmul.f32 %v1850_v13, %v5302_v19  ;;  %v1848_v14 = vpop.permute.xlu1 %1847  ;;  %v1886_v8 = vpack.c.bf16 %v1870_v18, %v1870_v18  ;;  %v1876_v13 = vld [vmem:[#allocation2 + $0x1c] sm:$0x1] }
 0x95a   : > { %v1868_v16 = vmul.f32 %v1848_v14, %v5305_v59  ;;  %v1906_v63 = vsel %vm744_vm3, %v1905_v32, %v1897_v57  ;;  %v1880_v32 = vld [vmem:[#allocation2 + $0x3c] sm:$0x1] }
 0x95b   : > { %v1885_v44 = vpack.c.bf16 %v1869_v54, %v1869_v54  ;;  %v1908_v59 = vsel %vm747_vm4, %v1907_v6, %v1906_v63  ;;  %v1902_v9 = vunpack.c.l.b16 %v1886_v8 }
 0x95c   : > { %v1884_v33 = vpack.c.bf16 %v1868_v16, %v1868_v16 }
 0x95d   : > { %v1901_v60 = vunpack.c.l.b16 %v1885_v44  ;;  %v1913_v2 = vrot.slane %v1902_v9, 3 }
 0x95e   : > { %v1900_v51 = vunpack.c.l.b16 %v1884_v33  ;;  %v1879_v33 = vld [vmem:[#allocation2 + $0x34] sm:$0x1] }
 0x95f   : > { %v1911_v36 = vrot.slane %v1901_v60, 4 }
 0x960   : > { %v1909_v38 = vrot.slane %v1900_v51, 5  ;;  %v1856_v56 = vpop.permute.xlu2 %1855 }
 0x961   : > { %v1872_v19 = vmul.f32 %v1856_v56, %v5322_v12  ;;  %v1854_v26 = vpop.permute.xlu1 %1853 }
 0x962   : > { %v1871_v25 = vmul.f32 %v1854_v26, %v5325_v15  ;;  %v1910_v55 = vsel %vm750_vm5, %v1909_v38, %v1908_v59 }
 0x963   : > { %v1888_v17 = vpack.c.bf16 %v1872_v19, %v1872_v19  ;;  %v1912_v27 = vsel %vm753_vm6, %v1911_v36, %v1910_v55 }
 0x964   : > { %v1887_v42 = vpack.c.bf16 %v1871_v25, %v1871_v25  ;;  %v1914_v12 = vsel %vm756_vm7, %v1913_v2, %v1912_v27 }
 0x965   : > { %v1904_v49 = vunpack.c.l.b16 %v1888_v17 }
 0x966   : > { %v1903_v4 = vunpack.c.l.b16 %v1887_v42 }
 0x967   : > { %v1917_v31 = vrot.slane %v1904_v49, 1 }
 0x968   : > { %v1915_v3 = vrot.slane %v1903_v4, 2 }
 0x96a   : > { %v1916_v50 = vsel %vm759_vm8, %v1915_v3, %v1914_v12 }
 0x96b   : > { %v1918_v40 = vsel %vm762_vm9, %v1917_v31, %v1916_v50 }
 0x96c   : > { %v1919_v58 = vpack.c.b16 %v1918_v40, %v1918_v40 }
 0x96e   : > { %1920 = vrot.lane.b32.xlu0 %v1919_v58, %s4432_s7 }
 0x9e0   : > { %v1921_v15 = vpop.permute.xlu0 %1920 }
 0x9e1   : > { %3628 = vmatmul.msk.bf16.vlgmr.msrb.gmra.mxu2 %vm305_vm0, %v1921_v15 }
 0xa64   : > { %v1934_v39 = vpop.f32.mrf.mxu2 }
 0xa65   : > { %v1954_v21 = vadd.f32 %v1934_v39, %v1873_v46  ;;  %v1940_v37 = vrot.slane %v1934_v39, 2  ;;  %v1939_v22 = vrot.slane %v1934_v39, 1  ;;  %v1943_v0 = vrot.slane %v1934_v39, 5 }
 0xa66   : > { %v1942_v7 = vrot.slane %v1934_v39, 4  ;;  %v1941_v61 = vrot.slane %v1934_v39, 3  ;;  %v1945_v5 = vrot.slane %v1934_v39, 7  ;;  %v1944_v16 = vrot.slane %v1934_v39, 6 }
 0xa67   : > { %4008 = vtanh.f32 %v1954_v21  ;;  %v1956_v35 = vadd.f32 %v1940_v37, %v1875_v20  ;;  %v1955_v29 = vadd.f32 %v1939_v22, %v1874_v45  ;;  %v1959_v62 = vadd.f32 %v1943_v0, %v1878_v53 }
 0xa68   : > { %v1958_v34 = vadd.f32 %v1942_v7, %v1877_v11  ;;  %v1957_v47 = vadd.f32 %v1941_v61, %v1876_v13  ;;  %v1961_v44 = vadd.f32 %v1945_v5, %v1880_v32  ;;  %v1960_v57 = vadd.f32 %v1944_v16, %v1879_v33 }
 0xa69   : > { %4010 = vtanh.f32 %v1956_v35  ;;  %v3631_v8 = vmul.f32 -1.442695, %v1956_v35  ;;  %v3629_v25 = vmul.f32 -1.442695, %v1954_v21  ;;  %v3630_v55 = vmul.f32 -1.442695, %v1955_v29 }
 0xa6a   : > { %4012 = vtanh.f32 %v1955_v29  ;;  %v3633_v38 = vmul.f32 -1.442695, %v1958_v34  ;;  %v3636_v26 = vmul.f32 -1.442695, %v1961_v44  ;;  %v3634_v27 = vmul.f32 -1.442695, %v1959_v62 }
 0xa6b   : > { %4014 = vtanh.f32 %v1959_v62  ;;  %v3632_v3 = vmul.f32 -1.442695, %v1957_v47  ;;  %v3635_v45 = vmul.f32 -1.442695, %v1960_v57 }
 0xa6c   : > { %v1936_v43 = vpop.f32.mrf.mxu2  ;;  %4016 = vtanh.f32 %v1958_v34 }
 0xa6d   : > { %v4009_v41 = vpop.eup %4008  ;;  %4018 = vtanh.f32 %v1957_v47 }
 0xa6e   : > { %2138 = vrot.lane.b32.xlu0 %v4009_v41, %s4431_s6  ;;  %4020 = vtanh.f32 %v1961_v44 }
 0xa6f   : > { %v4011_v54 = vpop.eup %4010  ;;  %4022 = vtanh.f32 %v1960_v57 }
 0xa70   : > { %v4013_v14 = vpop.eup %4012  ;;  %2142 = vrot.lane.b32.xlu2 %v4011_v54, %s4431_s6  ;;  %4024 = vpow2.f32 %v3631_v8 }
 0xa71   : > { %2140 = vrot.lane.b32.xlu1 %v4013_v14, %s4431_s6  ;;  %v4015_v18 = vpop.eup %4014  ;;  %4026 = vpow2.f32 %v3633_v38 }
 0xa72   : > { %v4017_v6 = vpop.eup %4016 }
 0xa73   : > { %v4019_v60 = vpop.eup %4018 }
 0xa74   : > { %v4021_v51 = vpop.eup %4020 }
 0xa75   : > { %v4023_v63 = vpop.eup %4022 }
 0xa76   : > { %2148 = vrot.lane.b32.xlu0 %v4015_v18, %s4431_s6  ;;  %v4025_v56 = vpop.eup %4024 }
 0xa77   : > { %v1988_v19 = vadd.f32 1.0, %v4025_v56  ;;  %v4027_v36 = vpop.eup %4026 }
 0xa78   : > { %2146 = vrot.lane.b32.xlu2 %v4017_v6, %s4431_s6  ;;  %v5403_v59 = vadd.f32 1.0, %v4027_v36 }
 0xa79   : > { %2144 = vrot.lane.b32.xlu1 %v4019_v60, %s4431_s6  ;;  %4028 = vrcp.f32 %v1988_v19  ;;  %v2035_v37 = vand.u32 2147483648, %v1988_v19  ;;  %vm2029_vm11 = vweird.f32 %v1988_v19  ;;  %v2033_v20 = vand.u32 2147483647, %v1988_v19 }
 0xa7a   : > { %4030 = vpow2.f32 %v3636_v26  ;;  %v2065_v54 = vand.u32 2147483648, %v5403_v59  ;;  %vm2059_vm15 = vweird.f32 %v5403_v59  ;;  %v2063_v5 = vand.u32 2147483647, %v5403_v59 }
 0xa7b   : > { %4032 = vrcp.f32 %v5403_v59  ;;  %v2036_v53 = vor.u32 1.1754944e-38, %v2035_v37  ;;  %vm2034_vm13 = vcmp.eq.f32.partialorder %v2033_v20, 8.507059e+37 }
 0xa7c   : > { %4034 = vpow2.f32 %v3629_v25  ;;  %v2066_v33 = vor.u32 1.1754944e-38, %v2065_v54  ;;  %vm2064_vm2 = vcmp.eq.f32.partialorder %v2063_v5, 8.507059e+37 }
 0xa7d   : > { %4036 = vpow2.f32 %v3630_v55 }
 0xa7f   : > { %v4029_v9 = vpop.eup %4028 }
 0xa80   : > { %2152 = vrot.lane.b32.xlu2 %v4021_v51, %s4431_s6  ;;  %v4031_v17 = vpop.eup %4030  ;;  %v2025_v42 = vmul.f32 %v4029_v9, %v1988_v19  ;;  %vm2030_vm10 = vweird.f32 %v4029_v9 }
 0xa81   : > { %2150 = vrot.lane.b32.xlu1 %v4023_v63, %s4431_s6  ;;  %v5406_v49 = vadd.f32 1.0, %v4031_v17  ;;  %v4033_v2 = vpop.eup %4032  ;;  %vm2031_vm12 = vmor %vm2029_vm11, %vm2030_vm10 }
 0xa82   : > { %v2026_v4 = vsub.f32 1.0, %v2025_v42  ;;  %v4035_v31 = vpop.eup %4034  ;;  %v2055_v50 = vmul.f32 %v4033_v2, %v5403_v59  ;;  %vm2060_vm14 = vweird.f32 %v4033_v2 }
 0xa83   : > { %4038 = vrcp.f32 %v5406_v49  ;;  %v4037_v40 = vpop.eup %4036  ;;  %v5410_v58 = vadd.f32 1.0, %v4035_v31  ;;  %vm2061_vm1 = vmor %vm2059_vm15, %vm2060_vm14  ;;  %v2110_v19 = vand.u32 2147483648, %v5406_v49  ;;  %vm2104_vm11 = vweird.f32 %v5406_v49 }
 0xa84   : > { %v2027_v12 = vmul.f32 %v4029_v9, %v2026_v4  ;;  %4040 = vpow2.f32 %v3634_v27  ;;  %v2056_v39 = vsub.f32 1.0, %v2055_v50  ;;  %v5412_v46 = vadd.f32 1.0, %v4037_v40 }
 0xa85   : > { %4042 = vpow2.f32 %v3632_v3  ;;  %v2108_v59 = vand.u32 2147483647, %v5406_v49  ;;  %v2111_v17 = vor.u32 1.1754944e-38, %v2110_v19  ;;  %v2005_v3 = vand.u32 2147483648, %v5410_v58 }
 0xa86   : > { %v2028_v15 = vadd.f32 %v4029_v9, %v2027_v12  ;;  %4044 = vrcp.f32 %v5410_v58  ;;  %v2057_v29 = vmul.f32 %v4033_v2, %v2056_v39  ;;  %vm1999_vm15 = vweird.f32 %v5410_v58 }
 0xa87   : > { %4046 = vrcp.f32 %v5412_v46  ;;  %v2003_v50 = vand.u32 2147483647, %v5410_v58  ;;  %v2006_v20 = vor.u32 1.1754944e-38, %v2005_v3 }
 0xa88   : > { %v2032_v35 = vsel %vm2031_vm12, %v4029_v9, %v2028_v15  ;;  %4048 = vpow2.f32 %v3635_v45  ;;  %v2058_v34 = vadd.f32 %v4033_v2, %v2057_v29  ;;  %v2018_v45 = vand.u32 2147483647, %v5412_v46 }
 0xa89   : > { %v5414_v21 = vpop.eup %4038  ;;  %v5424_v11 = vsel %vm2034_vm13, %v2036_v53, %v2032_v35  ;;  %vm2109_vm13 = vcmp.eq.f32.partialorder %v2108_v59, 8.507059e+37 }
 0xa8a   : > { %v4041_v22 = vpop.eup %4040  ;;  %v2100_v0 = vmul.f32 %v5414_v21, %v5406_v49  ;;  %v2062_v32 = vsel %vm2061_vm1, %v4033_v2, %v2058_v34  ;;  %vm2105_vm10 = vweird.f32 %v5414_v21 }
 0xa8b   : > { %v4043_v7 = vpop.eup %4042  ;;  %v5420_v61 = vadd.f32 1.0, %v4041_v22  ;;  %v5444_v51 = vsel %vm2064_vm2, %v2066_v33, %v2062_v32  ;;  %vm2106_vm12 = vmor %vm2104_vm11, %vm2105_vm10  ;;  %v2020_v22 = vand.u32 2147483648, %v5412_v46  ;;  %vm2014_vm10 = vweird.f32 %v5412_v46 }
 0xa8c   : > { %v5422_v62 = vpop.eup %4044  ;;  %v2101_v13 = vsub.f32 1.0, %v2100_v0  ;;  %v5427_v47 = vadd.f32 1.0, %v4043_v7  ;;  %vm2004_vm11 = vcmp.eq.f32.partialorder %v2003_v50, 8.507059e+37 }
 0xa8d   : > { %4050 = vrcp.f32 %v5420_v61  ;;  %v5431_v14 = vpop.eup %4046  ;;  %v1995_v16 = vmul.f32 %v5422_v62, %v5410_v58  ;;  %vm2000_vm14 = vweird.f32 %v5422_v62  ;;  %v2078_v54 = vand.u32 2147483647, %v5420_v61 }
 0xa8e   : > { %v2102_v18 = vmul.f32 %v5414_v21, %v2101_v13  ;;  %4052 = vrcp.f32 %v5427_v47  ;;  %v4049_v44 = vpop.eup %4048  ;;  %v2010_v57 = vmul.f32 %v5431_v14, %v5412_v46  ;;  %vm5473_vm1 = vmor %vm1999_vm15, %vm2000_vm14  ;;  %vm2015_vm2 = vweird.f32 %v5431_v14 }
 0xa8f   : > { %v1996_v6 = vsub.f32 1.0, %v1995_v16  ;;  %v5449_v56 = vadd.f32 1.0, %v4049_v44  ;;  %vm2019_vm14 = vcmp.eq.f32.partialorder %v2018_v45, 8.507059e+37  ;;  %v2080_v46 = vand.u32 2147483648, %v5420_v61 }
 0xa90   : > { %v2103_v38 = vadd.f32 %v5414_v21, %v2102_v18  ;;  %v2011_v26 = vsub.f32 1.0, %v2010_v57  ;;  %vm2074_vm15 = vweird.f32 %v5420_v61  ;;  %v2050_v18 = vand.u32 2147483648, %v5427_v47 }
 0xa91   : > { %v1997_v25 = vmul.f32 %v5422_v62, %v1996_v6  ;;  %4054 = vrcp.f32 %v5449_v56  ;;  %v2081_v44 = vor.u32 1.1754944e-38, %v2080_v46  ;;  %v2048_v33 = vand.u32 2147483647, %v5427_v47 }
 0xa92   : > { %v2107_v55 = vsel %vm2106_vm12, %v5414_v21, %v2103_v38  ;;  %v2012_v42 = vmul.f32 %v5431_v14, %v2011_v26  ;;  %vm2016_vm12 = vmor %vm2014_vm10, %vm2015_vm2  ;;  %vm2044_vm10 = vweird.f32 %v5427_v47  ;;  %v2095_v59 = vand.u32 2147483648, %v5449_v56 }
 0xa93   : > { %v5442_v60 = vpop.eup %4050  ;;  %v1998_v4 = vadd.f32 %v5422_v62, %v1997_v25  ;;  %v5467_v2 = vsel %vm2109_vm13, %v2111_v17, %v2107_v55 }
 0xa94   : > { %v5452_v36 = vpop.eup %4052  ;;  %v2070_v9 = vmul.f32 %v5442_v60, %v5420_v61  ;;  %v2013_v15 = vadd.f32 %v5431_v14, %v2012_v42  ;;  %vm2075_vm13 = vweird.f32 %v5442_v60 }
 0xa95   : > { %v2040_v27 = vmul.f32 %v5452_v36, %v5427_v47  ;;  %v2002_v37 = vsel %vm5473_vm1, %v5422_v62, %v1998_v4  ;;  %vm2076_vm1 = vmor %vm2074_vm15, %vm2075_vm13  ;;  %vm2045_vm2 = vweird.f32 %v5452_v36  ;;  %vm2049_vm13 = vcmp.eq.f32.partialorder %v2048_v33, 8.507059e+37 }
 0xa96   : > { %v2071_v49 = vsub.f32 1.0, %v2070_v9  ;;  %v5487_v29 = vsel %vm2004_vm11, %v2006_v20, %v2002_v37  ;;  %v2017_v0 = vsel %vm2016_vm12, %v5431_v14, %v2013_v15  ;;  %vm2079_vm11 = vcmp.eq.f32.partialorder %v2078_v54, 8.507059e+37  ;;  %vm2046_vm12 = vmor %vm2044_vm10, %vm2045_vm2 }
 0xa97   : > { %v2041_v39 = vsub.f32 1.0, %v2040_v27  ;;  %v4055_v21 = vpop.eup %4054  ;;  %vm2089_vm15 = vweird.f32 %v5449_v56  ;;  %v2096_v9 = vor.u32 1.1754944e-38, %v2095_v59  ;;  %v2122_v27 = vmul.f32 %v5487_v29, %v5332_v24 }
 0xa98   : > { %v2072_v58 = vmul.f32 %v5442_v60, %v2071_v49  ;;  %v2085_v53 = vmul.f32 %v4055_v21, %v5449_v56  ;;  %v2126_v24 = vmul.f32 %v5444_v51, %v5367_v23  ;;  %v2129_v37 = vmul.f32 %v5467_v2, %v5373_v48 }
 0xa99   : > { %v2042_v7 = vmul.f32 %v5452_v36, %v2041_v39 }
 0xa9a   : > { %v2086_v16 = vsub.f32 1.0, %v2085_v53 }
 0xa9b   : > { %v2043_v5 = vadd.f32 %v5452_v36, %v2042_v7 }
 0xa9d   : > { %v2047_v6 = vsel %vm2046_vm12, %v5452_v36, %v2043_v5  ;;  %v2093_v36 = vand.u32 2147483647, %v5449_v56  ;;  %v2124_v56 = vmul.f32 %v5424_v11, %v5361_v10 }
 0xa9f   : > { %vm2094_vm2 = vcmp.eq.f32.partialorder %v2093_v36, 8.507059e+37 }
 0xaca   : > { %v2143_v43 = vpop.permute.xlu2 %2142 }
 0xacb   : > { %v2164_v41 = vmul.f32 %v2143_v43, %v5424_v11  ;;  %v2021_v43 = vor.u32 1.1754944e-38, %v2020_v22 }
 0xacd   : > { %2182 = vrot.lane.b32.xlu1 %v2164_v41, %s4432_s7  ;;  %v2073_v41 = vadd.f32 %v5442_v60, %v2072_v58  ;;  %v5496_v13 = vsel %vm2019_vm14, %v2021_v43, %v2017_v0  ;;  %vm2090_vm14 = vweird.f32 %v4055_v21 }
 0xace   : > { %v2123_v20 = vmul.f32 %v5496_v13, %v5337_v28 }
 0xacf   : > { %v2077_v32 = vsel %vm2076_vm1, %v5442_v60, %v2073_v41  ;;  %v2051_v60 = vor.u32 1.1754944e-38, %v2050_v18  ;;  %vm2091_vm1 = vmor %vm2089_vm15, %vm2090_vm14 }
 0xad0   : > { %v5509_v57 = vsel %vm2079_vm11, %v2081_v44, %v2077_v32 }
 0xad1   : > { %v5513_v38 = vsel %vm2049_vm13, %v2051_v60, %v2047_v6 }
 0xad2   : > { %v2147_v63 = vpop.permute.xlu2 %2146  ;;  %v2125_v48 = vmul.f32 %v5513_v38, %v5348_v30 }
 0xad3   : > { %v2166_v8 = vmul.f32 %v2147_v63, %v5444_v51  ;;  %v2087_v63 = vmul.f32 %v4055_v21, %v2086_v16 }
 0xad5   : > { %2186 = vrot.lane.b32.xlu1 %v2166_v8, %s4432_s7  ;;  %v2088_v47 = vadd.f32 %v4055_v21, %v2087_v63 }
 0xad7   : > { %v2092_v25 = vsel %vm2091_vm1, %v4055_v21, %v2088_v47 }
 0xad8   : > { %v5521_v55 = vsel %vm2094_vm2, %v2096_v9, %v2092_v25 }
 0xad9   : > { %v2128_v28 = vmul.f32 %v5521_v55, %v5355_v52 }
 0xada   : > { %v2153_v31 = vpop.permute.xlu2 %2152 }
 0xadb   : > { %v2169_v12 = vmul.f32 %v2153_v31, %v5467_v2 }
 0xadd   : > { %2192 = vrot.lane.b32.xlu1 %v2169_v12, %s4432_s7  ;;  %v2127_v12 = vmul.f32 %v5509_v57, %v5342_v1 }
 0xae0   : > { %v2139_v35 = vpop.permute.xlu0 %2138 }
 0xae1   : > { %v2162_v62 = vmul.f32 %v2139_v35, %v5487_v29 }
 0xae3   : > { %v2141_v34 = vpop.permute.xlu1 %2140  ;;  %2178 = vrot.lane.b32.xlu2 %v2162_v62, %s4432_s7 }
 0xae4   : > { %v2163_v14 = vmul.f32 %v2141_v34, %v5496_v13 }
 0xae6   : > { %2180 = vrot.lane.b32.xlu0 %v2163_v14, %s4432_s7 }
 0xae8   : > { %v2149_v61 = vpop.permute.xlu0 %2148 }
 0xae9   : > { %v2167_v8 = vmul.f32 %v2149_v61, %v5509_v57 }
 0xaeb   : > { %v2145_v19 = vpop.permute.xlu1 %2144  ;;  %2188 = vrot.lane.b32.xlu2 %v2167_v8, %s4432_s7 }
 0xaec   : > { %v2165_v26 = vmul.f32 %v2145_v19, %v5513_v38 }
 0xaee   : > { %2184 = vrot.lane.b32.xlu0 %v2165_v26, %s4432_s7 }
 0xaf3   : > { %v2151_v17 = vpop.permute.xlu1 %2150 }
 0xaf4   : > { %v2168_v42 = vmul.f32 %v2151_v17, %v5521_v55 }
 0xaf6   : > { %2190 = vrot.lane.b32.xlu0 %v2168_v42, %s4432_s7 }
 0xb3d   : > { %v2179_v4 = vpop.permute.xlu2 %2178 }
 0xb3e   : > { %v5527_v49 = vadd.f32 %v2179_v4, %v2122_v27 }
 0xb3f   : > { %v2183_v31 = vpop.permute.xlu1 %2182 }
 0xb40   : > { %4056 = vtanh.f32 %v5527_v49  ;;  %v5532_v3 = vadd.f32 %v2183_v31, %v2124_v56 }
 0xb42   : > { %4058 = vtanh.f32 %v5532_v3 }
 0xb45   : > { %v2189_v50 = vpop.permute.xlu2 %2188 }
 0xb46   : > { %v4057_v40 = vpop.eup %4056  ;;  %v5537_v15 = vadd.f32 %v2189_v50, %v2127_v12 }
 0xb47   : > { %2226 = vrot.lane.b32.xlu1 %v4057_v40, %s4431_s6  ;;  %v2187_v10 = vpop.permute.xlu1 %2186 }
 0xb48   : > { %v4059_v39 = vpop.eup %4058  ;;  %4060 = vtanh.f32 %v5537_v15  ;;  %v5543_v21 = vadd.f32 %v2187_v10, %v2126_v24 }
 0xb49   : > { %2230 = vrot.lane.b32.xlu0 %v4059_v39, %s4431_s6 }
 0xb4a   : > { %4062 = vtanh.f32 %v5543_v21 }
 0xb4e   : > { %v4061_v1 = vpop.eup %4060 }
 0xb4f   : > { %2236 = vrot.lane.b32.xlu1 %v4061_v1, %s4431_s6  ;;  %v2193_v22 = vpop.permute.xlu1 %2192 }
 0xb50   : > { %v4063_v23 = vpop.eup %4062  ;;  %v5550_v58 = vadd.f32 %v2193_v22, %v2129_v37 }
 0xb51   : > { %2234 = vrot.lane.b32.xlu0 %v4063_v23, %s4431_s6 }
 0xb52   : > { %4064 = vtanh.f32 %v5550_v58 }
 0xb58   : > { %v4065_v45 = vpop.eup %4064  ;;  %v2181_v35 = vpop.permute.xlu0 %2180 }
 0xb59   : > { %v5556_v0 = vadd.f32 %v2181_v35, %v2123_v20  ;;  %2240 = vrot.lane.b32.xlu0 %v4065_v45, %s4431_s6 }
 0xb5b   : > { %4066 = vtanh.f32 %v5556_v0 }
 0xb60   : > { %v2185_v7 = vpop.permute.xlu0 %2184 }
 0xb61   : > { %v4067_v53 = vpop.eup %4066  ;;  %v5562_v62 = vadd.f32 %v2185_v7, %v2125_v48  ;;  %v2258_v48 = vld [vmem:[#allocation2 + $0x5] sm:$0x1] }
 0xb62   : > { %2228 = vrot.lane.b32.xlu2 %v4067_v53, %s4431_s6 }
 0xb63   : > { %4068 = vtanh.f32 %v5562_v62 }
 0xb68   : > { %v2191_v43 = vpop.permute.xlu0 %2190 }
 0xb69   : > { %v4069_v41 = vpop.eup %4068  ;;  %v5568_v46 = vadd.f32 %v2191_v43, %v2128_v28  ;;  %v2260_v43 = vld [vmem:[#allocation2 + $0x15] sm:$0x1] }
 0xb6a   : > { %2232 = vrot.lane.b32.xlu2 %v4069_v41, %s4431_s6  ;;  %v2259_v41 = vld [vmem:[#allocation2 + $0xd] sm:$0x1] }
 0xb6b   : > { %4070 = vtanh.f32 %v5568_v46 }
 0xb71   : > { %v4071_v30 = vpop.eup %4070 }
 0xb72   : > { %2238 = vrot.lane.b32.xlu2 %v4071_v30, %s4431_s6 }
 0xbb9   : > { %v2227_v34 = vpop.permute.xlu1 %2226 }
 0xbba   : > { %v2250_v52 = vmul.f32 %v2227_v34, %v5487_v29 }
 0xbbb   : > { %v2231_v54 = vpop.permute.xlu0 %2230 }
 0xbbc   : > { %v2229_v14 = vpop.permute.xlu2 %2228  ;;  %v2252_v5 = vmul.f32 %v2231_v54, %v5424_v11  ;;  %v2266_v6 = vpack.c.bf16 %v2250_v52, %v2250_v52 }
 0xbbd   : > { %v2251_v16 = vmul.f32 %v2229_v14, %v5496_v13 }
 0xbbe   : > { %v2268_v18 = vpack.c.bf16 %v2252_v5, %v2252_v5  ;;  %v2282_v13 = vunpack.c.l.b16 %v2266_v6  ;;  %v2263_v5 = vld [vmem:[#allocation2 + $0x2d] sm:$0x1] }
 0xbbf   : > { %v2267_v32 = vpack.c.bf16 %v2251_v16, %v2251_v16 }
 0xbc0   : > { %v2284_v60 = vunpack.c.l.b16 %v2268_v18  ;;  %v2262_v18 = vld [vmem:[#allocation2 + $0x25] sm:$0x1] }
 0xbc1   : > { %v2283_v44 = vunpack.c.l.b16 %v2267_v32  ;;  %v2237_v33 = vpop.permute.xlu1 %2236 }
 0xbc2   : > { %v2255_v47 = vmul.f32 %v2237_v33, %v5509_v57  ;;  %v2292_v36 = vrot.slane %v2284_v60, 6 }
 0xbc3   : > { %v2235_v61 = vpop.permute.xlu0 %2234  ;;  %v2290_v26 = vrot.slane %v2283_v44, 7 }
 0xbc4   : > { %v2254_v63 = vmul.f32 %v2235_v61, %v5444_v51  ;;  %v2233_v8 = vpop.permute.xlu2 %2232  ;;  %v2271_v17 = vpack.c.bf16 %v2255_v47, %v2255_v47  ;;  %v2261_v61 = vld [vmem:[#allocation2 + $0x1d] sm:$0x1] }
 0xbc5   : > { %v2253_v19 = vmul.f32 %v2233_v8, %v5513_v38  ;;  %v2291_v9 = vsel %vm744_vm3, %v2290_v26, %v2282_v13  ;;  %v2265_v26 = vld [vmem:[#allocation2 + $0x3d] sm:$0x1] }
 0xbc6   : > { %v2270_v11 = vpack.c.bf16 %v2254_v63, %v2254_v63  ;;  %v2293_v38 = vsel %vm747_vm4, %v2292_v36, %v2291_v9  ;;  %v2287_v57 = vunpack.c.l.b16 %v2271_v17 }
 0xbc7   : > { %v2269_v59 = vpack.c.bf16 %v2253_v19, %v2253_v19 }
 0xbc8   : > { %v2286_v25 = vunpack.c.l.b16 %v2270_v11  ;;  %v2298_v1 = vrot.slane %v2287_v57, 3 }
 0xbc9   : > { %v2285_v29 = vunpack.c.l.b16 %v2269_v59  ;;  %v2264_v59 = vld [vmem:[#allocation2 + $0x35] sm:$0x1] }
 0xbca   : > { %v2296_v56 = vrot.slane %v2286_v25, 4 }
 0xbcb   : > { %v2294_v42 = vrot.slane %v2285_v29, 5  ;;  %v2241_v27 = vpop.permute.xlu0 %2240 }
 0xbcc   : > { %v2257_v51 = vmul.f32 %v2241_v27, %v5467_v2  ;;  %v2239_v4 = vpop.permute.xlu2 %2238 }
 0xbcd   : > { %v2256_v31 = vmul.f32 %v2239_v4, %v5521_v55  ;;  %v2295_v12 = vsel %vm750_vm5, %v2294_v42, %v2293_v38 }
 0xbce   : > { %v2273_v50 = vpack.c.bf16 %v2257_v51, %v2257_v51  ;;  %v2297_v10 = vsel %vm753_vm6, %v2296_v56, %v2295_v12 }
 0xbcf   : > { %v2272_v40 = vpack.c.bf16 %v2256_v31, %v2256_v31  ;;  %v2299_v2 = vsel %vm756_vm7, %v2298_v1, %v2297_v10 }
 0xbd0   : > { %v2289_v24 = vunpack.c.l.b16 %v2273_v50 }
 0xbd1   : > { %v2288_v39 = vunpack.c.l.b16 %v2272_v40 }
 0xbd2   : > { %v2302_v37 = vrot.slane %v2289_v24, 1 }
 0xbd3   : > { %v2300_v22 = vrot.slane %v2288_v39, 2 }
 0xbd5   : > { %v2301_v23 = vsel %vm759_vm8, %v2300_v22, %v2299_v2 }
 0xbd6   : > { %v2303_v20 = vsel %vm762_vm9, %v2302_v37, %v2301_v23 }
 0xbd7   : > { %v2304_v45 = vpack.c.b16 %v2303_v20, %v2303_v20 }
 0xbd9   : > { %2305 = vrot.lane.b32.xlu1 %v2304_v45, %s4432_s7 }
 0xc4b   : > { %v2306_v55 = vpop.permute.xlu1 %2305 }
 0xc4c   : > { %3637 = vmatmul.msk.bf16.vlgmr.msra.gmra.mxu3 %vm305_vm0, %v2306_v55 }
 0xccf   : > { %v2319_v35 = vpop.f32.mrf.mxu3 }
 0xcd0   : > { %v2339_v7 = vadd.f32 %v2319_v35, %v2258_v48  ;;  %v2325_v53 = vrot.slane %v2319_v35, 2  ;;  %v2324_v28 = vrot.slane %v2319_v35, 1  ;;  %v2328_v54 = vrot.slane %v2319_v35, 5 }
 0xcd1   : > { %v2327_v14 = vrot.slane %v2319_v35, 4  ;;  %v2326_v16 = vrot.slane %v2319_v35, 3  ;;  %v2330_v60 = vrot.slane %v2319_v35, 7  ;;  %v2329_v19 = vrot.slane %v2319_v35, 6 }
 0xcd2   : > { %4072 = vtanh.f32 %v2339_v7  ;;  %v2341_v30 = vadd.f32 %v2325_v53, %v2260_v43  ;;  %v2340_v34 = vadd.f32 %v2324_v28, %v2259_v41  ;;  %v2344_v32 = vadd.f32 %v2328_v54, %v2263_v5 }
 0xcd3   : > { %v2343_v33 = vadd.f32 %v2327_v14, %v2262_v18  ;;  %v2342_v6 = vadd.f32 %v2326_v16, %v2261_v61  ;;  %v2346_v11 = vadd.f32 %v2330_v60, %v2265_v26  ;;  %v2345_v13 = vadd.f32 %v2329_v19, %v2264_v59 }
 0xcd4   : > { %4074 = vtanh.f32 %v2341_v30  ;;  %v3639_v17 = vmul.f32 -1.442695, %v2340_v34  ;;  %v3638_v38 = vmul.f32 -1.442695, %v2339_v7  ;;  %v3640_v12 = vmul.f32 -1.442695, %v2341_v30 }
 0xcd5   : > { %4076 = vtanh.f32 %v2340_v34  ;;  %v3641_v42 = vmul.f32 -1.442695, %v2342_v6  ;;  %v3644_v4 = vmul.f32 -1.442695, %v2345_v13  ;;  %v3643_v24 = vmul.f32 -1.442695, %v2344_v32 }
 0xcd6   : > { %4078 = vtanh.f32 %v2344_v32  ;;  %v3642_v22 = vmul.f32 -1.442695, %v2343_v33  ;;  %v3645_v28 = vmul.f32 -1.442695, %v2346_v11 }
 0xcd7   : > { %v2321_v52 = vpop.f32.mrf.mxu3  ;;  %4080 = vtanh.f32 %v2343_v33 }
 0xcd8   : > { %v4073_v44 = vpop.eup %4072  ;;  %4082 = vtanh.f32 %v2342_v6 }
 0xcd9   : > { %2523 = vrot.lane.b32.xlu1 %v4073_v44, %s4431_s6  ;;  %4084 = vtanh.f32 %v2346_v11 }
 0xcda   : > { %v4075_v63 = vpop.eup %4074  ;;  %4086 = vtanh.f32 %v2345_v13 }
 0xcdb   : > { %v4077_v8 = vpop.eup %4076  ;;  %2527 = vrot.lane.b32.xlu0 %v4075_v63, %s4431_s6  ;;  %4088 = vpow2.f32 %v3639_v17 }
 0xcdc   : > { %2525 = vrot.lane.b32.xlu2 %v4077_v8, %s4431_s6  ;;  %v4079_v47 = vpop.eup %4078  ;;  %4090 = vpow2.f32 %v3641_v42 }
 0xcdd   : > { %v4081_v36 = vpop.eup %4080 }
 0xcde   : > { %v4083_v25 = vpop.eup %4082 }
 0xcdf   : > { %v4085_v29 = vpop.eup %4084 }
 0xce0   : > { %v4087_v9 = vpop.eup %4086 }
 0xce1   : > { %2533 = vrot.lane.b32.xlu1 %v4079_v47, %s4431_s6  ;;  %v4089_v27 = vpop.eup %4088 }
 0xce2   : > { %v2372_v51 = vadd.f32 1.0, %v4089_v27  ;;  %v4091_v56 = vpop.eup %4090 }
 0xce3   : > { %2531 = vrot.lane.b32.xlu0 %v4081_v36, %s4431_s6  ;;  %v5598_v31 = vadd.f32 1.0, %v4091_v56 }
 0xce4   : > { %2529 = vrot.lane.b32.xlu2 %v4083_v25, %s4431_s6  ;;  %4092 = vrcp.f32 %v2372_v51  ;;  %v2405_v43 = vand.u32 2147483648, %v2372_v51  ;;  %vm2399_vm11 = vweird.f32 %v2372_v51  ;;  %v2403_v41 = vand.u32 2147483647, %v2372_v51 }
 0xce5   : > { %4094 = vpow2.f32 %v3644_v4  ;;  %v2435_v8 = vand.u32 2147483648, %v5598_v31  ;;  %vm2429_vm15 = vweird.f32 %v5598_v31  ;;  %v2433_v19 = vand.u32 2147483647, %v5598_v31 }
 0xce6   : > { %4096 = vpow2.f32 %v3638_v38  ;;  %v2406_v16 = vor.u32 1.1754944e-38, %v2405_v43  ;;  %vm2404_vm13 = vcmp.eq.f32.partialorder %v2403_v41, 8.507059e+37 }
 0xce7   : > { %4098 = vrcp.f32 %v5598_v31  ;;  %v2436_v13 = vor.u32 1.1754944e-38, %v2435_v8  ;;  %vm2434_vm2 = vcmp.eq.f32.partialorder %v2433_v19, 8.507059e+37 }
 0xce8   : > { %4100 = vpow2.f32 %v3640_v12 }
 0xce9   : > { %4102 = vpow2.f32 %v3643_v24 }
 0xcea   : > { %v4093_v57 = vpop.eup %4092 }
 0xceb   : > { %2537 = vrot.lane.b32.xlu0 %v4085_v29, %s4431_s6  ;;  %v4095_v50 = vpop.eup %4094  ;;  %v2395_v40 = vmul.f32 %v4093_v57, %v2372_v51  ;;  %vm2400_vm10 = vweird.f32 %v4093_v57 }
 0xcec   : > { %2535 = vrot.lane.b32.xlu2 %v4087_v9, %s4431_s6  ;;  %v5601_v10 = vadd.f32 1.0, %v4095_v50  ;;  %v4097_v39 = vpop.eup %4096  ;;  %vm2401_vm12 = vmor %vm2399_vm11, %vm2400_vm10 }
 0xced   : > { %v2396_v1 = vsub.f32 1.0, %v2395_v40  ;;  %v4099_v37 = vpop.eup %4098  ;;  %v5605_v45 = vadd.f32 1.0, %v4097_v39 }
 0xcee   : > { %v4101_v2 = vpop.eup %4100  ;;  %4104 = vrcp.f32 %v5601_v10  ;;  %v2425_v20 = vmul.f32 %v4099_v37, %v5598_v31  ;;  %vm2430_vm14 = vweird.f32 %v4099_v37  ;;  %v2480_v56 = vand.u32 2147483648, %v5601_v10 }
 0xcef   : > { %v2397_v23 = vmul.f32 %v4093_v57, %v2396_v1  ;;  %4106 = vpow2.f32 %v3642_v22  ;;  %v5607_v55 = vadd.f32 1.0, %v4101_v2  ;;  %v4103_v35 = vpop.eup %4102  ;;  %vm2431_vm1 = vmor %vm2429_vm15, %vm2430_vm14  ;;  %vm2474_vm11 = vweird.f32 %v5601_v10 }
 0xcf0   : > { %v2426_v7 = vsub.f32 1.0, %v2425_v20  ;;  %4108 = vrcp.f32 %v5605_v45  ;;  %v5615_v5 = vadd.f32 1.0, %v4103_v35  ;;  %v2481_v24 = vor.u32 1.1754944e-38, %v2480_v56 }
 0xcf1   : > { %v2398_v48 = vadd.f32 %v4093_v57, %v2397_v23  ;;  %4110 = vrcp.f32 %v5607_v55  ;;  %vm2384_vm15 = vweird.f32 %v5605_v45 }
 0xcf2   : > { %v2427_v54 = vmul.f32 %v4099_v37, %v2426_v7  ;;  %4112 = vpow2.f32 %v3645_v28  ;;  %v2420_v7 = vand.u32 2147483648, %v5607_v55 }
 0xcf3   : > { %v2402_v34 = vsel %vm2401_vm12, %v4093_v57, %v2398_v48  ;;  %4114 = vrcp.f32 %v5615_v5  ;;  %v2478_v57 = vand.u32 2147483647, %v5601_v10 }
 0xcf4   : > { %v5610_v53 = vpop.eup %4104  ;;  %v5621_v44 = vsel %vm2404_vm13, %v2406_v16, %v2402_v34  ;;  %v2428_v6 = vadd.f32 %v4099_v37, %v2427_v54  ;;  %v2421_v16 = vor.u32 1.1754944e-38, %v2420_v7 }
 0xcf5   : > { %v4107_v30 = vpop.eup %4106  ;;  %v2470_v14 = vmul.f32 %v5610_v53, %v5601_v10  ;;  %vm2475_vm10 = vweird.f32 %v5610_v53  ;;  %vm2479_vm14 = vcmp.eq.f32.partialorder %v2478_v57, 8.507059e+37  ;;  %v2388_v10 = vand.u32 2147483647, %v5605_v45 }
 0xcf6   : > { %v5617_v32 = vpop.eup %4108  ;;  %v5619_v52 = vadd.f32 1.0, %v4107_v30  ;;  %v2432_v11 = vsel %vm2431_vm1, %v4099_v37, %v2428_v6  ;;  %vm2476_vm12 = vmor %vm2474_vm11, %vm2475_vm10  ;;  %v2390_v37 = vand.u32 2147483648, %v5605_v45  ;;  %vm2414_vm10 = vweird.f32 %v5607_v55 }
 0xcf7   : > { %v5623_v33 = vpop.eup %4110  ;;  %v2471_v63 = vsub.f32 1.0, %v2470_v14  ;;  %v2380_v60 = vmul.f32 %v5617_v32, %v5605_v45  ;;  %v5641_v9 = vsel %vm2434_vm2, %v2436_v13, %v2432_v11  ;;  %vm2385_vm13 = vweird.f32 %v5617_v32 }
 0xcf8   : > { %4116 = vrcp.f32 %v5619_v52  ;;  %v4113_v26 = vpop.eup %4112  ;;  %v2410_v47 = vmul.f32 %v5623_v33, %v5607_v55  ;;  %vm2415_vm1 = vweird.f32 %v5623_v33  ;;  %vm2386_vm2 = vmor %vm2384_vm15, %vm2385_vm13  ;;  %v2418_v45 = vand.u32 2147483647, %v5607_v55 }
 0xcf9   : > { %v2472_v59 = vmul.f32 %v5610_v53, %v2471_v63  ;;  %v2381_v36 = vsub.f32 1.0, %v2380_v60  ;;  %v5637_v25 = vpop.eup %4114  ;;  %v5639_v29 = vadd.f32 1.0, %v4113_v26  ;;  %v2391_v43 = vor.u32 1.1754944e-38, %v2390_v37  ;;  %vm2416_vm11 = vmor %vm2414_vm10, %vm2415_vm1 }
 0xcfa   : > { %v2411_v42 = vsub.f32 1.0, %v2410_v47  ;;  %v2455_v31 = vmul.f32 %v5637_v25, %v5615_v5  ;;  %vm2419_vm13 = vcmp.eq.f32.partialorder %v2418_v45, 8.507059e+37  ;;  %vm2459_vm15 = vweird.f32 %v5615_v5 }
 0xcfb   : > { %v2473_v4 = vadd.f32 %v5610_v53, %v2472_v59  ;;  %v2382_v38 = vmul.f32 %v5617_v32, %v2381_v36  ;;  %4118 = vrcp.f32 %v5639_v29  ;;  %v2465_v6 = vand.u32 2147483648, %v5615_v5 }
 0xcfc   : > { %v2412_v12 = vmul.f32 %v5623_v33, %v2411_v42  ;;  %v2456_v1 = vsub.f32 1.0, %v2455_v31  ;;  %v2450_v19 = vand.u32 2147483648, %v5619_v52  ;;  %vm2444_vm10 = vweird.f32 %v5619_v52 }
 0xcfd   : > { %v2477_v40 = vsel %vm2476_vm12, %v5610_v53, %v2473_v4  ;;  %v2383_v39 = vadd.f32 %v5617_v32, %v2382_v38  ;;  %vm2389_vm12 = vcmp.eq.f32.partialorder %v2388_v10, 8.507059e+37  ;;  %v2466_v47 = vor.u32 1.1754944e-38, %v2465_v6 }
 0xcfe   : > { %v5643_v27 = vpop.eup %4116  ;;  %v5665_v22 = vsel %vm2479_vm14, %v2481_v24, %v2477_v40  ;;  %v2413_v23 = vadd.f32 %v5623_v33, %v2412_v12  ;;  %v2457_v28 = vmul.f32 %v5637_v25, %v2456_v1  ;;  %vm2460_vm14 = vweird.f32 %v5637_v25 }
 0xcff   : > { %v2440_v50 = vmul.f32 %v5643_v27, %v5619_v52  ;;  %v2387_v53 = vsel %vm2386_vm2, %v5617_v32, %v2383_v39  ;;  %vm2445_vm1 = vweird.f32 %v5643_v27  ;;  %vm2461_vm2 = vmor %vm2459_vm15, %vm2460_vm14  ;;  %vm2489_vm15 = vweird.f32 %v5639_v29 }
 0xd00   : > { %v2417_v41 = vsel %vm2416_vm11, %v5623_v33, %v2413_v23  ;;  %v5682_v14 = vsel %vm2389_vm12, %v2391_v43, %v2387_v53  ;;  %v2458_v32 = vadd.f32 %v5637_v25, %v2457_v28  ;;  %v2463_v33 = vand.u32 2147483647, %v5615_v5  ;;  %vm2446_vm11 = vmor %vm2444_vm10, %vm2445_vm1 }
 0xd01   : > { %v2441_v20 = vsub.f32 1.0, %v2440_v50  ;;  %v5669_v35 = vpop.eup %4118  ;;  %v2448_v5 = vand.u32 2147483647, %v5619_v52  ;;  %v2493_v56 = vand.u32 2147483647, %v5639_v29  ;;  %v2508_v39 = vmul.f32 %v5621_v44, %v5556_v0 }
 0xd02   : > { %v2485_v34 = vmul.f32 %v5669_v35, %v5639_v29  ;;  %v2462_v26 = vsel %vm2461_vm2, %v5637_v25, %v2458_v32  ;;  %vm2464_vm12 = vcmp.eq.f32.partialorder %v2463_v33, 8.507059e+37  ;;  %vm2490_vm14 = vweird.f32 %v5669_v35 }
 0xd03   : > { %v2442_v30 = vmul.f32 %v5643_v27, %v2441_v20  ;;  %v5703_v36 = vsel %vm2464_vm12, %v2466_v47, %v2462_v26  ;;  %vm2491_vm1 = vmor %vm2489_vm15, %vm2490_vm14  ;;  %vm2494_vm2 = vcmp.eq.f32.partialorder %v2493_v56, 8.507059e+37 }
 0xd04   : > { %v2486_v60 = vsub.f32 1.0, %v2485_v34 }
 0xd05   : > { %v2443_v8 = vadd.f32 %v5643_v27, %v2442_v30 }
 0xd06   : > { %v2487_v59 = vmul.f32 %v5669_v35, %v2486_v60 }
 0xd07   : > { %v2447_v11 = vsel %vm2446_vm11, %v5643_v27, %v2443_v8  ;;  %v2495_v27 = vand.u32 2147483648, %v5639_v29 }
 0xd08   : > { %v2488_v52 = vadd.f32 %v5669_v35, %v2487_v59 }
 0xd09   : > { %v2496_v31 = vor.u32 1.1754944e-38, %v2495_v27 }
 0xd0a   : > { %v2492_v38 = vsel %vm2491_vm1, %v5669_v35, %v2488_v52 }
 0xd0b   : > { %v5717_v57 = vsel %vm2494_vm2, %v2496_v31, %v2492_v38 }
 0xd36   : > { %v2526_v18 = vpop.permute.xlu2 %2525 }
 0xd37   : > { %v2548_v61 = vmul.f32 %v2526_v18, %v5621_v44 }
 0xd39   : > { %2565 = vrot.lane.b32.xlu1 %v2548_v61, %s4432_s7  ;;  %v5687_v61 = vsel %vm2419_vm13, %v2421_v16, %v2417_v41  ;;  %vm2449_vm13 = vcmp.eq.f32.partialorder %v2448_v5, 8.507059e+37  ;;  %v2512_v16 = vmul.f32 %v5703_v36, %v5537_v15 }
 0xd3a   : > { %v2509_v40 = vmul.f32 %v5687_v61, %v5532_v3  ;;  %v2510_v3 = vmul.f32 %v5641_v9, %v5562_v62  ;;  %v2513_v62 = vmul.f32 %v5665_v22, %v5568_v46 }
 0xd3e   : > { %v2530_v17 = vpop.permute.xlu2 %2529 }
 0xd3f   : > { %v2550_v51 = vmul.f32 %v2530_v17, %v5641_v9  ;;  %v2451_v17 = vor.u32 1.1754944e-38, %v2450_v19 }
 0xd41   : > { %2569 = vrot.lane.b32.xlu1 %v2550_v51, %s4432_s7  ;;  %v5706_v51 = vsel %vm2449_vm13, %v2451_v17, %v2447_v11 }
 0xd42   : > { %v2511_v37 = vmul.f32 %v5706_v51, %v5543_v21  ;;  %v2514_v21 = vmul.f32 %v5717_v57, %v5550_v58  ;;  %v2507_v58 = vmul.f32 %v5682_v14, %v5527_v49 }
 0xd46   : > { %v2536_v2 = vpop.permute.xlu2 %2535 }
 0xd47   : > { %v2553_v48 = vmul.f32 %v2536_v2, %v5665_v22 }
 0xd49   : > { %2575 = vrot.lane.b32.xlu1 %v2553_v48, %s4432_s7 }
 0xd4b   : > { %v2524_v54 = vpop.permute.xlu1 %2523 }
 0xd4c   : > { %v2547_v55 = vmul.f32 %v2524_v54, %v5682_v14 }
 0xd4d   : > { %v2528_v18 = vpop.permute.xlu0 %2527 }
 0xd4e   : > { %v2549_v63 = vmul.f32 %v2528_v18, %v5687_v61  ;;  %2563 = vrot.lane.b32.xlu0 %v2547_v55, %s4432_s7 }
 0xd50   : > { %2567 = vrot.lane.b32.xlu2 %v2549_v63, %s4432_s7 }
 0xd53   : > { %v2534_v13 = vpop.permute.xlu1 %2533 }
 0xd54   : > { %v2552_v42 = vmul.f32 %v2534_v13, %v5703_v36 }
 0xd55   : > { %v2532_v25 = vpop.permute.xlu0 %2531 }
 0xd56   : > { %v2551_v4 = vmul.f32 %v2532_v25, %v5706_v51  ;;  %2573 = vrot.lane.b32.xlu0 %v2552_v42, %s4432_s7 }
 0xd58   : > { %2571 = vrot.lane.b32.xlu2 %v2551_v4, %s4432_s7 }
 0xd5d   : > { %v2538_v12 = vpop.permute.xlu0 %2537 }
 0xd5e   : > { %v2554_v50 = vmul.f32 %v2538_v12, %v5717_v57 }
 0xd60   : > { %2577 = vrot.lane.b32.xlu2 %v2554_v50, %s4432_s7 }
 0xdaa   : > { %v2568_v24 = vpop.permute.xlu2 %2567 }
 0xdab   : > { %v5725_v29 = vadd.f32 %v2568_v24, %v2509_v40  ;;  %v2566_v1 = vpop.permute.xlu1 %2565 }
 0xdac   : > { %v5727_v10 = vadd.f32 %v2566_v1, %v2508_v39 }
 0xdad   : > { %4120 = vtanh.f32 %v5725_v29 }
 0xdae   : > { %4122 = vtanh.f32 %v5727_v10 }
 0xdb2   : > { %v2572_v2 = vpop.permute.xlu2 %2571 }
 0xdb3   : > { %v4121_v23 = vpop.eup %4120  ;;  %v5735_v20 = vadd.f32 %v2572_v2, %v2511_v37  ;;  %v2570_v0 = vpop.permute.xlu1 %2569 }
 0xdb4   : > { %v4123_v35 = vpop.eup %4122  ;;  %v5737_v48 = vadd.f32 %v2570_v0, %v2510_v3  ;;  %2615 = vrot.lane.b32.xlu1 %v4121_v23, %s4431_s6 }
 0xdb5   : > { %4124 = vtanh.f32 %v5735_v20  ;;  %2613 = vrot.lane.b32.xlu0 %v4123_v35, %s4431_s6 }
 0xdb6   : > { %4126 = vtanh.f32 %v5737_v48 }
 0xdba   : > { %v2578_v7 = vpop.permute.xlu2 %2577 }
 0xdbb   : > { %v4125_v53 = vpop.eup %4124  ;;  %v5747_v45 = vadd.f32 %v2578_v7, %v2514_v21  ;;  %v2576_v28 = vpop.permute.xlu1 %2575 }
 0xdbc   : > { %v4127_v43 = vpop.eup %4126  ;;  %v5749_v41 = vadd.f32 %v2576_v28, %v2513_v62  ;;  %2619 = vrot.lane.b32.xlu1 %v4125_v53, %s4431_s6 }
 0xdbd   : > { %4128 = vtanh.f32 %v5747_v45  ;;  %2617 = vrot.lane.b32.xlu0 %v4127_v43, %s4431_s6 }
 0xdbe   : > { %4130 = vtanh.f32 %v5749_v41 }
 0xdc0   : > { %v2564_v30 = vpop.permute.xlu0 %2563 }
 0xdc1   : > { %v5757_v46 = vadd.f32 %v2564_v30, %v2507_v58  ;;  %v2643_v30 = vld [vmem:[#allocation2 + $0x6] sm:$0x1] }
 0xdc3   : > { %v4129_v34 = vpop.eup %4128  ;;  %4132 = vtanh.f32 %v5757_v46 }
 0xdc4   : > { %v4131_v54 = vpop.eup %4130  ;;  %2625 = vrot.lane.b32.xlu1 %v4129_v34, %s4431_s6 }
 0xdc5   : > { %2623 = vrot.lane.b32.xlu0 %v4131_v54, %s4431_s6 }
 0xdc8   : > { %v2574_v55 = vpop.permute.xlu0 %2573 }
 0xdc9   : > { %v4133_v32 = vpop.eup %4132  ;;  %v5764_v18 = vadd.f32 %v2574_v55, %v2512_v16  ;;  %v2644_v16 = vld [vmem:[#allocation2 + $0xe] sm:$0x1]  ;;  %v2645_v55 = vld [vmem:[#allocation2 + $0x16] sm:$0x1] }
 0xdca   : > { %2611 = vrot.lane.b32.xlu2 %v4133_v32, %s4431_s6 }
 0xdcb   : > { %4134 = vtanh.f32 %v5764_v18 }
 0xdd1   : > { %v4135_v49 = vpop.eup %4134 }
 0xdd2   : > { %2621 = vrot.lane.b32.xlu2 %v4135_v49, %s4431_s6 }
 0xe24   : > { %v2612_v33 = vpop.permute.xlu2 %2611 }
 0xe25   : > { %v2635_v15 = vmul.f32 %v2612_v33, %v5682_v14 }
 0xe26   : > { %v2616_v6 = vpop.permute.xlu1 %2615 }
 0xe27   : > { %v2614_v63 = vpop.permute.xlu0 %2613  ;;  %v2637_v8 = vmul.f32 %v2616_v6, %v5687_v61  ;;  %v2651_v59 = vpack.c.bf16 %v2635_v15, %v2635_v15 }
 0xe28   : > { %v2636_v60 = vmul.f32 %v2614_v63, %v5621_v44 }
 0xe29   : > { %v2653_v26 = vpack.c.bf16 %v2637_v8, %v2637_v8  ;;  %v2667_v44 = vunpack.c.l.b16 %v2651_v59 }
 0xe2a   : > { %v2652_v19 = vpack.c.bf16 %v2636_v60, %v2636_v60  ;;  %v2648_v60 = vld [vmem:[#allocation2 + $0x2e] sm:$0x1] }
 0xe2b   : > { %v2669_v42 = vunpack.c.l.b16 %v2653_v26 }
 0xe2c   : > { %v2668_v5 = vunpack.c.l.b16 %v2652_v19  ;;  %v2622_v47 = vpop.permute.xlu2 %2621  ;;  %v2646_v19 = vld [vmem:[#allocation2 + $0x1e] sm:$0x1] }
 0xe2d   : > { %v2640_v52 = vmul.f32 %v2622_v47, %v5703_v36  ;;  %v2677_v56 = vrot.slane %v2669_v42, 6 }
 0xe2e   : > { %v2620_v11 = vpop.permute.xlu1 %2619  ;;  %v2675_v4 = vrot.slane %v2668_v5, 7  ;;  %v2647_v5 = vld [vmem:[#allocation2 + $0x26] sm:$0x1] }
 0xe2f   : > { %v2639_v13 = vmul.f32 %v2620_v11, %v5706_v51  ;;  %v2618_v17 = vpop.permute.xlu0 %2617  ;;  %v2656_v12 = vpack.c.bf16 %v2640_v52, %v2640_v52  ;;  %v2650_v52 = vld [vmem:[#allocation2 + $0x3e] sm:$0x1] }
 0xe30   : > { %v2638_v25 = vmul.f32 %v2618_v17, %v5641_v9  ;;  %v2676_v31 = vsel %vm744_vm3, %v2675_v4, %v2667_v44  ;;  %v2649_v4 = vld [vmem:[#allocation2 + $0x36] sm:$0x1] }
 0xe31   : > { %v2655_v61 = vpack.c.bf16 %v2639_v13, %v2639_v13  ;;  %v2678_v9 = vsel %vm747_vm4, %v2677_v56, %v2676_v31  ;;  %v2672_v36 = vunpack.c.l.b16 %v2656_v12 }
 0xe32   : > { %v2654_v27 = vpack.c.bf16 %v2638_v25, %v2638_v25 }
 0xe33   : > { %v2671_v38 = vunpack.c.l.b16 %v2655_v61  ;;  %v2683_v21 = vrot.slane %v2672_v36, 3 }
 0xe34   : > { %v2670_v14 = vunpack.c.l.b16 %v2654_v27 }
 0xe35   : > { %v2681_v39 = vrot.slane %v2671_v38, 4 }
 0xe36   : > { %v2679_v50 = vrot.slane %v2670_v14, 5  ;;  %v2626_v40 = vpop.permute.xlu1 %2625 }
 0xe37   : > { %v2642_v51 = vmul.f32 %v2626_v40, %v5717_v57  ;;  %v2624_v24 = vpop.permute.xlu0 %2623 }
 0xe38   : > { %v2641_v1 = vmul.f32 %v2624_v24, %v5665_v22  ;;  %v2680_v37 = vsel %vm750_vm5, %v2679_v50, %v2678_v9 }
 0xe39   : > { %v2658_v2 = vpack.c.bf16 %v2642_v51, %v2642_v51  ;;  %v2682_v0 = vsel %vm753_vm6, %v2681_v39, %v2680_v37 }
 0xe3a   : > { %v2657_v3 = vpack.c.bf16 %v2641_v1, %v2641_v1  ;;  %v2684_v57 = vsel %vm756_vm7, %v2683_v21, %v2682_v0 }
 0xe3b   : > { %v2674_v23 = vunpack.c.l.b16 %v2658_v2 }
 0xe3c   : > { %v2673_v35 = vunpack.c.l.b16 %v2657_v3 }
 0xe3d   : > { %v2687_v7 = vrot.slane %v2674_v23, 1 }
 0xe3e   : > { %v2685_v62 = vrot.slane %v2673_v35, 2 }
 0xe40   : > { %v2686_v53 = vsel %vm759_vm8, %v2685_v62, %v2684_v57 }
 0xe41   : > { %v2688_v28 = vsel %vm762_vm9, %v2687_v7, %v2686_v53 }
 0xe42   : > { %v2689_v43 = vpack.c.b16 %v2688_v28, %v2688_v28 }
 0xe44   : > { %2690 = vrot.lane.b32.xlu2 %v2689_v43, %s4432_s7 }
 0xe9e   : > { %v2691_v22 = vpop.permute.xlu2 %2690 }
 0xe9f   : > { %3646 = vmatmul.msk.bf16.vlgmr.msra.gmra.mxu1 %vm305_vm0, %v2691_v22 }
 0xf1c   : > { %v2704_v58 = vpop.f32.mrf.mxu1 }
 0xf1d   : > { %v2709_v34 = vrot.slane %v2704_v58, 1  ;;  %v2710_v54 = vrot.slane %v2704_v58, 2  ;;  %v2724_v32 = vadd.f32 %v2704_v58, %v2643_v30  ;;  %v2713_v6 = vrot.slane %v2704_v58, 5 }
 0xf1e   : > { %v2711_v63 = vrot.slane %v2704_v58, 3  ;;  %v2712_v8 = vrot.slane %v2704_v58, 4  ;;  %v2714_v42 = vrot.slane %v2704_v58, 6  ;;  %v2715_v25 = vrot.slane %v2704_v58, 7 }
 0xf1f   : > { %v2725_v49 = vadd.f32 %v2709_v34, %v2644_v16  ;;  %v2726_v33 = vadd.f32 %v2710_v54, %v2645_v55  ;;  %4136 = vtanh.f32 %v2724_v32  ;;  %v2729_v15 = vadd.f32 %v2713_v6, %v2648_v60 }
 0xf20   : > { %v2727_v47 = vadd.f32 %v2711_v63, %v2646_v19  ;;  %v2728_v59 = vadd.f32 %v2712_v8, %v2647_v5  ;;  %v2730_v61 = vadd.f32 %v2714_v42, %v2649_v4  ;;  %v2731_v44 = vadd.f32 %v2715_v25, %v2650_v52 }
 0xf21   : > { %4138 = vtanh.f32 %v2725_v49  ;;  %v3647_v12 = vmul.f32 -1.442695, %v2724_v32  ;;  %v3652_v50 = vmul.f32 -1.442695, %v2729_v15  ;;  %v3648_v1 = vmul.f32 -1.442695, %v2725_v49 }
 0xf22   : > { %4140 = vtanh.f32 %v2726_v33  ;;  %v3649_v37 = vmul.f32 -1.442695, %v2726_v33  ;;  %v3651_v23 = vmul.f32 -1.442695, %v2728_v59  ;;  %v3650_v0 = vmul.f32 -1.442695, %v2727_v47 }
 0xf23   : > { %4142 = vtanh.f32 %v2729_v15  ;;  %v3654_v30 = vmul.f32 -1.442695, %v2731_v44  ;;  %v3653_v34 = vmul.f32 -1.442695, %v2730_v61 }
 0xf24   : > { %v2706_v26 = vpop.f32.mrf.mxu1  ;;  %4144 = vtanh.f32 %v2727_v47 }
 0xf25   : > { %v4137_v11 = vpop.eup %4136  ;;  %4146 = vtanh.f32 %v2728_v59 }
 0xf26   : > { %2908 = vrot.lane.b32.xlu2 %v4137_v11, %s4431_s6  ;;  %4148 = vtanh.f32 %v2730_v61 }
 0xf27   : > { %v4139_v13 = vpop.eup %4138  ;;  %4150 = vtanh.f32 %v2731_v44 }
 0xf28   : > { %v4141_v17 = vpop.eup %4140  ;;  %2910 = vrot.lane.b32.xlu0 %v4139_v13, %s4431_s6  ;;  %4152 = vpow2.f32 %v3647_v12 }
 0xf29   : > { %2912 = vrot.lane.b32.xlu1 %v4141_v17, %s4431_s6  ;;  %v4143_v27 = vpop.eup %4142  ;;  %4154 = vpow2.f32 %v3652_v50 }
 0xf2a   : > { %v4145_v56 = vpop.eup %4144 }
 0xf2b   : > { %v4147_v38 = vpop.eup %4146 }
 0xf2c   : > { %v4149_v14 = vpop.eup %4148 }
 0xf2d   : > { %v4151_v31 = vpop.eup %4150 }
 0xf2e   : > { %2918 = vrot.lane.b32.xlu2 %v4143_v27, %s4431_s6  ;;  %v4153_v40 = vpop.eup %4152 }
 0xf2f   : > { %v2756_v51 = vadd.f32 1.0, %v4153_v40  ;;  %v4155_v24 = vpop.eup %4154 }
 0xf30   : > { %2914 = vrot.lane.b32.xlu0 %v4145_v56, %s4431_s6  ;;  %v2761_v39 = vadd.f32 1.0, %v4155_v24 }
 0xf31   : > { %2916 = vrot.lane.b32.xlu1 %v4147_v38, %s4431_s6  ;;  %4156 = vrcp.f32 %v2756_v51  ;;  %v2775_v43 = vand.u32 2147483648, %v2756_v51  ;;  %vm2769_vm11 = vweird.f32 %v2756_v51  ;;  %v2773_v58 = vand.u32 2147483647, %v2756_v51 }
 0xf32   : > { %4158 = vrcp.f32 %v2761_v39  ;;  %v2850_v19 = vand.u32 2147483648, %v2761_v39  ;;  %vm2844_vm15 = vweird.f32 %v2761_v39  ;;  %v2848_v5 = vand.u32 2147483647, %v2761_v39 }
 0xf33   : > { %4160 = vpow2.f32 %v3648_v1  ;;  %v2776_v49 = vor.u32 1.1754944e-38, %v2775_v43  ;;  %vm2774_vm13 = vcmp.eq.f32.partialorder %v2773_v58, 8.507059e+37 }
 0xf34   : > { %4162 = vpow2.f32 %v3649_v37  ;;  %v2851_v17 = vor.u32 1.1754944e-38, %v2850_v19  ;;  %vm2849_vm2 = vcmp.eq.f32.partialorder %v2848_v5, 8.507059e+37 }
 0xf35   : > { %4164 = vpow2.f32 %v3651_v23 }
 0xf36   : > { %4166 = vpow2.f32 %v3650_v0 }
 0xf37   : > { %v4157_v9 = vpop.eup %4156 }
 0xf38   : > { %2920 = vrot.lane.b32.xlu0 %v4149_v14, %s4431_s6  ;;  %v2765_v36 = vmul.f32 %v4157_v9, %v2756_v51  ;;  %v4159_v3 = vpop.eup %4158  ;;  %vm2770_vm10 = vweird.f32 %v4157_v9 }
 0xf39   : > { %2922 = vrot.lane.b32.xlu1 %v4151_v31, %s4431_s6  ;;  %v2840_v21 = vmul.f32 %v4159_v3, %v2761_v39  ;;  %v4161_v7 = vpop.eup %4160  ;;  %vm2771_vm12 = vmor %vm2769_vm11, %vm2770_vm10  ;;  %vm2845_vm14 = vweird.f32 %v4159_v3 }
 0xf3a   : > { %v2766_v2 = vsub.f32 1.0, %v2765_v36  ;;  %v4163_v62 = vpop.eup %4162  ;;  %v5794_v28 = vadd.f32 1.0, %v4161_v7  ;;  %vm2846_vm1 = vmor %vm2844_vm15, %vm2845_vm14 }
 0xf3b   : > { %v2841_v53 = vsub.f32 1.0, %v2840_v21  ;;  %v5796_v22 = vadd.f32 1.0, %v4163_v62  ;;  %v4165_v54 = vpop.eup %4164 }
 0xf3c   : > { %v2767_v35 = vmul.f32 %v4157_v9, %v2766_v2  ;;  %4168 = vrcp.f32 %v5794_v28  ;;  %v4167_v32 = vpop.eup %4166  ;;  %v5805_v15 = vadd.f32 1.0, %v4165_v54  ;;  %v2790_v36 = vand.u32 2147483648, %v5794_v28 }
 0xf3d   : > { %v2842_v55 = vmul.f32 %v4159_v3, %v2841_v53  ;;  %4170 = vrcp.f32 %v5796_v22  ;;  %v5803_v60 = vadd.f32 1.0, %v4167_v32  ;;  %v2788_v23 = vand.u32 2147483647, %v5794_v28 }
 0xf3e   : > { %v2768_v57 = vadd.f32 %v4157_v9, %v2767_v35  ;;  %4172 = vpow2.f32 %v3654_v30  ;;  %v2803_v0 = vand.u32 2147483647, %v5796_v22  ;;  %v2791_v53 = vor.u32 1.1754944e-38, %v2790_v36 }
 0xf3f   : > { %4174 = vpow2.f32 %v3653_v34  ;;  %v2843_v8 = vadd.f32 %v4159_v3, %v2842_v55  ;;  %v2820_v34 = vand.u32 2147483648, %v5803_v60  ;;  %v2835_v19 = vand.u32 2147483648, %v5805_v15 }
 0xf40   : > { %v2772_v16 = vsel %vm2771_vm12, %v4157_v9, %v2768_v57  ;;  %4176 = vrcp.f32 %v5803_v60  ;;  %vm2784_vm12 = vweird.f32 %v5794_v28  ;;  %v2833_v5 = vand.u32 2147483647, %v5805_v15 }
 0xf41   : > { %v5800_v6 = vsel %vm2774_vm13, %v2776_v49, %v2772_v16  ;;  %v2847_v59 = vsel %vm2846_vm1, %v4159_v3, %v2843_v8  ;;  %4178 = vrcp.f32 %v5805_v15  ;;  %v2805_v3 = vand.u32 2147483648, %v5796_v22 }
 0xf42   : > { %v4169_v26 = vpop.eup %4168  ;;  %v5812_v52 = vsel %vm2849_vm2, %v2851_v17, %v2847_v59  ;;  %vm2799_vm13 = vweird.f32 %v5796_v22  ;;  %vm2789_vm1 = vcmp.eq.f32.partialorder %v2788_v23, 8.507059e+37  ;;  %vm2804_vm2 = vcmp.eq.f32.partialorder %v2803_v0, 8.507059e+37 }
 0xf43   : > { %v4171_v47 = vpop.eup %4170  ;;  %v2780_v42 = vmul.f32 %v4169_v26, %v5794_v28  ;;  %vm2785_vm10 = vweird.f32 %v4169_v26 }
 0xf44   : > { %v4173_v11 = vpop.eup %4172  ;;  %v2795_v25 = vmul.f32 %v4171_v47, %v5796_v22  ;;  %vm2800_vm11 = vweird.f32 %v4171_v47  ;;  %vm2786_vm14 = vmor %vm2784_vm12, %vm2785_vm10  ;;  %v2806_v22 = vor.u32 1.1754944e-38, %v2805_v3  ;;  %vm2814_vm12 = vweird.f32 %v5803_v60 }
 0xf45   : > { %v4175_v13 = vpop.eup %4174  ;;  %v2781_v44 = vsub.f32 1.0, %v2780_v42  ;;  %v5817_v56 = vadd.f32 1.0, %v4173_v11  ;;  %vm5840_vm15 = vmor %vm2799_vm13, %vm2800_vm11  ;;  %vm2829_vm13 = vweird.f32 %v5805_v15 }
 0xf46   : > { %v5815_v27 = vadd.f32 1.0, %v4175_v13  ;;  %v5819_v38 = vpop.eup %4176  ;;  %v2796_v14 = vsub.f32 1.0, %v2795_v25  ;;  %v2821_v13 = vor.u32 1.1754944e-38, %v2820_v34 }
 0xf47   : > { %v5822_v31 = vpop.eup %4178  ;;  %v2782_v12 = vmul.f32 %v4169_v26, %v2781_v44  ;;  %v2810_v50 = vmul.f32 %v5819_v38, %v5803_v60  ;;  %vm2815_vm10 = vweird.f32 %v5819_v38 }
 0xf48   : > { %4180 = vrcp.f32 %v5815_v27  ;;  %v2797_v40 = vmul.f32 %v4171_v47, %v2796_v14  ;;  %v2825_v51 = vmul.f32 %v5822_v31, %v5805_v15  ;;  %vm2830_vm11 = vweird.f32 %v5822_v31 }
 0xf49   : > { %4182 = vrcp.f32 %v5817_v56  ;;  %v2783_v24 = vadd.f32 %v4169_v26, %v2782_v12  ;;  %v2811_v39 = vsub.f32 1.0, %v2810_v50  ;;  %v2880_v12 = vand.u32 2147483648, %v5817_v56 }
 0xf4a   : > { %v2798_v1 = vadd.f32 %v4171_v47, %v2797_v40  ;;  %v2826_v37 = vsub.f32 1.0, %v2825_v51  ;;  %v2863_v50 = vand.u32 2147483647, %v5815_v27  ;;  %v2878_v40 = vand.u32 2147483647, %v5817_v56 }
 0xf4b   : > { %v2787_v21 = vsel %vm2786_vm14, %v4169_v26, %v2783_v24  ;;  %v2812_v7 = vmul.f32 %v5819_v38, %v2811_v39  ;;  %v2818_v26 = vand.u32 2147483647, %v5803_v60  ;;  %vm2816_vm14 = vmor %vm2814_vm12, %vm2815_vm10  ;;  %v2836_v60 = vor.u32 1.1754944e-38, %v2835_v19 }
 0xf4c   : > { %v2802_v57 = vsel %vm5840_vm15, %v4171_v47, %v2798_v1  ;;  %v2827_v28 = vmul.f32 %v5822_v31, %v2826_v37  ;;  %v5852_v30 = vsel %vm2789_vm1, %v2791_v53, %v2787_v21  ;;  %vm2831_vm15 = vmor %vm2829_vm13, %vm2830_vm11  ;;  %vm2859_vm12 = vweird.f32 %v5815_v27 }
 0xf4d   : > { %v5856_v16 = vsel %vm2804_vm2, %v2806_v22, %v2802_v57  ;;  %v2813_v32 = vadd.f32 %v5819_v38, %v2812_v7  ;;  %vm2819_vm1 = vcmp.eq.f32.partialorder %v2818_v26, 8.507059e+37  ;;  %vm2834_vm2 = vcmp.eq.f32.partialorder %v2833_v5, 8.507059e+37 }
 0xf4e   : > { %v5830_v9 = vpop.eup %4180  ;;  %vm2874_vm13 = vweird.f32 %v5817_v56  ;;  %v2881_v1 = vor.u32 1.1754944e-38, %v2880_v12  ;;  %v2893_v0 = vmul.f32 %v5852_v30, %v5727_v10 }
 0xf4f   : > { %v5833_v2 = vpop.eup %4182  ;;  %v2855_v62 = vmul.f32 %v5830_v9, %v5815_v27  ;;  %v2817_v47 = vsel %vm2816_vm14, %v5819_v38, %v2813_v32  ;;  %vm2860_vm10 = vweird.f32 %v5830_v9 }
 0xf50   : > { %v2870_v43 = vmul.f32 %v5833_v2, %v5817_v56  ;;  %v5876_v42 = vsel %vm2819_vm1, %v2821_v13, %v2817_v47  ;;  %vm2875_vm11 = vweird.f32 %v5833_v2  ;;  %vm2861_vm14 = vmor %vm2859_vm12, %vm2860_vm10  ;;  %vm2864_vm1 = vcmp.eq.f32.partialorder %v2863_v50, 8.507059e+37 }
 0xf51   : > { %v2856_v49 = vsub.f32 1.0, %v2855_v62  ;;  %v2897_v62 = vmul.f32 %v5812_v52, %v5764_v18 }
 0xf52   : > { %v2871_v8 = vsub.f32 1.0, %v2870_v43 }
 0xf53   : > { %v2857_v11 = vmul.f32 %v5830_v9, %v2856_v49 }
 0xf54   : > { %v2872_v17 = vmul.f32 %v5833_v2, %v2871_v8 }
 0xf55   : > { %v2858_v44 = vadd.f32 %v5830_v9, %v2857_v11 }
 0xf56   : > { %v2873_v14 = vadd.f32 %v5833_v2, %v2872_v17 }
 0xf57   : > { %v2862_v51 = vsel %vm2861_vm14, %v5830_v9, %v2858_v44  ;;  %v2892_v9 = vmul.f32 %v5800_v6, %v5757_v46  ;;  %v2895_v46 = vmul.f32 %v5876_v42, %v5737_v48 }
 0xf80   : > { %v2909_v33 = vpop.permute.xlu2 %2908 }
 0xf81   : > { %v2932_v63 = vmul.f32 %v2909_v33, %v5800_v6 }
 0xf83   : > { %2948 = vrot.lane.b32.xlu1 %v2932_v63, %s4432_s7  ;;  %v2828_v63 = vadd.f32 %v5822_v31, %v2827_v28 }
 0xf85   : > { %v2832_v59 = vsel %vm2831_vm15, %v5822_v31, %v2828_v63  ;;  %v2865_v31 = vand.u32 2147483648, %v5815_v27  ;;  %vm2876_vm15 = vmor %vm2874_vm13, %vm2875_vm11 }
 0xf86   : > { %v5878_v15 = vsel %vm2834_vm2, %v2836_v60, %v2832_v59  ;;  %v2877_v24 = vsel %vm2876_vm15, %v5833_v2, %v2873_v14  ;;  %vm2879_vm2 = vcmp.eq.f32.partialorder %v2878_v40, 8.507059e+37 }
 0xf87   : > { %v2866_v39 = vor.u32 1.1754944e-38, %v2865_v31  ;;  %v5898_v27 = vsel %vm2879_vm2, %v2881_v1, %v2877_v24 }
 0xf88   : > { %v2919_v4 = vpop.permute.xlu2 %2918 }
 0xf89   : > { %v2937_v61 = vmul.f32 %v2919_v4, %v5812_v52  ;;  %v5896_v36 = vsel %vm2864_vm1, %v2866_v39, %v2862_v51 }
 0xf8a   : > { %v2898_v18 = vmul.f32 %v5896_v36, %v5749_v41  ;;  %v2896_v41 = vmul.f32 %v5878_v15, %v5735_v20 }
 0xf8b   : > { %2958 = vrot.lane.b32.xlu1 %v2937_v61, %s4432_s7 }
 0xf9a   : > { %v2911_v58 = vpop.permute.xlu0 %2910 }
 0xf9b   : > { %v2913_v54 = vpop.permute.xlu1 %2912  ;;  %v2933_v55 = vmul.f32 %v2911_v58, %v5852_v30 }
 0xf9c   : > { %v2934_v33 = vmul.f32 %v2913_v54, %v5856_v16 }
 0xf9d   : > { %2950 = vrot.lane.b32.xlu2 %v2933_v55, %s4432_s7  ;;  %v2894_v55 = vmul.f32 %v5856_v16, %v5725_v29  ;;  %v2899_v29 = vmul.f32 %v5898_v27, %v5747_v45 }
 0xf9e   : > { %2952 = vrot.lane.b32.xlu0 %v2934_v33, %s4432_s7 }
 0xfa2   : > { %v2915_v25 = vpop.permute.xlu0 %2914 }
 0xfa3   : > { %v2917_v4 = vpop.permute.xlu1 %2916  ;;  %v2935_v61 = vmul.f32 %v2915_v25, %v5876_v42 }
 0xfa4   : > { %v2936_v38 = vmul.f32 %v2917_v4, %v5878_v15 }
 0xfa5   : > { %2954 = vrot.lane.b32.xlu2 %v2935_v61, %s4432_s7 }
 0xfa6   : > { %2956 = vrot.lane.b32.xlu0 %v2936_v38, %s4432_s7 }
 0xfaa   : > { %v2921_v37 = vpop.permute.xlu0 %2920 }
 0xfab   : > { %v2923_v3 = vpop.permute.xlu1 %2922  ;;  %v2938_v23 = vmul.f32 %v2921_v37, %v5896_v36 }
 0xfac   : > { %v2939_v56 = vmul.f32 %v2923_v3, %v5898_v27 }
 0xfad   : > { %2960 = vrot.lane.b32.xlu2 %v2938_v23, %s4432_s7 }
 0xfae   : > { %2962 = vrot.lane.b32.xlu0 %v2939_v56, %s4432_s7 }
 0xff5   : > { %v2949_v2 = vpop.permute.xlu1 %2948 }
 0xff6   : > { %v5908_v35 = vadd.f32 %v2949_v2, %v2892_v9 }
 0xff7   : > { %v2951_v21 = vpop.permute.xlu2 %2950 }
 0xff8   : > { %v5910_v7 = vadd.f32 %v2951_v21, %v2893_v0  ;;  %4184 = vtanh.f32 %v5908_v35 }
 0xffa   : > { %4186 = vtanh.f32 %v5910_v7 }
 0xffd   : > { %v2959_v57 = vpop.permute.xlu1 %2958 }
 0xffe   : > { %v4185_v53 = vpop.eup %4184  ;;  %v5918_v28 = vadd.f32 %v2959_v57, %v2897_v62 }
 0xfff   : > { %v2955_v10 = vpop.permute.xlu2 %2954  ;;  %2996 = vrot.lane.b32.xlu0 %v4185_v53, %s4431_s6 }
0x1000   : > { %v4187_v43 = vpop.eup %4186  ;;  %v5921_v22 = vadd.f32 %v2955_v10, %v2895_v46  ;;  %4188 = vtanh.f32 %v5918_v28 }
0x1001   : > { %2998 = vrot.lane.b32.xlu1 %v4187_v43, %s4431_s6 }
0x1002   : > { %4190 = vtanh.f32 %v5921_v22 }
0x1006   : > { %v4189_v58 = vpop.eup %4188 }
0x1007   : > { %v2961_v48 = vpop.permute.xlu2 %2960  ;;  %3006 = vrot.lane.b32.xlu0 %v4189_v58, %s4431_s6 }
0x1008   : > { %v4191_v34 = vpop.eup %4190  ;;  %v5929_v54 = vadd.f32 %v2961_v48, %v2898_v18 }
0x1009   : > { %3002 = vrot.lane.b32.xlu1 %v4191_v34, %s4431_s6 }
0x100a   : > { %4192 = vtanh.f32 %v5929_v54 }
0x1010   : > { %v4193_v32 = vpop.eup %4192  ;;  %v2953_v49 = vpop.permute.xlu0 %2952 }
0x1011   : > { %v5935_v33 = vadd.f32 %v2953_v49, %v2894_v55  ;;  %3008 = vrot.lane.b32.xlu1 %v4193_v32, %s4431_s6 }
0x1013   : > { %4194 = vtanh.f32 %v5935_v33 }
0x1018   : > { %v2957_v63 = vpop.permute.xlu0 %2956 }
0x1019   : > { %v4195_v8 = vpop.eup %4194  ;;  %v5941_v19 = vadd.f32 %v2957_v63, %v2896_v41  ;;  %v3028_v41 = vld [vmem:[#allocation2 + $0x7] sm:$0x1] }
0x101a   : > { %3000 = vrot.lane.b32.xlu2 %v4195_v8, %s4431_s6 }
0x101b   : > { %4196 = vtanh.f32 %v5941_v19 }
0x1020   : > { %v2963_v26 = vpop.permute.xlu0 %2962 }
0x1021   : > { %v4197_v5 = vpop.eup %4196  ;;  %v5947_v47 = vadd.f32 %v2963_v26, %v2899_v29  ;;  %v3029_v29 = vld [vmem:[#allocation2 + $0xf] sm:$0x1]  ;;  %v3030_v26 = vld [vmem:[#allocation2 + $0x17] sm:$0x1] }
0x1022   : > { %3004 = vrot.lane.b32.xlu2 %v4197_v5, %s4431_s6 }
0x1023   : > { %4198 = vtanh.f32 %v5947_v47 }
0x1029   : > { %v4199_v20 = vpop.eup %4198 }
0x102a   : > { %3010 = vrot.lane.b32.xlu2 %v4199_v20, %s4431_s6 }
0x1071   : > { %v2997_v11 = vpop.permute.xlu0 %2996 }
0x1072   : > { %v3020_v45 = vmul.f32 %v2997_v11, %v5800_v6 }
0x1073   : > { %v2999_v59 = vpop.permute.xlu1 %2998 }
0x1074   : > { %v3001_v13 = vpop.permute.xlu2 %3000  ;;  %v3021_v17 = vmul.f32 %v2999_v59, %v5852_v30  ;;  %v3036_v38 = vpack.c.bf16 %v3020_v45, %v3020_v45 }
0x1075   : > { %v3022_v60 = vmul.f32 %v3001_v13, %v5856_v16 }
0x1076   : > { %v3037_v25 = vpack.c.bf16 %v3021_v17, %v3021_v17  ;;  %v3052_v39 = vunpack.c.l.b16 %v3036_v38 }
0x1077   : > { %v3038_v4 = vpack.c.bf16 %v3022_v60, %v3022_v60  ;;  %v3033_v60 = vld [vmem:[#allocation2 + $0x2f] sm:$0x1] }
0x1078   : > { %v3053_v61 = vunpack.c.l.b16 %v3037_v25  ;;  %v3031_v25 = vld [vmem:[#allocation2 + $0x1f] sm:$0x1] }
0x1079   : > { %v3007_v44 = vpop.permute.xlu0 %3006  ;;  %v3054_v31 = vunpack.c.l.b16 %v3038_v4 }
0x107a   : > { %v3060_v40 = vrot.slane %v3053_v61, 7  ;;  %v3025_v51 = vmul.f32 %v3007_v44, %v5812_v52  ;;  %v3032_v61 = vld [vmem:[#allocation2 + $0x27] sm:$0x1] }
0x107b   : > { %v3003_v14 = vpop.permute.xlu1 %3002  ;;  %v3062_v1 = vrot.slane %v3054_v31, 6 }
0x107c   : > { %v3005_v12 = vpop.permute.xlu2 %3004  ;;  %v3023_v50 = vmul.f32 %v3003_v14, %v5876_v42  ;;  %v3061_v6 = vsel %vm744_vm3, %v3060_v40, %v3052_v39  ;;  %v3041_v3 = vpack.c.bf16 %v3025_v51, %v3025_v51  ;;  %v3034_v51 = vld [vmem:[#allocation2 + $0x37] sm:$0x1] }
0x107d   : > { %v3024_v24 = vmul.f32 %v3005_v12, %v5878_v15  ;;  %v3063_v0 = vsel %vm747_vm4, %v3062_v1, %v3061_v6 }
0x107e   : > { %v3039_v30 = vpack.c.bf16 %v3023_v50, %v3023_v50  ;;  %v3057_v52 = vunpack.c.l.b16 %v3041_v3 }
0x107f   : > { %v3040_v16 = vpack.c.bf16 %v3024_v24, %v3024_v24  ;;  %v3035_v24 = vld [vmem:[#allocation2 + $0x3f] sm:$0x1] }
0x1080   : > { %v3055_v37 = vunpack.c.l.b16 %v3039_v30  ;;  %v3068_v43 = vrot.slane %v3057_v52, 3 }
0x1081   : > { %v3056_v23 = vunpack.c.l.b16 %v3040_v16 }
0x1082   : > { %v3064_v56 = vrot.slane %v3055_v37, 5 }
0x1083   : > { %v3009_v9 = vpop.permute.xlu1 %3008  ;;  %v3066_v2 = vrot.slane %v3056_v23, 4 }
0x1084   : > { %v3011_v42 = vpop.permute.xlu2 %3010  ;;  %v3026_v21 = vmul.f32 %v3009_v9, %v5896_v36  ;;  %v3065_v15 = vsel %vm750_vm5, %v3064_v56, %v3063_v0 }
0x1085   : > { %v3027_v62 = vmul.f32 %v3011_v42, %v5898_v27  ;;  %v3067_v53 = vsel %vm753_vm6, %v3066_v2, %v3065_v15 }
0x1086   : > { %v3042_v57 = vpack.c.bf16 %v3026_v21, %v3026_v21  ;;  %v3069_v34 = vsel %vm756_vm7, %v3068_v43, %v3067_v53 }
0x1087   : > { %v3043_v46 = vpack.c.bf16 %v3027_v62, %v3027_v62 }
0x1088   : > { %v3058_v10 = vunpack.c.l.b16 %v3042_v57 }
0x1089   : > { %v3059_v18 = vunpack.c.l.b16 %v3043_v46 }
0x108a   : > { %v3070_v58 = vrot.slane %v3058_v10, 2 }
0x108b   : > { %v3072_v48 = vrot.slane %v3059_v18, 1 }
0x108c   : > { %v3071_v55 = vsel %vm759_vm8, %v3070_v58, %v3069_v34 }
0x108d   : > { %v3073_v36 = vsel %vm762_vm9, %v3072_v48, %v3071_v55 }
0x108e   : > { %v3074_v32 = vpack.c.b16 %v3073_v36, %v3073_v36 }
0x1090   : > { %3075 = vrot.lane.b32.xlu0 %v3074_v32, %s4432_s7 }
0x1102   : > { %v3076_v49 = vpop.permute.xlu0 %3075 }
0x1103   : > { %3655 = vmatmul.msk.bf16.vlgmr.msra.gmra.mxu2 %vm305_vm0, %v3076_v49 }
0x1186   : > { %v3089_v27 = vpop.f32.mrf.mxu2 }
0x1187   : > { %v3094_v63 = vrot.slane %v3089_v27, 1  ;;  %v3095_v8 = vrot.slane %v3089_v27, 2  ;;  %v3109_v5 = vadd.f32 %v3089_v27, %v3028_v41  ;;  %v3098_v59 = vrot.slane %v3089_v27, 5 }
0x1188   : > { %v3096_v13 = vrot.slane %v3089_v27, 3  ;;  %v3097_v17 = vrot.slane %v3089_v27, 4  ;;  %v3099_v50 = vrot.slane %v3089_v27, 6  ;;  %v3100_v40 = vrot.slane %v3089_v27, 7 }
0x1189   : > { %v3110_v20 = vadd.f32 %v3094_v63, %v3029_v29  ;;  %v3111_v11 = vadd.f32 %v3095_v8, %v3030_v26  ;;  %4200 = vtanh.f32 %v3109_v5  ;;  %v3114_v45 = vadd.f32 %v3098_v59, %v3033_v60 }
0x118a   : > { %v3112_v44 = vadd.f32 %v3096_v13, %v3031_v25  ;;  %v3113_v14 = vadd.f32 %v3097_v17, %v3032_v61  ;;  %v3115_v30 = vadd.f32 %v3099_v50, %v3034_v51  ;;  %v3116_v16 = vadd.f32 %v3100_v40, %v3035_v24 }
0x118b   : > { %4202 = vtanh.f32 %v3110_v20  ;;  %v3658_v23 = vmul.f32 -1.442695, %v3111_v11  ;;  %v3656_v52 = vmul.f32 -1.442695, %v3109_v5  ;;  %v3657_v62 = vmul.f32 -1.442695, %v3110_v20 }
0x118c   : > { %4204 = vtanh.f32 %v3111_v11  ;;  %v3660_v56 = vmul.f32 -1.442695, %v3113_v14  ;;  %v3663_v0 = vmul.f32 -1.442695, %v3116_v16  ;;  %v3661_v43 = vmul.f32 -1.442695, %v3114_v45 }
0x118d   : > { %4206 = vtanh.f32 %v3114_v45  ;;  %v3659_v58 = vmul.f32 -1.442695, %v3112_v44  ;;  %v3662_v29 = vmul.f32 -1.442695, %v3115_v30 }
0x118e   : > { %v3091_v4 = vpop.f32.mrf.mxu2  ;;  %4208 = vtanh.f32 %v3112_v44 }
0x118f   : > { %v4201_v38 = vpop.eup %4200  ;;  %4210 = vtanh.f32 %v3113_v14 }
0x1190   : > { %3293 = vrot.lane.b32.xlu0 %v4201_v38, %s4431_s6  ;;  %4212 = vtanh.f32 %v3115_v30 }
0x1191   : > { %v4203_v31 = vpop.eup %4202  ;;  %4214 = vtanh.f32 %v3116_v16 }
0x1192   : > { %v4205_v12 = vpop.eup %4204  ;;  %3295 = vrot.lane.b32.xlu1 %v4203_v31, %s4431_s6  ;;  %4216 = vpow2.f32 %v3658_v23 }
0x1193   : > { %3297 = vrot.lane.b32.xlu2 %v4205_v12, %s4431_s6  ;;  %v4207_v39 = vpop.eup %4206  ;;  %4218 = vpow2.f32 %v3660_v56 }
0x1194   : > { %v4209_v1 = vpop.eup %4208 }
0x1195   : > { %v4211_v37 = vpop.eup %4210 }
0x1196   : > { %v4213_v6 = vpop.eup %4212 }
0x1197   : > { %v4215_v3 = vpop.eup %4214 }
0x1198   : > { %3303 = vrot.lane.b32.xlu0 %v4207_v39, %s4431_s6  ;;  %v4217_v9 = vpop.eup %4216 }
0x1199   : > { %v3143_v2 = vadd.f32 1.0, %v4217_v9  ;;  %v4219_v42 = vpop.eup %4218 }
0x119a   : > { %3299 = vrot.lane.b32.xlu1 %v4209_v1, %s4431_s6  ;;  %v5977_v21 = vadd.f32 1.0, %v4219_v42 }
0x119b   : > { %3301 = vrot.lane.b32.xlu2 %v4211_v37, %s4431_s6  ;;  %4220 = vrcp.f32 %v3143_v2  ;;  %v3190_v8 = vand.u32 2147483648, %v3143_v2  ;;  %vm3184_vm11 = vweird.f32 %v3143_v2  ;;  %v3188_v5 = vand.u32 2147483647, %v3143_v2 }
0x119c   : > { %4222 = vpow2.f32 %v3663_v0  ;;  %v3220_v12 = vand.u32 2147483648, %v5977_v21  ;;  %vm3214_vm15 = vweird.f32 %v5977_v21  ;;  %v3218_v50 = vand.u32 2147483647, %v5977_v21 }
0x119d   : > { %4224 = vrcp.f32 %v5977_v21  ;;  %v3191_v17 = vor.u32 1.1754944e-38, %v3190_v8  ;;  %vm3189_vm13 = vcmp.eq.f32.partialorder %v3188_v5, 8.507059e+37 }
0x119e   : > { %4226 = vpow2.f32 %v3656_v52  ;;  %v3221_v16 = vor.u32 1.1754944e-38, %v3220_v12  ;;  %vm3219_vm2 = vcmp.eq.f32.partialorder %v3218_v50, 8.507059e+37 }
0x119f   : > { %4228 = vpow2.f32 %v3657_v62 }
0x11a1   : > { %v4221_v15 = vpop.eup %4220 }
0x11a2   : > { %3305 = vrot.lane.b32.xlu1 %v4213_v6, %s4431_s6  ;;  %v4223_v57 = vpop.eup %4222  ;;  %v3180_v46 = vmul.f32 %v4221_v15, %v3143_v2  ;;  %vm3185_vm10 = vweird.f32 %v4221_v15 }
0x11a3   : > { %3307 = vrot.lane.b32.xlu2 %v4215_v3, %s4431_s6  ;;  %v5980_v53 = vadd.f32 1.0, %v4223_v57  ;;  %v4225_v18 = vpop.eup %4224  ;;  %vm3186_vm12 = vmor %vm3184_vm11, %vm3185_vm10 }
0x11a4   : > { %v3181_v10 = vsub.f32 1.0, %v3180_v46  ;;  %v4227_v48 = vpop.eup %4226  ;;  %v3210_v36 = vmul.f32 %v4225_v18, %v5977_v21  ;;  %vm3215_vm14 = vweird.f32 %v4225_v18 }
0x11a5   : > { %v4229_v34 = vpop.eup %4228  ;;  %4230 = vrcp.f32 %v5980_v53  ;;  %v5984_v32 = vadd.f32 1.0, %v4227_v48  ;;  %vm3216_vm1 = vmor %vm3214_vm15, %vm3215_vm14  ;;  %vm3259_vm11 = vweird.f32 %v5980_v53  ;;  %v3265_v42 = vand.u32 2147483648, %v5980_v53 }
0x11a6   : > { %v3182_v55 = vmul.f32 %v4221_v15, %v3181_v10  ;;  %4232 = vpow2.f32 %v3661_v43  ;;  %v5986_v49 = vadd.f32 1.0, %v4229_v34  ;;  %v3211_v41 = vsub.f32 1.0, %v3210_v36 }
0x11a7   : > { %4234 = vpow2.f32 %v3659_v58  ;;  %v3263_v21 = vand.u32 2147483647, %v5980_v53  ;;  %v3266_v10 = vor.u32 1.1754944e-38, %v3265_v42  ;;  %v3160_v43 = vand.u32 2147483648, %v5984_v32 }
0x11a8   : > { %v3183_v27 = vadd.f32 %v4221_v15, %v3182_v55  ;;  %4236 = vrcp.f32 %v5984_v32  ;;  %v3212_v59 = vmul.f32 %v4225_v18, %v3211_v41  ;;  %v3158_v41 = vand.u32 2147483647, %v5984_v32 }
0x11a9   : > { %4238 = vrcp.f32 %v5986_v49  ;;  %v3173_v8 = vand.u32 2147483647, %v5986_v49  ;;  %v3161_v5 = vor.u32 1.1754944e-38, %v3160_v43 }
0x11aa   : > { %v3187_v11 = vsel %vm3186_vm12, %v4221_v15, %v3183_v27  ;;  %4240 = vpow2.f32 %v3662_v29  ;;  %v3213_v14 = vadd.f32 %v4225_v18, %v3212_v59 }
0x11ab   : > { %v5988_v63 = vpop.eup %4230  ;;  %v6000_v61 = vsel %vm3189_vm13, %v3191_v17, %v3187_v11  ;;  %vm3264_vm13 = vcmp.eq.f32.partialorder %v3263_v21, 8.507059e+37 }
0x11ac   : > { %v4233_v26 = vpop.eup %4232  ;;  %v3255_v13 = vmul.f32 %v5988_v63, %v5980_v53  ;;  %v3217_v30 = vsel %vm3216_vm1, %v4225_v18, %v3213_v14  ;;  %vm3260_vm10 = vweird.f32 %v5988_v63  ;;  %vm3154_vm1 = vweird.f32 %v5984_v32 }
0x11ad   : > { %v4235_v20 = vpop.eup %4234  ;;  %v5994_v60 = vadd.f32 1.0, %v4233_v26  ;;  %v6020_v3 = vsel %vm3219_vm2, %v3221_v16, %v3217_v30  ;;  %vm3261_vm12 = vmor %vm3259_vm11, %vm3260_vm10  ;;  %vm3169_vm10 = vweird.f32 %v5986_v49 }
0x11ae   : > { %v5996_v25 = vadd.f32 1.0, %v4235_v20  ;;  %v5998_v45 = vpop.eup %4236  ;;  %v3256_v31 = vsub.f32 1.0, %v3255_v13 }
0x11af   : > { %v6002_v44 = vpop.eup %4238  ;;  %4242 = vrcp.f32 %v5994_v60  ;;  %v3150_v40 = vmul.f32 %v5998_v45, %v5984_v32  ;;  %vm3155_vm14 = vweird.f32 %v5998_v45  ;;  %v3233_v50 = vand.u32 2147483647, %v5994_v60 }
0x11b0   : > { %4244 = vrcp.f32 %v5996_v25  ;;  %v4241_v51 = vpop.eup %4240  ;;  %v3165_v24 = vmul.f32 %v6002_v44, %v5986_v49  ;;  %v3257_v39 = vmul.f32 %v5988_v63, %v3256_v31  ;;  %vm3170_vm15 = vweird.f32 %v6002_v44  ;;  %vm3156_vm2 = vmor %vm3154_vm1, %vm3155_vm14 }
0x11b1   : > { %v3151_v1 = vsub.f32 1.0, %v3150_v40  ;;  %v6016_v37 = vadd.f32 1.0, %v4241_v51  ;;  %vm3171_vm11 = vmor %vm3169_vm10, %vm3170_vm15  ;;  %vm3229_vm1 = vweird.f32 %v5994_v60  ;;  %v3205_v40 = vand.u32 2147483648, %v5996_v25 }
0x11b2   : > { %v3166_v56 = vsub.f32 1.0, %v3165_v24  ;;  %v3258_v0 = vadd.f32 %v5988_v63, %v3257_v39  ;;  %vm3199_vm10 = vweird.f32 %v5996_v25  ;;  %v3203_v51 = vand.u32 2147483647, %v5996_v25 }
0x11b3   : > { %v3152_v52 = vmul.f32 %v5998_v45, %v3151_v1  ;;  %4246 = vrcp.f32 %v6016_v37  ;;  %v3206_v1 = vor.u32 1.1754944e-38, %v3205_v40  ;;  %v3248_v42 = vand.u32 2147483647, %v6016_v37 }
0x11b4   : > { %v3167_v62 = vmul.f32 %v6002_v44, %v3166_v56  ;;  %v3262_v46 = vsel %vm3261_vm12, %v5988_v63, %v3258_v0  ;;  %v3175_v63 = vand.u32 2147483648, %v5986_v49  ;;  %vm3159_vm12 = vcmp.eq.f32.partialorder %v3158_v41, 8.507059e+37 }
0x11b5   : > { %v6018_v6 = vpop.eup %4242  ;;  %v3153_v53 = vadd.f32 %v5998_v45, %v3152_v52  ;;  %v6042_v58 = vsel %vm3264_vm13, %v3266_v10, %v3262_v46  ;;  %vm3174_vm13 = vcmp.eq.f32.partialorder %v3173_v8, 8.507059e+37  ;;  %v3235_v49 = vand.u32 2147483648, %v5994_v60 }
0x11b6   : > { %v6022_v9 = vpop.eup %4244  ;;  %v3225_v15 = vmul.f32 %v6018_v6, %v5994_v60  ;;  %v3168_v34 = vadd.f32 %v6002_v44, %v3167_v62  ;;  %v3176_v59 = vor.u32 1.1754944e-38, %v3175_v63  ;;  %vm3230_vm14 = vweird.f32 %v6018_v6 }
0x11b7   : > { %v3195_v57 = vmul.f32 %v6022_v9, %v5996_v25  ;;  %v3157_v29 = vsel %vm3156_vm2, %v5998_v45, %v3153_v53  ;;  %vm3200_vm15 = vweird.f32 %v6022_v9  ;;  %vm3231_vm2 = vmor %vm3229_vm1, %vm3230_vm14  ;;  %v3236_v30 = vor.u32 1.1754944e-38, %v3235_v49 }
0x11b8   : > { %v3226_v18 = vsub.f32 1.0, %v3225_v15  ;;  %v3172_v20 = vsel %vm3171_vm11, %v6002_v44, %v3168_v34  ;;  %v6061_v17 = vsel %vm3159_vm12, %v3161_v5, %v3157_v29  ;;  %vm3201_vm11 = vmor %vm3199_vm10, %vm3200_vm15  ;;  %vm3234_vm12 = vcmp.eq.f32.partialorder %v3233_v50, 8.507059e+37 }
0x11b9   : > { %v3196_v55 = vsub.f32 1.0, %v3195_v57  ;;  %v6046_v36 = vpop.eup %4246  ;;  %vm3244_vm15 = vweird.f32 %v6016_v37  ;;  %v3277_v46 = vmul.f32 %v6061_v17, %v5908_v35  ;;  %v3284_v8 = vmul.f32 %v6042_v58, %v5947_v47 }
0x11ba   : > { %v3227_v26 = vmul.f32 %v6018_v6, %v3226_v18  ;;  %v3240_v32 = vmul.f32 %v6046_v36, %v6016_v37  ;;  %vm3245_vm14 = vweird.f32 %v6046_v36 }
0x11bb   : > { %v3197_v11 = vmul.f32 %v6022_v9, %v3196_v55  ;;  %vm3246_vm1 = vmor %vm3244_vm15, %vm3245_vm14 }
0x11bc   : > { %v3228_v44 = vadd.f32 %v6018_v6, %v3227_v26  ;;  %v3241_v12 = vsub.f32 1.0, %v3240_v32 }
0x11bd   : > { %v3198_v31 = vadd.f32 %v6022_v9, %v3197_v11 }
0x11be   : > { %v3232_v24 = vsel %vm3231_vm2, %v6018_v6, %v3228_v44  ;;  %v3242_v16 = vmul.f32 %v6046_v36, %v3241_v12  ;;  %vm3249_vm2 = vcmp.eq.f32.partialorder %v3248_v42, 8.507059e+37 }
0x11bf   : > { %v3202_v39 = vsel %vm3201_vm11, %v6022_v9, %v3198_v31  ;;  %v3250_v9 = vand.u32 2147483648, %v6016_v37  ;;  %v3279_v37 = vmul.f32 %v6000_v61, %v5935_v33 }
0x11c0   : > { %v3243_v6 = vadd.f32 %v6046_v36, %v3242_v16 }
0x11c1   : > { %v3251_v52 = vor.u32 1.1754944e-38, %v3250_v9 }
0x11c2   : > { %v3247_v21 = vsel %vm3246_vm1, %v6046_v36, %v3243_v6 }
0x11c3   : > { %v6096_v15 = vsel %vm3249_vm2, %v3251_v52, %v3247_v21 }
0x11c4   : > { %v3283_v49 = vmul.f32 %v6096_v15, %v5929_v54 }
0x11ed   : > { %v3298_v4 = vpop.permute.xlu2 %3297 }
0x11ee   : > { %v3319_v38 = vmul.f32 %v3298_v4, %v6000_v61 }
0x11f0   : > { %3337 = vrot.lane.b32.xlu1 %v3319_v38, %s4432_s7  ;;  %v6065_v38 = vsel %vm3174_vm13, %v3176_v59, %v3172_v20  ;;  %vm3204_vm13 = vcmp.eq.f32.partialorder %v3203_v51, 8.507059e+37 }
0x11f5   : > { %v3302_v23 = vpop.permute.xlu2 %3301 }
0x11f6   : > { %v3321_v2 = vmul.f32 %v3302_v23, %v6020_v3  ;;  %v6082_v23 = vsel %vm3234_vm12, %v3236_v30, %v3232_v24 }
0x11f8   : > { %3341 = vrot.lane.b32.xlu1 %v3321_v2, %s4432_s7  ;;  %v6085_v2 = vsel %vm3204_vm13, %v3206_v1, %v3202_v39 }
0x11f9   : > { %v3280_v47 = vmul.f32 %v6085_v2, %v5921_v22 }
0x11fd   : > { %v3308_v48 = vpop.permute.xlu2 %3307 }
0x11fe   : > { %v3324_v27 = vmul.f32 %v3308_v48, %v6042_v58  ;;  %v3282_v48 = vmul.f32 %v6082_v23, %v5918_v28 }
0x1200   : > { %3347 = vrot.lane.b32.xlu1 %v3324_v27, %s4432_s7  ;;  %v3281_v27 = vmul.f32 %v6020_v3, %v5941_v19  ;;  %v3278_v19 = vmul.f32 %v6065_v38, %v5910_v7 }
0x1202   : > { %v3294_v13 = vpop.permute.xlu0 %3293 }
0x1203   : > { %v3317_v45 = vmul.f32 %v3294_v13, %v6061_v17 }
0x1204   : > { %v3296_v4 = vpop.permute.xlu1 %3295 }
0x1205   : > { %v3318_v14 = vmul.f32 %v3296_v4, %v6065_v38  ;;  %3333 = vrot.lane.b32.xlu2 %v3317_v45, %s4432_s7 }
0x1207   : > { %3335 = vrot.lane.b32.xlu0 %v3318_v14, %s4432_s7 }
0x120a   : > { %v3304_v60 = vpop.permute.xlu0 %3303 }
0x120b   : > { %v3322_v56 = vmul.f32 %v3304_v60, %v6082_v23 }
0x120c   : > { %v3300_v0 = vpop.permute.xlu1 %3299 }
0x120d   : > { %v3320_v25 = vmul.f32 %v3300_v0, %v6085_v2  ;;  %3343 = vrot.lane.b32.xlu2 %v3322_v56, %s4432_s7 }
0x120f   : > { %3339 = vrot.lane.b32.xlu0 %v3320_v25, %s4432_s7 }
0x1214   : > { %v3306_v62 = vpop.permute.xlu1 %3305 }
0x1215   : > { %v3323_v57 = vmul.f32 %v3306_v62, %v6096_v15 }
0x1217   : > { %3345 = vrot.lane.b32.xlu0 %v3323_v57, %s4432_s7 }
0x125f   : > { %v3334_v10 = vpop.permute.xlu2 %3333 }
0x1260   : > { %v3357_v43 = vadd.f32 %v3334_v10, %v3277_v46 }
0x1262   : > { %v3338_v53 = vpop.permute.xlu1 %3337  ;;  %4248 = vtanh.f32 %v3357_v43 }
0x1263   : > { %v3359_v18 = vadd.f32 %v3338_v53, %v3279_v37 }
0x1265   : > { %4250 = vtanh.f32 %v3359_v18 }
0x1267   : > { %v3344_v34 = vpop.permute.xlu2 %3343 }
0x1268   : > { %v4249_v55 = vpop.eup %4248  ;;  %v3362_v36 = vadd.f32 %v3344_v34, %v3282_v48 }
0x1269   : > { %3381 = vrot.lane.b32.xlu1 %v4249_v55, %s4431_s6 }
0x126a   : > { %v3342_v35 = vpop.permute.xlu1 %3341  ;;  %4252 = vtanh.f32 %v3362_v36 }
0x126b   : > { %v4251_v41 = vpop.eup %4250  ;;  %v3361_v63 = vadd.f32 %v3342_v35, %v3281_v27 }
0x126c   : > { %3385 = vrot.lane.b32.xlu0 %v4251_v41, %s4431_s6 }
0x126d   : > { %4254 = vtanh.f32 %v3361_v63 }
0x1270   : > { %v4253_v33 = vpop.eup %4252 }
0x1271   : > { %3391 = vrot.lane.b32.xlu1 %v4253_v33, %s4431_s6 }
0x1272   : > { %v3348_v28 = vpop.permute.xlu1 %3347 }
0x1273   : > { %v4255_v29 = vpop.eup %4254  ;;  %v3364_v26 = vadd.f32 %v3348_v28, %v3284_v8 }
0x1274   : > { %3389 = vrot.lane.b32.xlu0 %v4255_v29, %s4431_s6 }
0x1275   : > { %4256 = vtanh.f32 %v3364_v26 }
0x1279   : > { %v3336_v5 = vpop.permute.xlu0 %3335 }
0x127a   : > { %v3358_v20 = vadd.f32 %v3336_v5, %v3278_v19 }
0x127b   : > { %v4257_v11 = vpop.eup %4256 }
0x127c   : > { %4258 = vtanh.f32 %v3358_v20  ;;  %3395 = vrot.lane.b32.xlu0 %v4257_v11, %s4431_s6 }
0x1281   : > { %v3340_v32 = vpop.permute.xlu0 %3339 }
0x1282   : > { %v4259_v59 = vpop.eup %4258  ;;  %v3360_v13 = vadd.f32 %v3340_v32, %v3280_v47 }
0x1283   : > { %3383 = vrot.lane.b32.xlu2 %v4259_v59, %s4431_s6 }
0x1284   : > { %4260 = vtanh.f32 %v3360_v13 }
0x1289   : > { %v3346_v45 = vpop.permute.xlu0 %3345 }
0x128a   : > { %v4261_v7 = vpop.eup %4260  ;;  %v3363_v4 = vadd.f32 %v3346_v45, %v3283_v49 }
0x128b   : > { %3387 = vrot.lane.b32.xlu2 %v4261_v7, %s4431_s6 }
0x128c   : > { %4262 = vtanh.f32 %v3363_v4 }
0x1292   : > { %v4263_v44 = vpop.eup %4262 }
0x1293   : > { %3393 = vrot.lane.b32.xlu2 %v4263_v44, %s4431_s6 }
0x12db   : > { %v3382_v22 = vpop.permute.xlu1 %3381 }
0x12dc   : > { %v3405_v51 = vmul.f32 %v3382_v22, %v6061_v17 }
0x12dd   : > { %v3384_v14 = vpop.permute.xlu2 %3383 }
0x12de   : > { %v3386_v31 = vpop.permute.xlu0 %3385  ;;  %v3406_v12 = vmul.f32 %v3384_v14, %v6065_v38 }
0x12df   : > { %v3407_v50 = vmul.f32 %v3386_v31, %v6000_v61 }
0x12e0   : > { %v3421_v40 = vrot.slane %v3406_v12, 7 }
0x12e1   : > { %v3423_v24 = vrot.slane %v3407_v50, 6 }
0x12e2   : > { %v3422_v16 = vsel %vm744_vm3, %v3421_v40, %v3405_v51 }
0x12e3   : > { %v3392_v60 = vpop.permute.xlu1 %3391  ;;  %v3424_v38 = vsel %vm747_vm4, %v3423_v24, %v3422_v16 }
0x12e4   : > { %v3410_v61 = vmul.f32 %v3392_v60, %v6082_v23 }
0x12e5   : > { %v3388_v54 = vpop.permute.xlu2 %3387 }
0x12e6   : > { %v3390_v30 = vpop.permute.xlu0 %3389  ;;  %v3408_v39 = vmul.f32 %v3388_v54, %v6085_v2  ;;  %v3429_v42 = vrot.slane %v3410_v61, 3 }
0x12e7   : > { %v3409_v1 = vmul.f32 %v3390_v30, %v6020_v3 }
0x12e8   : > { %v3425_v56 = vrot.slane %v3408_v39, 5 }
0x12e9   : > { %v3427_v0 = vrot.slane %v3409_v1, 4 }
0x12ea   : > { %v3426_v17 = vsel %vm750_vm5, %v3425_v56, %v3424_v38 }
0x12eb   : > { %v3428_v6 = vsel %vm753_vm6, %v3427_v0, %v3426_v17 }
0x12ec   : > { %v3430_v62 = vsel %vm756_vm7, %v3429_v42, %v3428_v6 }
0x12ed   : > { %v3394_v25 = vpop.permute.xlu2 %3393 }
0x12ee   : > { %v3396_v9 = vpop.permute.xlu0 %3395  ;;  %v3411_v2 = vmul.f32 %v3394_v25, %v6096_v15 }
0x12ef   : > { %v3412_v3 = vmul.f32 %v3396_v9, %v6042_v58 }
0x12f0   : > { %v3431_v21 = vrot.slane %v3411_v2, 2 }
0x12f1   : > { %v3433_v52 = vrot.slane %v3412_v3, 1 }
0x12f2   : > { %v3432_v57 = vsel %vm759_vm8, %v3431_v21, %v3430_v62 }
0x12f3   : > { %v3434_v23 = vsel %vm762_vm9, %v3433_v52, %v3432_v57 }
0x12f4   : > { %3435 = vrot.lane.b32.xlu1 %v3434_v23, %s4432_s7 }
0x1366   : > { %v3436_v58 = vpop.permute.xlu1 %3435 }
0x1367   : > { %3438 = vst.msk [vmem:[%s250_s23] sm:$0xff] %vm305_vm0, %v3436_v58 }
0x1368   : > { %4381 = shalt.err (!%p4378_p10)
}
0x1369   : > { %3689 = dma.vmem_to_hbm [thread:$0]  (%p4530_p3), %s3453_s25, 128, %s3455_s27, %s3440_s28  }
0x136a PF: > { %s3466_s20 = sand.u32 1, %s4412_s15   ;;  %p6197_p12 = scmp.ge.s32.totalorder %s4424_s18, 2 }
0x136b   : > { %s3467_s7 = scalar_lea.sflag [#allocation5], %s3466_s20 }
0x136c   : > { %p3703_p13 = pnand %p6197_p12, %p4493_p6 }
0x136e   : > { %p3704_p0 = pneg %p3703_p13 }
0x1370   : > { %4407 = dma.done.wait (%p3704_p0), %s3467_s7, 128  }
0x1371   : > { %4409 = vsyncadd (%p3704_p0), %s3467_s7, 4294967168  ;;  %p18_p5 = scmp.ge.s32.totalorder %s4520_s10, 4   ;;  %s6198_s15 = smov %s4416_s16 }
0x1372   : > { %s6199_s16 = smov %s4420_s17  ;;  %s6200_s17 = smov %s4536_s14 }
0x1373   : > { %s6201_s18 = smov %s4520_s10  ;;  %20 = sbr.rel (!%p18_p5) target bundleno = 6 (0x6), region = 89 }
0x1378   :  { %3473 = vsyncpa [#allocation4], 1 }
0x1379   :  { %3475 = vsyncpa [#allocation4 + $0x1], 1 }
0x137a   :  { %3476 = vsyncpa [#allocation7], 1 }
0x137b   :  { %3477 = vsyncpa [#allocation5], 1 }
0x137c   :  { %3479 = vsyncpa [#allocation5 + $0x1], 1 }

</bundles_post_ra>
